<compile_context>
chip_gen: v6e
topology: v6e:2x2x1
jax: 0.10.0
libtpu: 0.0.40
codegen_flags: <defaults>
</compile_context>

<pallas_src>
import functools

import jax
import jax.numpy as jnp
from jax.experimental import pallas as pl
from jax.experimental.pallas import tpu as pltpu

HIDDEN = 768            # TimeSformer-base hidden size
HEAD_HIDDEN = 256       # regression-head hidden size
PATCH = 16              # ViT patch size
OUT_LANES = 128         # lane-dense padded width of the scalar score output
MAX_TILE_BYTES = 8 * 1024 * 1024   # streamed pixel tile budget (VMEM-safe on v5e/v6e/v7x)


def _choose_frame_tile(num_frames, frame_bytes, max_bytes=MAX_TILE_BYTES):
    """Largest divisor of num_frames whose tile stays under max_bytes (>= 1 frame)."""
    best = 1
    for d in range(1, num_frames + 1):
        if num_frames % d == 0 and d * frame_bytes <= max_bytes:
            best = d
    return best


# --------------------------------------------------------------------------- kernel

def fused_forward_kernel(x_ref, r_ref, lb_ref, wr_ref, bp_ref,
                         w1_ref, b1_ref, w2_ref, b2_ref,
                         o_ref, acc_ref, *, tile_f, n_cp, inv_t):
    """grid = (batch "parallel", frame-tiles "arbitrary").

    Per step: acc[C*H, W] += sum over the frames in this tile (VPU adds only).
    Finalize (last frame tile): fold acc into per-patch-position sums with two constant
    pooling matmuls, apply the patch-embed matvec + bias (token mean), then the fused
    regression head, writing a lane-dense (1, 1, 128) score block.
    """
    f = pl.program_id(1)

    @pl.when(f == 0)
    def _init():
        acc_ref[...] = jnp.zeros_like(acc_ref)

    # Streaming frame-sum over this tile: the dominant, HBM-bound part of the kernel.
    s = x_ref[0, 0]                              # [C*H, W] f32
    for k in range(1, tile_f):
        s = s + x_ref[0, k]
    acc_ref[...] += s

    @pl.when(f == pl.num_programs(1) - 1)
    def _finalize():
        a = acc_ref[...]                                                     # [CH, W]
        # Column (lane) pooling: sum over patch columns iw  -> [CH, PATCH].
        acol = jnp.dot(a, r_ref[...], preferred_element_type=jnp.float32)
        # Row/channel pooling: sum over patch rows ih, grouped by channel -> [C*PATCH, PATCH].
        s2 = jnp.dot(lb_ref[...], acol, preferred_element_type=jnp.float32)

        # Patch-embed contraction: feature[h] = sum_{a,px} s2[a,px] * W_patch[a*P+px, h].
        # Done as n_cp tiny [1,P]x[P,HIDDEN] matvecs (static unrolled) to avoid any
        # in-kernel cross-lane reshape; runs once per batch element (negligible).
        feat = jnp.zeros((1, HIDDEN), jnp.float32)
        for row in range(n_cp):
            feat = feat + jnp.dot(s2[row:row + 1, :], wr_ref[row],
                                  preferred_element_type=jnp.float32)
        # Token mean; the patch-embed bias enters the mean exactly once.
        feat = feat * inv_t + bp_ref[...]

        # Fused regression head: Linear(768,256) -> ReLU -> Linear(256,1) -> Sigmoid*10.
        h = jnp.dot(feat, w1_ref[...], preferred_element_type=jnp.float32) + b1_ref[...]
        h = jnp.maximum(h, 0.0)
        sc = jnp.dot(h, w2_ref[...], preferred_element_type=jnp.float32) + b2_ref[...]
        o_ref[...] = (jax.nn.sigmoid(sc) * 10.0)[None]                       # [1, 1, 128]


# --------------------------------------------------------------------------- wrapper

def fused_forward(x, pool_r, pool_lb, w_r, b_patch, w1, b1, w2p, b2p, total_tokens):
    """x: [B, F, C*H, W] f32 (natural frame layout) -> scores [B, 1, OUT_LANES] f32."""
    bsz, num_f, ch, w = x.shape
    n_cp, p, hid = w_r.shape

    frame_bytes = ch * w * x.dtype.itemsize
    tile_f = _choose_frame_tile(num_f, frame_bytes)
    n_steps = num_f // tile_f

    kernel = functools.partial(fused_forward_kernel, tile_f=tile_f, n_cp=n_cp,
                               inv_t=1.0 / float(total_tokens))

    resident_bytes = sum(int(a.size) * a.dtype.itemsize
                         for a in (pool_r, pool_lb, w_r, b_patch, w1, b1, w2p, b2p))
    # Double-buffered streamed tile + (double-buffered) resident weights + accumulator.
    vmem_bytes = 2 * (tile_f * frame_bytes + resident_bytes) + frame_bytes + (4 << 20)
    vmem_bytes = int(min(max(vmem_bytes, 32 << 20), 100 << 20))

    dp = n_cp * p
    flops = bsz * (num_f * ch * w                 # frame-sum adds
                   + 2 * ch * w * p               # column pooling matmul
                   + 2 * n_cp * ch * p            # row/channel pooling matmul
                   + 2 * dp * hid                 # patch-embed matvec
                   + 2 * hid * HEAD_HIDDEN        # head fc1
                   + 2 * HEAD_HIDDEN * OUT_LANES) # head fc2 (lane-padded)
    bytes_accessed = (int(x.size) * x.dtype.itemsize + resident_bytes
                      + bsz * OUT_LANES * 4)

    return pl.pallas_call(
        kernel,
        out_shape=jax.ShapeDtypeStruct((bsz, 1, OUT_LANES), jnp.float32),
        grid=(bsz, n_steps),
        in_specs=[
            pl.BlockSpec((1, tile_f, ch, w), lambda i, f: (i, f, 0, 0)),   # streamed pixels
            pl.BlockSpec((w, p), lambda i, f: (0, 0)),                     # column pool matrix
            pl.BlockSpec((n_cp, ch), lambda i, f: (0, 0)),                 # row/channel pool matrix
            pl.BlockSpec((n_cp, p, hid), lambda i, f: (0, 0, 0)),          # patch-embed weight
            pl.BlockSpec((1, hid), lambda i, f: (0, 0)),                   # patch-embed bias
            pl.BlockSpec((hid, HEAD_HIDDEN), lambda i, f: (0, 0)),         # head fc1 weight
            pl.BlockSpec((1, HEAD_HIDDEN), lambda i, f: (0, 0)),           # head fc1 bias
            pl.BlockSpec((HEAD_HIDDEN, OUT_LANES), lambda i, f: (0, 0)),   # head fc2 weight (padded)
            pl.BlockSpec((1, OUT_LANES), lambda i, f: (0, 0)),             # head fc2 bias (padded)
        ],
        out_specs=pl.BlockSpec((1, 1, OUT_LANES), lambda i, f: (i, 0, 0)),
        scratch_shapes=[pltpu.VMEM((ch, w), jnp.float32)],                 # frame-sum accumulator
        compiler_params=pltpu.CompilerParams(
            dimension_semantics=("parallel", "arbitrary"),
            vmem_limit_bytes=vmem_bytes),
        cost_estimate=pl.CostEstimate(
            flops=int(flops), transcendentals=bsz * OUT_LANES,
            bytes_accessed=int(bytes_accessed)),
    )(x, pool_r, pool_lb, w_r, b_patch, w1, b1, w2p, b2p)


def init_params(key):
    k1, k2, k3, k4 = jax.random.split(key, 4)
    dp = 3 * PATCH * PATCH
    return {
        "w_patch": jax.random.normal(k1, (dp, HIDDEN), jnp.float32) * 0.02,
        "b_patch": jnp.zeros((1, HIDDEN), jnp.float32),
        "w1": jax.random.normal(k2, (HIDDEN, HEAD_HIDDEN), jnp.float32) * 0.02,
        "b1": jnp.zeros((1, HEAD_HIDDEN), jnp.float32),
        "w2": jax.random.normal(k3, (HEAD_HIDDEN, 1), jnp.float32) * 0.05,
        "b2": jax.random.normal(k4, (1, 1), jnp.float32) * 0.05,
    }


@jax.jit
def video_score_predictor(pixel_values, params):
    """Forward pass. pixel_values: [B, F, C, H, W] float32 -> scores [B] in [0, 10]."""
    B, F, C, H, W = pixel_values.shape
    # TODO(synk): the reference PyTorch permute-when-shape[2]==3 branch conflicts with its
    # own unpacking/view; we use the intended [B, F, C, H, W] interpretation directly.
    nH, nW = H // PATCH, W // PATCH
    T = F * nH * nW
    CH = C * H
    CP = C * PATCH

    # Free, contiguous reshape (no transpose / no cast => no extra HBM pass over pixels).
    x = pixel_values.reshape(B, F, CH, W)

    # Tiny constant pooling matrices (trace-time, a few KB):
    #   pool_r[x, px]  = 1  iff  x % PATCH == px                       (column fold)
    #   pool_lb[a, ch] = 1  iff  ch//H == a//PATCH and (ch%H)%PATCH == a%PATCH   (row fold)
    lane = jnp.arange(W, dtype=jnp.int32)
    pool_r = (lane[:, None] % PATCH == jnp.arange(PATCH, dtype=jnp.int32)[None, :]
              ).astype(jnp.float32)                                            # [W, PATCH]
    chv = jnp.arange(CH, dtype=jnp.int32)
    rowv = jnp.arange(CP, dtype=jnp.int32)
    pool_lb = ((chv[None, :] // H == rowv[:, None] // PATCH)
               & ((chv[None, :] % H) % PATCH == rowv[:, None] % PATCH)
               ).astype(jnp.float32)                                           # [CP, CH]

    # Free weight rearrangements (done in the wrapper, tiny tensors).
    w_r = params["w_patch"].reshape(CP, PATCH, HIDDEN)
    w2p = jnp.pad(params["w2"], ((0, 0), (0, OUT_LANES - 1)))   # [256, 128], col 0 is real
    b2p = jnp.pad(params["b2"], ((0, 0), (0, OUT_LANES - 1)))   # [1, 128]

    out = fused_forward(x, pool_r, pool_lb, w_r, params["b_patch"],
                        params["w1"], params["b1"], w2p, b2p, T)
    return out[:, 0, 0]   # == (sigmoid(...) * 10).squeeze(-1), shape [B]


# --------------------------------------------------------------------------- main

if __name__ == "__main__":
    key = jax.random.PRNGKey(0)
    k_in, k_par = jax.random.split(key)

    # Small but consistent shapes: batch=2, frames=4, channels=3, 32x32 images (2x2 patches).
    pixel_values = jax.random.normal(k_in, (2, 4, 3, 32, 32), dtype=jnp.float32)
    params = init_params(k_par)

    scores = video_score_predictor(pixel_values, params)
    scores = jax.block_until_ready(scores)

    assert scores.shape == (2,)
    assert bool(jnp.all((scores >= 0.0) & (scores <= 10.0)))
    print("KERNEL_OK")
</pallas_src>

<mosaic_0001>
module attributes {stable_mosaic.version = 11 : i64} {
  func.func @fused_forward_kernel(%arg0: i32, %arg1: i32, %arg2: memref<1x4x96x32xf32, #tpu.memory_space<vmem>>, %arg3: memref<32x16xf32, #tpu.memory_space<vmem>>, %arg4: memref<48x96xf32, #tpu.memory_space<vmem>>, %arg5: memref<48x16x768xf32, #tpu.memory_space<vmem>>, %arg6: memref<1x768xf32, #tpu.memory_space<vmem>>, %arg7: memref<768x256xf32, #tpu.memory_space<vmem>>, %arg8: memref<1x256xf32, #tpu.memory_space<vmem>>, %arg9: memref<256x128xf32, #tpu.memory_space<vmem>>, %arg10: memref<1x128xf32, #tpu.memory_space<vmem>>, %arg11: memref<1x1x128xf32, #tpu.memory_space<vmem>>, %arg12: memref<96x32xf32, #tpu.memory_space<vmem>>) attributes {dimension_semantics = [#tpu.dimension_semantics<parallel>, #tpu.dimension_semantics<arbitrary>], iteration_bounds = array<i64: 2, 1>, scalar_prefetch = 0 : i64, scratch_operands = 1 : i64, tpu.core_type = #tpu.core_type<tc>, window_params = [{transform_indices = @transform_0, window_bounds = array<i64: 1, 4, 96, 32>}, {pipeline_mode = #tpu.pipeline_mode<synchronous>, transform_indices = @transform_1, window_bounds = array<i64: 32, 16>}, {pipeline_mode = #tpu.pipeline_mode<synchronous>, transform_indices = @transform_2, window_bounds = array<i64: 48, 96>}, {pipeline_mode = #tpu.pipeline_mode<synchronous>, transform_indices = @transform_3, window_bounds = array<i64: 48, 16, 768>}, {pipeline_mode = #tpu.pipeline_mode<synchronous>, transform_indices = @transform_4, window_bounds = array<i64: 1, 768>}, {pipeline_mode = #tpu.pipeline_mode<synchronous>, transform_indices = @transform_5, window_bounds = array<i64: 768, 256>}, {pipeline_mode = #tpu.pipeline_mode<synchronous>, transform_indices = @transform_6, window_bounds = array<i64: 1, 256>}, {pipeline_mode = #tpu.pipeline_mode<synchronous>, transform_indices = @transform_7, window_bounds = array<i64: 256, 128>}, {pipeline_mode = #tpu.pipeline_mode<synchronous>, transform_indices = @transform_8, window_bounds = array<i64: 1, 128>}, {transform_indices = @transform_9, window_bounds = array<i64: 1, 1, 128>}]} {
    %c0_i32 = arith.constant 0 : i32
    %0 = arith.cmpi eq, %arg1, %c0_i32 : i32
    %1 = arith.extui %0 : i1 to i32
    %c0_i32_0 = arith.constant 0 : i32
    %2 = arith.cmpi ne, %1, %c0_i32_0 : i32
    scf.if %2 {
      %cst = arith.constant 0.000000e+00 : f32
      %20 = vector.broadcast %cst : f32 to vector<96x32xf32>
      %c0_19 = arith.constant 0 : index
      %c0_20 = arith.constant 0 : index
      %21 = vector.load %arg12[%c0_19, %c0_20] : memref<96x32xf32, #tpu.memory_space<vmem>>, vector<96x32xf32>
      tpu.vector_store %arg12[%c0_19, %c0_20], %20 {strides = array<i32>} : memref<96x32xf32, #tpu.memory_space<vmem>>, vector<96x32xf32>,
    } else {
    }
    %c0 = arith.constant 0 : index
    %c0_1 = arith.constant 0 : index
    %c0_2 = arith.constant 0 : index
    %c0_3 = arith.constant 0 : index
    %3 = vector.load %arg2[%c0, %c0_1, %c0_2, %c0_3] : memref<1x4x96x32xf32, #tpu.memory_space<vmem>>, vector<1x1x96x32xf32>
    %4 = vector.shape_cast %3 : vector<1x1x96x32xf32> to vector<96x32xf32>
    %c0_4 = arith.constant 0 : index
    %c1 = arith.constant 1 : index
    %c0_5 = arith.constant 0 : index
    %c0_6 = arith.constant 0 : index
    %5 = vector.load %arg2[%c0_4, %c1, %c0_5, %c0_6] : memref<1x4x96x32xf32, #tpu.memory_space<vmem>>, vector<1x1x96x32xf32>
    %6 = vector.shape_cast %5 : vector<1x1x96x32xf32> to vector<96x32xf32>
    %7 = arith.addf %4, %6 : vector<96x32xf32>
    %c0_7 = arith.constant 0 : index
    %c2 = arith.constant 2 : index
    %c0_8 = arith.constant 0 : index
    %c0_9 = arith.constant 0 : index
    %8 = vector.load %arg2[%c0_7, %c2, %c0_8, %c0_9] : memref<1x4x96x32xf32, #tpu.memory_space<vmem>>, vector<1x1x96x32xf32>
    %9 = vector.shape_cast %8 : vector<1x1x96x32xf32> to vector<96x32xf32>
    %10 = arith.addf %7, %9 : vector<96x32xf32>
    %c0_10 = arith.constant 0 : index
    %c3 = arith.constant 3 : index
    %c0_11 = arith.constant 0 : index
    %c0_12 = arith.constant 0 : index
    %11 = vector.load %arg2[%c0_10, %c3, %c0_11, %c0_12] : memref<1x4x96x32xf32, #tpu.memory_space<vmem>>, vector<1x1x96x32xf32>
    %12 = vector.shape_cast %11 : vector<1x1x96x32xf32> to vector<96x32xf32>
    %13 = arith.addf %10, %12 : vector<96x32xf32>
    %c0_13 = arith.constant 0 : index
    %c0_14 = arith.constant 0 : index
    %14 = vector.load %arg12[%c0_13, %c0_14] : memref<96x32xf32, #tpu.memory_space<vmem>>, vector<96x32xf32>
    %15 = arith.addf %14, %13 : vector<96x32xf32>
    %c0_15 = arith.constant 0 : index
    %c0_16 = arith.constant 0 : index
    %16 = vector.load %arg12[%c0_15, %c0_16] : memref<96x32xf32, #tpu.memory_space<vmem>>, vector<96x32xf32>
    tpu.vector_store %arg12[%c0_15, %c0_16], %15 {strides = array<i32>} : memref<96x32xf32, #tpu.memory_space<vmem>>, vector<96x32xf32>,
    %c0_i32_17 = arith.constant 0 : i32
    %17 = arith.cmpi eq, %arg1, %c0_i32_17 : i32
    %18 = arith.extui %17 : i1 to i32
    %c0_i32_18 = arith.constant 0 : i32
    %19 = arith.cmpi ne, %18, %c0_i32_18 : i32
    scf.if %19 {
      %c0_19 = arith.constant 0 : index
      %c0_20 = arith.constant 0 : index
      %20 = vector.load %arg12[%c0_19, %c0_20] : memref<96x32xf32, #tpu.memory_space<vmem>>, vector<96x32xf32>
      %c0_21 = arith.constant 0 : index
      %c0_22 = arith.constant 0 : index
      %21 = vector.load %arg3[%c0_21, %c0_22] : memref<32x16xf32, #tpu.memory_space<vmem>>, vector<32x16xf32>
      %cst = arith.constant dense<0.000000e+00> : vector<96x16xf32>
      %22 = tpu.matmul %20, %21, %cst {dimension_numbers = #tpu.dot_dimension_numbers<[1], [0], [0], [1], [0, 0, 1, 1], [], []>} : vector<96x32xf32>, vector<32x16xf32>, vector<96x16xf32> -> vector<96x16xf32>
      %c0_23 = arith.constant 0 : index
      %c0_24 = arith.constant 0 : index
      %23 = vector.load %arg4[%c0_23, %c0_24] : memref<48x96xf32, #tpu.memory_space<vmem>>, vector<48x96xf32>
      %cst_25 = arith.constant dense<0.000000e+00> : vector<48x16xf32>
      %24 = tpu.matmul %23, %22, %cst_25 {dimension_numbers = #tpu.dot_dimension_numbers<[1], [0], [0], [1], [0, 0, 1, 1], [], []>} : vector<48x96xf32>, vector<96x16xf32>, vector<48x16xf32> -> vector<48x16xf32>
      %cst_26 = arith.constant 0.000000e+00 : f32
      %25 = vector.broadcast %cst_26 : f32 to vector<1x768xf32>
      %26 = vector.extract_strided_slice %24 {offsets = [0, 0], sizes = [1, 16], strides = [1, 1]} : vector<48x16xf32> to vector<1x16xf32>
      %c0_27 = arith.constant 0 : index
      %c0_28 = arith.constant 0 : index
      %c0_29 = arith.constant 0 : index
      %27 = vector.load %arg5[%c0_27, %c0_28, %c0_29] : memref<48x16x768xf32, #tpu.memory_space<vmem>>, vector<1x16x768xf32>
      %28 = vector.shape_cast %27 : vector<1x16x768xf32> to vector<16x768xf32>
      %cst_30 = arith.constant dense<0.000000e+00> : vector<1x768xf32>
      %29 = tpu.matmul %26, %28, %cst_30 {dimension_numbers = #tpu.dot_dimension_numbers<[1], [0], [0], [1], [0, 0, 1, 1], [], []>} : vector<1x16xf32>, vector<16x768xf32>, vector<1x768xf32> -> vector<1x768xf32>
      %30 = arith.addf %25, %29 : vector<1x768xf32>
      %31 = vector.extract_strided_slice %24 {offsets = [1, 0], sizes = [1, 16], strides = [1, 1]} : vector<48x16xf32> to vector<1x16xf32>
      %c1_31 = arith.constant 1 : index
      %c0_32 = arith.constant 0 : index
      %c0_33 = arith.constant 0 : index
      %32 = vector.load %arg5[%c1_31, %c0_32, %c0_33] : memref<48x16x768xf32, #tpu.memory_space<vmem>>, vector<1x16x768xf32>
      %33 = vector.shape_cast %32 : vector<1x16x768xf32> to vector<16x768xf32>
      %cst_34 = arith.constant dense<0.000000e+00> : vector<1x768xf32>
      %34 = tpu.matmul %31, %33, %cst_34 {dimension_numbers = #tpu.dot_dimension_numbers<[1], [0], [0], [1], [0, 0, 1, 1], [], []>} : vector<1x16xf32>, vector<16x768xf32>, vector<1x768xf32> -> vector<1x768xf32>
      %35 = arith.addf %30, %34 : vector<1x768xf32>
      %36 = vector.extract_strided_slice %24 {offsets = [2, 0], sizes = [1, 16], strides = [1, 1]} : vector<48x16xf32> to vector<1x16xf32>
      %c2_35 = arith.constant 2 : index
      %c0_36 = arith.constant 0 : index
      %c0_37 = arith.constant 0 : index
      %37 = vector.load %arg5[%c2_35, %c0_36, %c0_37] : memref<48x16x768xf32, #tpu.memory_space<vmem>>, vector<1x16x768xf32>
      %38 = vector.shape_cast %37 : vector<1x16x768xf32> to vector<16x768xf32>
      %cst_38 = arith.constant dense<0.000000e+00> : vector<1x768xf32>
      %39 = tpu.matmul %36, %38, %cst_38 {dimension_numbers = #tpu.dot_dimension_numbers<[1], [0], [0], [1], [0, 0, 1, 1], [], []>} : vector<1x16xf32>, vector<16x768xf32>, vector<1x768xf32> -> vector<1x768xf32>
      %40 = arith.addf %35, %39 : vector<1x768xf32>
      %41 = vector.extract_strided_slice %24 {offsets = [3, 0], sizes = [1, 16], strides = [1, 1]} : vector<48x16xf32> to vector<1x16xf32>
      %c3_39 = arith.constant 3 : index
      %c0_40 = arith.constant 0 : index
      %c0_41 = arith.constant 0 : index
      %42 = vector.load %arg5[%c3_39, %c0_40, %c0_41] : memref<48x16x768xf32, #tpu.memory_space<vmem>>, vector<1x16x768xf32>
      %43 = vector.shape_cast %42 : vector<1x16x768xf32> to vector<16x768xf32>
      %cst_42 = arith.constant dense<0.000000e+00> : vector<1x768xf32>
      %44 = tpu.matmul %41, %43, %cst_42 {dimension_numbers = #tpu.dot_dimension_numbers<[1], [0], [0], [1], [0, 0, 1, 1], [], []>} : vector<1x16xf32>, vector<16x768xf32>, vector<1x768xf32> -> vector<1x768xf32>
      %45 = arith.addf %40, %44 : vector<1x768xf32>
      %46 = vector.extract_strided_slice %24 {offsets = [4, 0], sizes = [1, 16], strides = [1, 1]} : vector<48x16xf32> to vector<1x16xf32>
      %c4 = arith.constant 4 : index
      %c0_43 = arith.constant 0 : index
      %c0_44 = arith.constant 0 : index
      %47 = vector.load %arg5[%c4, %c0_43, %c0_44] : memref<48x16x768xf32, #tpu.memory_space<vmem>>, vector<1x16x768xf32>
      %48 = vector.shape_cast %47 : vector<1x16x768xf32> to vector<16x768xf32>
      %cst_45 = arith.constant dense<0.000000e+00> : vector<1x768xf32>
      %49 = tpu.matmul %46, %48, %cst_45 {dimension_numbers = #tpu.dot_dimension_numbers<[1], [0], [0], [1], [0, 0, 1, 1], [], []>} : vector<1x16xf32>, vector<16x768xf32>, vector<1x768xf32> -> vector<1x768xf32>
      %50 = arith.addf %45, %49 : vector<1x768xf32>
      %51 = vector.extract_strided_slice %24 {offsets = [5, 0], sizes = [1, 16], strides = [1, 1]} : vector<48x16xf32> to vector<1x16xf32>
      %c5 = arith.constant 5 : index
      %c0_46 = arith.constant 0 : index
      %c0_47 = arith.constant 0 : index
      %52 = vector.load %arg5[%c5, %c0_46, %c0_47] : memref<48x16x768xf32, #tpu.memory_space<vmem>>, vector<1x16x768xf32>
      %53 = vector.shape_cast %52 : vector<1x16x768xf32> to vector<16x768xf32>
      %cst_48 = arith.constant dense<0.000000e+00> : vector<1x768xf32>
      %54 = tpu.matmul %51, %53, %cst_48 {dimension_numbers = #tpu.dot_dimension_numbers<[1], [0], [0], [1], [0, 0, 1, 1], [], []>} : vector<1x16xf32>, vector<16x768xf32>, vector<1x768xf32> -> vector<1x768xf32>
      %55 = arith.addf %50, %54 : vector<1x768xf32>
      %56 = vector.extract_strided_slice %24 {offsets = [6, 0], sizes = [1, 16], strides = [1, 1]} : vector<48x16xf32> to vector<1x16xf32>
      %c6 = arith.constant 6 : index
      %c0_49 = arith.constant 0 : index
      %c0_50 = arith.constant 0 : index
      %57 = vector.load %arg5[%c6, %c0_49, %c0_50] : memref<48x16x768xf32, #tpu.memory_space<vmem>>, vector<1x16x768xf32>
      %58 = vector.shape_cast %57 : vector<1x16x768xf32> to vector<16x768xf32>
      %cst_51 = arith.constant dense<0.000000e+00> : vector<1x768xf32>
      %59 = tpu.matmul %56, %58, %cst_51 {dimension_numbers = #tpu.dot_dimension_numbers<[1], [0], [0], [1], [0, 0, 1, 1], [], []>} : vector<1x16xf32>, vector<16x768xf32>, vector<1x768xf32> -> vector<1x768xf32>
      %60 = arith.addf %55, %59 : vector<1x768xf32>
      %61 = vector.extract_strided_slice %24 {offsets = [7, 0], sizes = [1, 16], strides = [1, 1]} : vector<48x16xf32> to vector<1x16xf32>
      %c7 = arith.constant 7 : index
      %c0_52 = arith.constant 0 : index
      %c0_53 = arith.constant 0 : index
      %62 = vector.load %arg5[%c7, %c0_52, %c0_53] : memref<48x16x768xf32, #tpu.memory_space<vmem>>, vector<1x16x768xf32>
      %63 = vector.shape_cast %62 : vector<1x16x768xf32> to vector<16x768xf32>
      %cst_54 = arith.constant dense<0.000000e+00> : vector<1x768xf32>
      %64 = tpu.matmul %61, %63, %cst_54 {dimension_numbers = #tpu.dot_dimension_numbers<[1], [0], [0], [1], [0, 0, 1, 1], [], []>} : vector<1x16xf32>, vector<16x768xf32>, vector<1x768xf32> -> vector<1x768xf32>
      %65 = arith.addf %60, %64 : vector<1x768xf32>
      %66 = vector.extract_strided_slice %24 {offsets = [8, 0], sizes = [1, 16], strides = [1, 1]} : vector<48x16xf32> to vector<1x16xf32>
      %c8 = arith.constant 8 : index
      %c0_55 = arith.constant 0 : index
      %c0_56 = arith.constant 0 : index
      %67 = vector.load %arg5[%c8, %c0_55, %c0_56] : memref<48x16x768xf32, #tpu.memory_space<vmem>>, vector<1x16x768xf32>
      %68 = vector.shape_cast %67 : vector<1x16x768xf32> to vector<16x768xf32>
      %cst_57 = arith.constant dense<0.000000e+00> : vector<1x768xf32>
      %69 = tpu.matmul %66, %68, %cst_57 {dimension_numbers = #tpu.dot_dimension_numbers<[1], [0], [0], [1], [0, 0, 1, 1], [], []>} : vector<1x16xf32>, vector<16x768xf32>, vector<1x768xf32> -> vector<1x768xf32>
      %70 = arith.addf %65, %69 : vector<1x768xf32>
      %71 = vector.extract_strided_slice %24 {offsets = [9, 0], sizes = [1, 16], strides = [1, 1]} : vector<48x16xf32> to vector<1x16xf32>
      %c9 = arith.constant 9 : index
      %c0_58 = arith.constant 0 : index
      %c0_59 = arith.constant 0 : index
      %72 = vector.load %arg5[%c9, %c0_58, %c0_59] : memref<48x16x768xf32, #tpu.memory_space<vmem>>, vector<1x16x768xf32>
      %73 = vector.shape_cast %72 : vector<1x16x768xf32> to vector<16x768xf32>
      %cst_60 = arith.constant dense<0.000000e+00> : vector<1x768xf32>
      %74 = tpu.matmul %71, %73, %cst_60 {dimension_numbers = #tpu.dot_dimension_numbers<[1], [0], [0], [1], [0, 0, 1, 1], [], []>} : vector<1x16xf32>, vector<16x768xf32>, vector<1x768xf32> -> vector<1x768xf32>
      %75 = arith.addf %70, %74 : vector<1x768xf32>
      %76 = vector.extract_strided_slice %24 {offsets = [10, 0], sizes = [1, 16], strides = [1, 1]} : vector<48x16xf32> to vector<1x16xf32>
      %c10 = arith.constant 10 : index
      %c0_61 = arith.constant 0 : index
      %c0_62 = arith.constant 0 : index
      %77 = vector.load %arg5[%c10, %c0_61, %c0_62] : memref<48x16x768xf32, #tpu.memory_space<vmem>>, vector<1x16x768xf32>
      %78 = vector.shape_cast %77 : vector<1x16x768xf32> to vector<16x768xf32>
      %cst_63 = arith.constant dense<0.000000e+00> : vector<1x768xf32>
      %79 = tpu.matmul %76, %78, %cst_63 {dimension_numbers = #tpu.dot_dimension_numbers<[1], [0], [0], [1], [0, 0, 1, 1], [], []>} : vector<1x16xf32>, vector<16x768xf32>, vector<1x768xf32> -> vector<1x768xf32>
      %80 = arith.addf %75, %79 : vector<1x768xf32>
      %81 = vector.extract_strided_slice %24 {offsets = [11, 0], sizes = [1, 16], strides = [1, 1]} : vector<48x16xf32> to vector<1x16xf32>
      %c11 = arith.constant 11 : index
      %c0_64 = arith.constant 0 : index
      %c0_65 = arith.constant 0 : index
      %82 = vector.load %arg5[%c11, %c0_64, %c0_65] : memref<48x16x768xf32, #tpu.memory_space<vmem>>, vector<1x16x768xf32>
      %83 = vector.shape_cast %82 : vector<1x16x768xf32> to vector<16x768xf32>
      %cst_66 = arith.constant dense<0.000000e+00> : vector<1x768xf32>
      %84 = tpu.matmul %81, %83, %cst_66 {dimension_numbers = #tpu.dot_dimension_numbers<[1], [0], [0], [1], [0, 0, 1, 1], [], []>} : vector<1x16xf32>, vector<16x768xf32>, vector<1x768xf32> -> vector<1x768xf32>
      %85 = arith.addf %80, %84 : vector<1x768xf32>
      %86 = vector.extract_strided_slice %24 {offsets = [12, 0], sizes = [1, 16], strides = [1, 1]} : vector<48x16xf32> to vector<1x16xf32>
      %c12 = arith.constant 12 : index
      %c0_67 = arith.constant 0 : index
      %c0_68 = arith.constant 0 : index
      %87 = vector.load %arg5[%c12, %c0_67, %c0_68] : memref<48x16x768xf32, #tpu.memory_space<vmem>>, vector<1x16x768xf32>
      %88 = vector.shape_cast %87 : vector<1x16x768xf32> to vector<16x768xf32>
      %cst_69 = arith.constant dense<0.000000e+00> : vector<1x768xf32>
      %89 = tpu.matmul %86, %88, %cst_69 {dimension_numbers = #tpu.dot_dimension_numbers<[1], [0], [0], [1], [0, 0, 1, 1], [], []>} : vector<1x16xf32>, vector<16x768xf32>, vector<1x768xf32> -> vector<1x768xf32>
      %90 = arith.addf %85, %89 : vector<1x768xf32>
      %91 = vector.extract_strided_slice %24 {offsets = [13, 0], sizes = [1, 16], strides = [1, 1]} : vector<48x16xf32> to vector<1x16xf32>
      %c13 = arith.constant 13 : index
      %c0_70 = arith.constant 0 : index
      %c0_71 = arith.constant 0 : index
      %92 = vector.load %arg5[%c13, %c0_70, %c0_71] : memref<48x16x768xf32, #tpu.memory_space<vmem>>, vector<1x16x768xf32>
      %93 = vector.shape_cast %92 : vector<1x16x768xf32> to vector<16x768xf32>
      %cst_72 = arith.constant dense<0.000000e+00> : vector<1x768xf32>
      %94 = tpu.matmul %91, %93, %cst_72 {dimension_numbers = #tpu.dot_dimension_numbers<[1], [0], [0], [1], [0, 0, 1, 1], [], []>} : vector<1x16xf32>, vector<16x768xf32>, vector<1x768xf32> -> vector<1x768xf32>
      %95 = arith.addf %90, %94 : vector<1x768xf32>
      %96 = vector.extract_strided_slice %24 {offsets = [14, 0], sizes = [1, 16], strides = [1, 1]} : vector<48x16xf32> to vector<1x16xf32>
      %c14 = arith.constant 14 : index
      %c0_73 = arith.constant 0 : index
      %c0_74 = arith.constant 0 : index
      %97 = vector.load %arg5[%c14, %c0_73, %c0_74] : memref<48x16x768xf32, #tpu.memory_space<vmem>>, vector<1x16x768xf32>
      %98 = vector.shape_cast %97 : vector<1x16x768xf32> to vector<16x768xf32>
      %cst_75 = arith.constant dense<0.000000e+00> : vector<1x768xf32>
      %99 = tpu.matmul %96, %98, %cst_75 {dimension_numbers = #tpu.dot_dimension_numbers<[1], [0], [0], [1], [0, 0, 1, 1], [], []>} : vector<1x16xf32>, vector<16x768xf32>, vector<1x768xf32> -> vector<1x768xf32>
      %100 = arith.addf %95, %99 : vector<1x768xf32>
      %101 = vector.extract_strided_slice %24 {offsets = [15, 0], sizes = [1, 16], strides = [1, 1]} : vector<48x16xf32> to vector<1x16xf32>
      %c15 = arith.constant 15 : index
      %c0_76 = arith.constant 0 : index
      %c0_77 = arith.constant 0 : index
      %102 = vector.load %arg5[%c15, %c0_76, %c0_77] : memref<48x16x768xf32, #tpu.memory_space<vmem>>, vector<1x16x768xf32>
      %103 = vector.shape_cast %102 : vector<1x16x768xf32> to vector<16x768xf32>
      %cst_78 = arith.constant dense<0.000000e+00> : vector<1x768xf32>
      %104 = tpu.matmul %101, %103, %cst_78 {dimension_numbers = #tpu.dot_dimension_numbers<[1], [0], [0], [1], [0, 0, 1, 1], [], []>} : vector<1x16xf32>, vector<16x768xf32>, vector<1x768xf32> -> vector<1x768xf32>
      %105 = arith.addf %100, %104 : vector<1x768xf32>
      %106 = vector.extract_strided_slice %24 {offsets = [16, 0], sizes = [1, 16], strides = [1, 1]} : vector<48x16xf32> to vector<1x16xf32>
      %c16 = arith.constant 16 : index
      %c0_79 = arith.constant 0 : index
      %c0_80 = arith.constant 0 : index
      %107 = vector.load %arg5[%c16, %c0_79, %c0_80] : memref<48x16x768xf32, #tpu.memory_space<vmem>>, vector<1x16x768xf32>
      %108 = vector.shape_cast %107 : vector<1x16x768xf32> to vector<16x768xf32>
      %cst_81 = arith.constant dense<0.000000e+00> : vector<1x768xf32>
      %109 = tpu.matmul %106, %108, %cst_81 {dimension_numbers = #tpu.dot_dimension_numbers<[1], [0], [0], [1], [0, 0, 1, 1], [], []>} : vector<1x16xf32>, vector<16x768xf32>, vector<1x768xf32> -> vector<1x768xf32>
      %110 = arith.addf %105, %109 : vector<1x768xf32>
      %111 = vector.extract_strided_slice %24 {offsets = [17, 0], sizes = [1, 16], strides = [1, 1]} : vector<48x16xf32> to vector<1x16xf32>
      %c17 = arith.constant 17 : index
      %c0_82 = arith.constant 0 : index
      %c0_83 = arith.constant 0 : index
      %112 = vector.load %arg5[%c17, %c0_82, %c0_83] : memref<48x16x768xf32, #tpu.memory_space<vmem>>, vector<1x16x768xf32>
      %113 = vector.shape_cast %112 : vector<1x16x768xf32> to vector<16x768xf32>
      %cst_84 = arith.constant dense<0.000000e+00> : vector<1x768xf32>
      %114 = tpu.matmul %111, %113, %cst_84 {dimension_numbers = #tpu.dot_dimension_numbers<[1], [0], [0], [1], [0, 0, 1, 1], [], []>} : vector<1x16xf32>, vector<16x768xf32>, vector<1x768xf32> -> vector<1x768xf32>
      %115 = arith.addf %110, %114 : vector<1x768xf32>
      %116 = vector.extract_strided_slice %24 {offsets = [18, 0], sizes = [1, 16], strides = [1, 1]} : vector<48x16xf32> to vector<1x16xf32>
      %c18 = arith.constant 18 : index
      %c0_85 = arith.constant 0 : index
      %c0_86 = arith.constant 0 : index
      %117 = vector.load %arg5[%c18, %c0_85, %c0_86] : memref<48x16x768xf32, #tpu.memory_space<vmem>>, vector<1x16x768xf32>
      %118 = vector.shape_cast %117 : vector<1x16x768xf32> to vector<16x768xf32>
      %cst_87 = arith.constant dense<0.000000e+00> : vector<1x768xf32>
      %119 = tpu.matmul %116, %118, %cst_87 {dimension_numbers = #tpu.dot_dimension_numbers<[1], [0], [0], [1], [0, 0, 1, 1], [], []>} : vector<1x16xf32>, vector<16x768xf32>, vector<1x768xf32> -> vector<1x768xf32>
      %120 = arith.addf %115, %119 : vector<1x768xf32>
      %121 = vector.extract_strided_slice %24 {offsets = [19, 0], sizes = [1, 16], strides = [1, 1]} : vector<48x16xf32> to vector<1x16xf32>
      %c19 = arith.constant 19 : index
      %c0_88 = arith.constant 0 : index
      %c0_89 = arith.constant 0 : index
      %122 = vector.load %arg5[%c19, %c0_88, %c0_89] : memref<48x16x768xf32, #tpu.memory_space<vmem>>, vector<1x16x768xf32>
      %123 = vector.shape_cast %122 : vector<1x16x768xf32> to vector<16x768xf32>
      %cst_90 = arith.constant dense<0.000000e+00> : vector<1x768xf32>
      %124 = tpu.matmul %121, %123, %cst_90 {dimension_numbers = #tpu.dot_dimension_numbers<[1], [0], [0], [1], [0, 0, 1, 1], [], []>} : vector<1x16xf32>, vector<16x768xf32>, vector<1x768xf32> -> vector<1x768xf32>
      %125 = arith.addf %120, %124 : vector<1x768xf32>
      %126 = vector.extract_strided_slice %24 {offsets = [20, 0], sizes = [1, 16], strides = [1, 1]} : vector<48x16xf32> to vector<1x16xf32>
      %c20 = arith.constant 20 : index
      %c0_91 = arith.constant 0 : index
      %c0_92 = arith.constant 0 : index
      %127 = vector.load %arg5[%c20, %c0_91, %c0_92] : memref<48x16x768xf32, #tpu.memory_space<vmem>>, vector<1x16x768xf32>
      %128 = vector.shape_cast %127 : vector<1x16x768xf32> to vector<16x768xf32>
      %cst_93 = arith.constant dense<0.000000e+00> : vector<1x768xf32>
      %129 = tpu.matmul %126, %128, %cst_93 {dimension_numbers = #tpu.dot_dimension_numbers<[1], [0], [0], [1], [0, 0, 1, 1], [], []>} : vector<1x16xf32>, vector<16x768xf32>, vector<1x768xf32> -> vector<1x768xf32>
      %130 = arith.addf %125, %129 : vector<1x768xf32>
      %131 = vector.extract_strided_slice %24 {offsets = [21, 0], sizes = [1, 16], strides = [1, 1]} : vector<48x16xf32> to vector<1x16xf32>
      %c21 = arith.constant 21 : index
      %c0_94 = arith.constant 0 : index
      %c0_95 = arith.constant 0 : index
      %132 = vector.load %arg5[%c21, %c0_94, %c0_95] : memref<48x16x768xf32, #tpu.memory_space<vmem>>, vector<1x16x768xf32>
      %133 = vector.shape_cast %132 : vector<1x16x768xf32> to vector<16x768xf32>
      %cst_96 = arith.constant dense<0.000000e+00> : vector<1x768xf32>
      %134 = tpu.matmul %131, %133, %cst_96 {dimension_numbers = #tpu.dot_dimension_numbers<[1], [0], [0], [1], [0, 0, 1, 1], [], []>} : vector<1x16xf32>, vector<16x768xf32>, vector<1x768xf32> -> vector<1x768xf32>
      %135 = arith.addf %130, %134 : vector<1x768xf32>
      %136 = vector.extract_strided_slice %24 {offsets = [22, 0], sizes = [1, 16], strides = [1, 1]} : vector<48x16xf32> to vector<1x16xf32>
      %c22 = arith.constant 22 : index
      %c0_97 = arith.constant 0 : index
      %c0_98 = arith.constant 0 : index
      %137 = vector.load %arg5[%c22, %c0_97, %c0_98] : memref<48x16x768xf32, #tpu.memory_space<vmem>>, vector<1x16x768xf32>
      %138 = vector.shape_cast %137 : vector<1x16x768xf32> to vector<16x768xf32>
      %cst_99 = arith.constant dense<0.000000e+00> : vector<1x768xf32>
      %139 = tpu.matmul %136, %138, %cst_99 {dimension_numbers = #tpu.dot_dimension_numbers<[1], [0], [0], [1], [0, 0, 1, 1], [], []>} : vector<1x16xf32>, vector<16x768xf32>, vector<1x768xf32> -> vector<1x768xf32>
      %140 = arith.addf %135, %139 : vector<1x768xf32>
      %141 = vector.extract_strided_slice %24 {offsets = [23, 0], sizes = [1, 16], strides = [1, 1]} : vector<48x16xf32> to vector<1x16xf32>
      %c23 = arith.constant 23 : index
      %c0_100 = arith.constant 0 : index
      %c0_101 = arith.constant 0 : index
      %142 = vector.load %arg5[%c23, %c0_100, %c0_101] : memref<48x16x768xf32, #tpu.memory_space<vmem>>, vector<1x16x768xf32>
      %143 = vector.shape_cast %142 : vector<1x16x768xf32> to vector<16x768xf32>
      %cst_102 = arith.constant dense<0.000000e+00> : vector<1x768xf32>
      %144 = tpu.matmul %141, %143, %cst_102 {dimension_numbers = #tpu.dot_dimension_numbers<[1], [0], [0], [1], [0, 0, 1, 1], [], []>} : vector<1x16xf32>, vector<16x768xf32>, vector<1x768xf32> -> vector<1x768xf32>
      %145 = arith.addf %140, %144 : vector<1x768xf32>
      %146 = vector.extract_strided_slice %24 {offsets = [24, 0], sizes = [1, 16], strides = [1, 1]} : vector<48x16xf32> to vector<1x16xf32>
      %c24 = arith.constant 24 : index
      %c0_103 = arith.constant 0 : index
      %c0_104 = arith.constant 0 : index
      %147 = vector.load %arg5[%c24, %c0_103, %c0_104] : memref<48x16x768xf32, #tpu.memory_space<vmem>>, vector<1x16x768xf32>
      %148 = vector.shape_cast %147 : vector<1x16x768xf32> to vector<16x768xf32>
      %cst_105 = arith.constant dense<0.000000e+00> : vector<1x768xf32>
      %149 = tpu.matmul %146, %148, %cst_105 {dimension_numbers = #tpu.dot_dimension_numbers<[1], [0], [0], [1], [0, 0, 1, 1], [], []>} : vector<1x16xf32>, vector<16x768xf32>, vector<1x768xf32> -> vector<1x768xf32>
      %150 = arith.addf %145, %149 : vector<1x768xf32>
      %151 = vector.extract_strided_slice %24 {offsets = [25, 0], sizes = [1, 16], strides = [1, 1]} : vector<48x16xf32> to vector<1x16xf32>
      %c25 = arith.constant 25 : index
      %c0_106 = arith.constant 0 : index
      %c0_107 = arith.constant 0 : index
      %152 = vector.load %arg5[%c25, %c0_106, %c0_107] : memref<48x16x768xf32, #tpu.memory_space<vmem>>, vector<1x16x768xf32>
      %153 = vector.shape_cast %152 : vector<1x16x768xf32> to vector<16x768xf32>
      %cst_108 = arith.constant dense<0.000000e+00> : vector<1x768xf32>
      %154 = tpu.matmul %151, %153, %cst_108 {dimension_numbers = #tpu.dot_dimension_numbers<[1], [0], [0], [1], [0, 0, 1, 1], [], []>} : vector<1x16xf32>, vector<16x768xf32>, vector<1x768xf32> -> vector<1x768xf32>
      %155 = arith.addf %150, %154 : vector<1x768xf32>
      %156 = vector.extract_strided_slice %24 {offsets = [26, 0], sizes = [1, 16], strides = [1, 1]} : vector<48x16xf32> to vector<1x16xf32>
      %c26 = arith.constant 26 : index
      %c0_109 = arith.constant 0 : index
      %c0_110 = arith.constant 0 : index
      %157 = vector.load %arg5[%c26, %c0_109, %c0_110] : memref<48x16x768xf32, #tpu.memory_space<vmem>>, vector<1x16x768xf32>
      %158 = vector.shape_cast %157 : vector<1x16x768xf32> to vector<16x768xf32>
      %cst_111 = arith.constant dense<0.000000e+00> : vector<1x768xf32>
      %159 = tpu.matmul %156, %158, %cst_111 {dimension_numbers = #tpu.dot_dimension_numbers<[1], [0], [0], [1], [0, 0, 1, 1], [], []>} : vector<1x16xf32>, vector<16x768xf32>, vector<1x768xf32> -> vector<1x768xf32>
      %160 = arith.addf %155, %159 : vector<1x768xf32>
      %161 = vector.extract_strided_slice %24 {offsets = [27, 0], sizes = [1, 16], strides = [1, 1]} : vector<48x16xf32> to vector<1x16xf32>
      %c27 = arith.constant 27 : index
      %c0_112 = arith.constant 0 : index
      %c0_113 = arith.constant 0 : index
      %162 = vector.load %arg5[%c27, %c0_112, %c0_113] : memref<48x16x768xf32, #tpu.memory_space<vmem>>, vector<1x16x768xf32>
      %163 = vector.shape_cast %162 : vector<1x16x768xf32> to vector<16x768xf32>
      %cst_114 = arith.constant dense<0.000000e+00> : vector<1x768xf32>
      %164 = tpu.matmul %161, %163, %cst_114 {dimension_numbers = #tpu.dot_dimension_numbers<[1], [0], [0], [1], [0, 0, 1, 1], [], []>} : vector<1x16xf32>, vector<16x768xf32>, vector<1x768xf32> -> vector<1x768xf32>
      %165 = arith.addf %160, %164 : vector<1x768xf32>
      %166 = vector.extract_strided_slice %24 {offsets = [28, 0], sizes = [1, 16], strides = [1, 1]} : vector<48x16xf32> to vector<1x16xf32>
      %c28 = arith.constant 28 : index
      %c0_115 = arith.constant 0 : index
      %c0_116 = arith.constant 0 : index
      %167 = vector.load %arg5[%c28, %c0_115, %c0_116] : memref<48x16x768xf32, #tpu.memory_space<vmem>>, vector<1x16x768xf32>
      %168 = vector.shape_cast %167 : vector<1x16x768xf32> to vector<16x768xf32>
      %cst_117 = arith.constant dense<0.000000e+00> : vector<1x768xf32>
      %169 = tpu.matmul %166, %168, %cst_117 {dimension_numbers = #tpu.dot_dimension_numbers<[1], [0], [0], [1], [0, 0, 1, 1], [], []>} : vector<1x16xf32>, vector<16x768xf32>, vector<1x768xf32> -> vector<1x768xf32>
      %170 = arith.addf %165, %169 : vector<1x768xf32>
      %171 = vector.extract_strided_slice %24 {offsets = [29, 0], sizes = [1, 16], strides = [1, 1]} : vector<48x16xf32> to vector<1x16xf32>
      %c29 = arith.constant 29 : index
      %c0_118 = arith.constant 0 : index
      %c0_119 = arith.constant 0 : index
      %172 = vector.load %arg5[%c29, %c0_118, %c0_119] : memref<48x16x768xf32, #tpu.memory_space<vmem>>, vector<1x16x768xf32>
      %173 = vector.shape_cast %172 : vector<1x16x768xf32> to vector<16x768xf32>
      %cst_120 = arith.constant dense<0.000000e+00> : vector<1x768xf32>
      %174 = tpu.matmul %171, %173, %cst_120 {dimension_numbers = #tpu.dot_dimension_numbers<[1], [0], [0], [1], [0, 0, 1, 1], [], []>} : vector<1x16xf32>, vector<16x768xf32>, vector<1x768xf32> -> vector<1x768xf32>
      %175 = arith.addf %170, %174 : vector<1x768xf32>
      %176 = vector.extract_strided_slice %24 {offsets = [30, 0], sizes = [1, 16], strides = [1, 1]} : vector<48x16xf32> to vector<1x16xf32>
      %c30 = arith.constant 30 : index
      %c0_121 = arith.constant 0 : index
      %c0_122 = arith.constant 0 : index
      %177 = vector.load %arg5[%c30, %c0_121, %c0_122] : memref<48x16x768xf32, #tpu.memory_space<vmem>>, vector<1x16x768xf32>
      %178 = vector.shape_cast %177 : vector<1x16x768xf32> to vector<16x768xf32>
      %cst_123 = arith.constant dense<0.000000e+00> : vector<1x768xf32>
      %179 = tpu.matmul %176, %178, %cst_123 {dimension_numbers = #tpu.dot_dimension_numbers<[1], [0], [0], [1], [0, 0, 1, 1], [], []>} : vector<1x16xf32>, vector<16x768xf32>, vector<1x768xf32> -> vector<1x768xf32>
      %180 = arith.addf %175, %179 : vector<1x768xf32>
      %181 = vector.extract_strided_slice %24 {offsets = [31, 0], sizes = [1, 16], strides = [1, 1]} : vector<48x16xf32> to vector<1x16xf32>
      %c31 = arith.constant 31 : index
      %c0_124 = arith.constant 0 : index
      %c0_125 = arith.constant 0 : index
      %182 = vector.load %arg5[%c31, %c0_124, %c0_125] : memref<48x16x768xf32, #tpu.memory_space<vmem>>, vector<1x16x768xf32>
      %183 = vector.shape_cast %182 : vector<1x16x768xf32> to vector<16x768xf32>
      %cst_126 = arith.constant dense<0.000000e+00> : vector<1x768xf32>
      %184 = tpu.matmul %181, %183, %cst_126 {dimension_numbers = #tpu.dot_dimension_numbers<[1], [0], [0], [1], [0, 0, 1, 1], [], []>} : vector<1x16xf32>, vector<16x768xf32>, vector<1x768xf32> -> vector<1x768xf32>
      %185 = arith.addf %180, %184 : vector<1x768xf32>
      %186 = vector.extract_strided_slice %24 {offsets = [32, 0], sizes = [1, 16], strides = [1, 1]} : vector<48x16xf32> to vector<1x16xf32>
      %c32 = arith.constant 32 : index
      %c0_127 = arith.constant 0 : index
      %c0_128 = arith.constant 0 : index
      %187 = vector.load %arg5[%c32, %c0_127, %c0_128] : memref<48x16x768xf32, #tpu.memory_space<vmem>>, vector<1x16x768xf32>
      %188 = vector.shape_cast %187 : vector<1x16x768xf32> to vector<16x768xf32>
      %cst_129 = arith.constant dense<0.000000e+00> : vector<1x768xf32>
      %189 = tpu.matmul %186, %188, %cst_129 {dimension_numbers = #tpu.dot_dimension_numbers<[1], [0], [0], [1], [0, 0, 1, 1], [], []>} : vector<1x16xf32>, vector<16x768xf32>, vector<1x768xf32> -> vector<1x768xf32>
      %190 = arith.addf %185, %189 : vector<1x768xf32>
      %191 = vector.extract_strided_slice %24 {offsets = [33, 0], sizes = [1, 16], strides = [1, 1]} : vector<48x16xf32> to vector<1x16xf32>
      %c33 = arith.constant 33 : index
      %c0_130 = arith.constant 0 : index
      %c0_131 = arith.constant 0 : index
      %192 = vector.load %arg5[%c33, %c0_130, %c0_131] : memref<48x16x768xf32, #tpu.memory_space<vmem>>, vector<1x16x768xf32>
      %193 = vector.shape_cast %192 : vector<1x16x768xf32> to vector<16x768xf32>
      %cst_132 = arith.constant dense<0.000000e+00> : vector<1x768xf32>
      %194 = tpu.matmul %191, %193, %cst_132 {dimension_numbers = #tpu.dot_dimension_numbers<[1], [0], [0], [1], [0, 0, 1, 1], [], []>} : vector<1x16xf32>, vector<16x768xf32>, vector<1x768xf32> -> vector<1x768xf32>
      %195 = arith.addf %190, %194 : vector<1x768xf32>
      %196 = vector.extract_strided_slice %24 {offsets = [34, 0], sizes = [1, 16], strides = [1, 1]} : vector<48x16xf32> to vector<1x16xf32>
      %c34 = arith.constant 34 : index
      %c0_133 = arith.constant 0 : index
      %c0_134 = arith.constant 0 : index
      %197 = vector.load %arg5[%c34, %c0_133, %c0_134] : memref<48x16x768xf32, #tpu.memory_space<vmem>>, vector<1x16x768xf32>
      %198 = vector.shape_cast %197 : vector<1x16x768xf32> to vector<16x768xf32>
      %cst_135 = arith.constant dense<0.000000e+00> : vector<1x768xf32>
      %199 = tpu.matmul %196, %198, %cst_135 {dimension_numbers = #tpu.dot_dimension_numbers<[1], [0], [0], [1], [0, 0, 1, 1], [], []>} : vector<1x16xf32>, vector<16x768xf32>, vector<1x768xf32> -> vector<1x768xf32>
      %200 = arith.addf %195, %199 : vector<1x768xf32>
      %201 = vector.extract_strided_slice %24 {offsets = [35, 0], sizes = [1, 16], strides = [1, 1]} : vector<48x16xf32> to vector<1x16xf32>
      %c35 = arith.constant 35 : index
      %c0_136 = arith.constant 0 : index
      %c0_137 = arith.constant 0 : index
      %202 = vector.load %arg5[%c35, %c0_136, %c0_137] : memref<48x16x768xf32, #tpu.memory_space<vmem>>, vector<1x16x768xf32>
      %203 = vector.shape_cast %202 : vector<1x16x768xf32> to vector<16x768xf32>
      %cst_138 = arith.constant dense<0.000000e+00> : vector<1x768xf32>
      %204 = tpu.matmul %201, %203, %cst_138 {dimension_numbers = #tpu.dot_dimension_numbers<[1], [0], [0], [1], [0, 0, 1, 1], [], []>} : vector<1x16xf32>, vector<16x768xf32>, vector<1x768xf32> -> vector<1x768xf32>
      %205 = arith.addf %200, %204 : vector<1x768xf32>
      %206 = vector.extract_strided_slice %24 {offsets = [36, 0], sizes = [1, 16], strides = [1, 1]} : vector<48x16xf32> to vector<1x16xf32>
      %c36 = arith.constant 36 : index
      %c0_139 = arith.constant 0 : index
      %c0_140 = arith.constant 0 : index
      %207 = vector.load %arg5[%c36, %c0_139, %c0_140] : memref<48x16x768xf32, #tpu.memory_space<vmem>>, vector<1x16x768xf32>
      %208 = vector.shape_cast %207 : vector<1x16x768xf32> to vector<16x768xf32>
      %cst_141 = arith.constant dense<0.000000e+00> : vector<1x768xf32>
      %209 = tpu.matmul %206, %208, %cst_141 {dimension_numbers = #tpu.dot_dimension_numbers<[1], [0], [0], [1], [0, 0, 1, 1], [], []>} : vector<1x16xf32>, vector<16x768xf32>, vector<1x768xf32> -> vector<1x768xf32>
      %210 = arith.addf %205, %209 : vector<1x768xf32>
      %211 = vector.extract_strided_slice %24 {offsets = [37, 0], sizes = [1, 16], strides = [1, 1]} : vector<48x16xf32> to vector<1x16xf32>
      %c37 = arith.constant 37 : index
      %c0_142 = arith.constant 0 : index
      %c0_143 = arith.constant 0 : index
      %212 = vector.load %arg5[%c37, %c0_142, %c0_143] : memref<48x16x768xf32, #tpu.memory_space<vmem>>, vector<1x16x768xf32>
      %213 = vector.shape_cast %212 : vector<1x16x768xf32> to vector<16x768xf32>
      %cst_144 = arith.constant dense<0.000000e+00> : vector<1x768xf32>
      %214 = tpu.matmul %211, %213, %cst_144 {dimension_numbers = #tpu.dot_dimension_numbers<[1], [0], [0], [1], [0, 0, 1, 1], [], []>} : vector<1x16xf32>, vector<16x768xf32>, vector<1x768xf32> -> vector<1x768xf32>
      %215 = arith.addf %210, %214 : vector<1x768xf32>
      %216 = vector.extract_strided_slice %24 {offsets = [38, 0], sizes = [1, 16], strides = [1, 1]} : vector<48x16xf32> to vector<1x16xf32>
      %c38 = arith.constant 38 : index
      %c0_145 = arith.constant 0 : index
      %c0_146 = arith.constant 0 : index
      %217 = vector.load %arg5[%c38, %c0_145, %c0_146] : memref<48x16x768xf32, #tpu.memory_space<vmem>>, vector<1x16x768xf32>
      %218 = vector.shape_cast %217 : vector<1x16x768xf32> to vector<16x768xf32>
      %cst_147 = arith.constant dense<0.000000e+00> : vector<1x768xf32>
      %219 = tpu.matmul %216, %218, %cst_147 {dimension_numbers = #tpu.dot_dimension_numbers<[1], [0], [0], [1], [0, 0, 1, 1], [], []>} : vector<1x16xf32>, vector<16x768xf32>, vector<1x768xf32> -> vector<1x768xf32>
      %220 = arith.addf %215, %219 : vector<1x768xf32>
      %221 = vector.extract_strided_slice %24 {offsets = [39, 0], sizes = [1, 16], strides = [1, 1]} : vector<48x16xf32> to vector<1x16xf32>
      %c39 = arith.constant 39 : index
      %c0_148 = arith.constant 0 : index
      %c0_149 = arith.constant 0 : index
      %222 = vector.load %arg5[%c39, %c0_148, %c0_149] : memref<48x16x768xf32, #tpu.memory_space<vmem>>, vector<1x16x768xf32>
      %223 = vector.shape_cast %222 : vector<1x16x768xf32> to vector<16x768xf32>
      %cst_150 = arith.constant dense<0.000000e+00> : vector<1x768xf32>
      %224 = tpu.matmul %221, %223, %cst_150 {dimension_numbers = #tpu.dot_dimension_numbers<[1], [0], [0], [1], [0, 0, 1, 1], [], []>} : vector<1x16xf32>, vector<16x768xf32>, vector<1x768xf32> -> vector<1x768xf32>
      %225 = arith.addf %220, %224 : vector<1x768xf32>
      %226 = vector.extract_strided_slice %24 {offsets = [40, 0], sizes = [1, 16], strides = [1, 1]} : vector<48x16xf32> to vector<1x16xf32>
      %c40 = arith.constant 40 : index
      %c0_151 = arith.constant 0 : index
      %c0_152 = arith.constant 0 : index
      %227 = vector.load %arg5[%c40, %c0_151, %c0_152] : memref<48x16x768xf32, #tpu.memory_space<vmem>>, vector<1x16x768xf32>
      %228 = vector.shape_cast %227 : vector<1x16x768xf32> to vector<16x768xf32>
      %cst_153 = arith.constant dense<0.000000e+00> : vector<1x768xf32>
      %229 = tpu.matmul %226, %228, %cst_153 {dimension_numbers = #tpu.dot_dimension_numbers<[1], [0], [0], [1], [0, 0, 1, 1], [], []>} : vector<1x16xf32>, vector<16x768xf32>, vector<1x768xf32> -> vector<1x768xf32>
      %230 = arith.addf %225, %229 : vector<1x768xf32>
      %231 = vector.extract_strided_slice %24 {offsets = [41, 0], sizes = [1, 16], strides = [1, 1]} : vector<48x16xf32> to vector<1x16xf32>
      %c41 = arith.constant 41 : index
      %c0_154 = arith.constant 0 : index
      %c0_155 = arith.constant 0 : index
      %232 = vector.load %arg5[%c41, %c0_154, %c0_155] : memref<48x16x768xf32, #tpu.memory_space<vmem>>, vector<1x16x768xf32>
      %233 = vector.shape_cast %232 : vector<1x16x768xf32> to vector<16x768xf32>
      %cst_156 = arith.constant dense<0.000000e+00> : vector<1x768xf32>
      %234 = tpu.matmul %231, %233, %cst_156 {dimension_numbers = #tpu.dot_dimension_numbers<[1], [0], [0], [1], [0, 0, 1, 1], [], []>} : vector<1x16xf32>, vector<16x768xf32>, vector<1x768xf32> -> vector<1x768xf32>
      %235 = arith.addf %230, %234 : vector<1x768xf32>
      %236 = vector.extract_strided_slice %24 {offsets = [42, 0], sizes = [1, 16], strides = [1, 1]} : vector<48x16xf32> to vector<1x16xf32>
      %c42 = arith.constant 42 : index
      %c0_157 = arith.constant 0 : index
      %c0_158 = arith.constant 0 : index
      %237 = vector.load %arg5[%c42, %c0_157, %c0_158] : memref<48x16x768xf32, #tpu.memory_space<vmem>>, vector<1x16x768xf32>
      %238 = vector.shape_cast %237 : vector<1x16x768xf32> to vector<16x768xf32>
      %cst_159 = arith.constant dense<0.000000e+00> : vector<1x768xf32>
      %239 = tpu.matmul %236, %238, %cst_159 {dimension_numbers = #tpu.dot_dimension_numbers<[1], [0], [0], [1], [0, 0, 1, 1], [], []>} : vector<1x16xf32>, vector<16x768xf32>, vector<1x768xf32> -> vector<1x768xf32>
      %240 = arith.addf %235, %239 : vector<1x768xf32>
      %241 = vector.extract_strided_slice %24 {offsets = [43, 0], sizes = [1, 16], strides = [1, 1]} : vector<48x16xf32> to vector<1x16xf32>
      %c43 = arith.constant 43 : index
      %c0_160 = arith.constant 0 : index
      %c0_161 = arith.constant 0 : index
      %242 = vector.load %arg5[%c43, %c0_160, %c0_161] : memref<48x16x768xf32, #tpu.memory_space<vmem>>, vector<1x16x768xf32>
      %243 = vector.shape_cast %242 : vector<1x16x768xf32> to vector<16x768xf32>
      %cst_162 = arith.constant dense<0.000000e+00> : vector<1x768xf32>
      %244 = tpu.matmul %241, %243, %cst_162 {dimension_numbers = #tpu.dot_dimension_numbers<[1], [0], [0], [1], [0, 0, 1, 1], [], []>} : vector<1x16xf32>, vector<16x768xf32>, vector<1x768xf32> -> vector<1x768xf32>
      %245 = arith.addf %240, %244 : vector<1x768xf32>
      %246 = vector.extract_strided_slice %24 {offsets = [44, 0], sizes = [1, 16], strides = [1, 1]} : vector<48x16xf32> to vector<1x16xf32>
      %c44 = arith.constant 44 : index
      %c0_163 = arith.constant 0 : index
      %c0_164 = arith.constant 0 : index
      %247 = vector.load %arg5[%c44, %c0_163, %c0_164] : memref<48x16x768xf32, #tpu.memory_space<vmem>>, vector<1x16x768xf32>
      %248 = vector.shape_cast %247 : vector<1x16x768xf32> to vector<16x768xf32>
      %cst_165 = arith.constant dense<0.000000e+00> : vector<1x768xf32>
      %249 = tpu.matmul %246, %248, %cst_165 {dimension_numbers = #tpu.dot_dimension_numbers<[1], [0], [0], [1], [0, 0, 1, 1], [], []>} : vector<1x16xf32>, vector<16x768xf32>, vector<1x768xf32> -> vector<1x768xf32>
      %250 = arith.addf %245, %249 : vector<1x768xf32>
      %251 = vector.extract_strided_slice %24 {offsets = [45, 0], sizes = [1, 16], strides = [1, 1]} : vector<48x16xf32> to vector<1x16xf32>
      %c45 = arith.constant 45 : index
      %c0_166 = arith.constant 0 : index
      %c0_167 = arith.constant 0 : index
      %252 = vector.load %arg5[%c45, %c0_166, %c0_167] : memref<48x16x768xf32, #tpu.memory_space<vmem>>, vector<1x16x768xf32>
      %253 = vector.shape_cast %252 : vector<1x16x768xf32> to vector<16x768xf32>
      %cst_168 = arith.constant dense<0.000000e+00> : vector<1x768xf32>
      %254 = tpu.matmul %251, %253, %cst_168 {dimension_numbers = #tpu.dot_dimension_numbers<[1], [0], [0], [1], [0, 0, 1, 1], [], []>} : vector<1x16xf32>, vector<16x768xf32>, vector<1x768xf32> -> vector<1x768xf32>
      %255 = arith.addf %250, %254 : vector<1x768xf32>
      %256 = vector.extract_strided_slice %24 {offsets = [46, 0], sizes = [1, 16], strides = [1, 1]} : vector<48x16xf32> to vector<1x16xf32>
      %c46 = arith.constant 46 : index
      %c0_169 = arith.constant 0 : index
      %c0_170 = arith.constant 0 : index
      %257 = vector.load %arg5[%c46, %c0_169, %c0_170] : memref<48x16x768xf32, #tpu.memory_space<vmem>>, vector<1x16x768xf32>
      %258 = vector.shape_cast %257 : vector<1x16x768xf32> to vector<16x768xf32>
      %cst_171 = arith.constant dense<0.000000e+00> : vector<1x768xf32>
      %259 = tpu.matmul %256, %258, %cst_171 {dimension_numbers = #tpu.dot_dimension_numbers<[1], [0], [0], [1], [0, 0, 1, 1], [], []>} : vector<1x16xf32>, vector<16x768xf32>, vector<1x768xf32> -> vector<1x768xf32>
      %260 = arith.addf %255, %259 : vector<1x768xf32>
      %261 = vector.extract_strided_slice %24 {offsets = [47, 0], sizes = [1, 16], strides = [1, 1]} : vector<48x16xf32> to vector<1x16xf32>
      %c47 = arith.constant 47 : index
      %c0_172 = arith.constant 0 : index
      %c0_173 = arith.constant 0 : index
      %262 = vector.load %arg5[%c47, %c0_172, %c0_173] : memref<48x16x768xf32, #tpu.memory_space<vmem>>, vector<1x16x768xf32>
      %263 = vector.shape_cast %262 : vector<1x16x768xf32> to vector<16x768xf32>
      %cst_174 = arith.constant dense<0.000000e+00> : vector<1x768xf32>
      %264 = tpu.matmul %261, %263, %cst_174 {dimension_numbers = #tpu.dot_dimension_numbers<[1], [0], [0], [1], [0, 0, 1, 1], [], []>} : vector<1x16xf32>, vector<16x768xf32>, vector<1x768xf32> -> vector<1x768xf32>
      %265 = arith.addf %260, %264 : vector<1x768xf32>
      %cst_175 = arith.constant 6.250000e-02 : f32
      %266 = vector.broadcast %cst_175 : f32 to vector<1x768xf32>
      %267 = arith.mulf %265, %266 : vector<1x768xf32>
      %c0_176 = arith.constant 0 : index
      %c0_177 = arith.constant 0 : index
      %268 = vector.load %arg6[%c0_176, %c0_177] : memref<1x768xf32, #tpu.memory_space<vmem>>, vector<1x768xf32>
      %269 = arith.addf %267, %268 : vector<1x768xf32>
      %c0_178 = arith.constant 0 : index
      %c0_179 = arith.constant 0 : index
      %270 = vector.load %arg7[%c0_178, %c0_179] : memref<768x256xf32, #tpu.memory_space<vmem>>, vector<768x256xf32>
      %cst_180 = arith.constant dense<0.000000e+00> : vector<1x256xf32>
      %271 = tpu.matmul %269, %270, %cst_180 {dimension_numbers = #tpu.dot_dimension_numbers<[1], [0], [0], [1], [0, 0, 1, 1], [], []>} : vector<1x768xf32>, vector<768x256xf32>, vector<1x256xf32> -> vector<1x256xf32>
      %c0_181 = arith.constant 0 : index
      %c0_182 = arith.constant 0 : index
      %272 = vector.load %arg8[%c0_181, %c0_182] : memref<1x256xf32, #tpu.memory_space<vmem>>, vector<1x256xf32>
      %273 = arith.addf %271, %272 : vector<1x256xf32>
      %cst_183 = arith.constant 0.000000e+00 : f32
      %274 = vector.broadcast %cst_183 : f32 to vector<1x256xf32>
      %275 = arith.maximumf %273, %274 : vector<1x256xf32>
      %c0_184 = arith.constant 0 : index
      %c0_185 = arith.constant 0 : index
      %276 = vector.load %arg9[%c0_184, %c0_185] : memref<256x128xf32, #tpu.memory_space<vmem>>, vector<256x128xf32>
      %cst_186 = arith.constant dense<0.000000e+00> : vector<1x128xf32>
      %277 = tpu.matmul %275, %276, %cst_186 {dimension_numbers = #tpu.dot_dimension_numbers<[1], [0], [0], [1], [0, 0, 1, 1], [], []>} : vector<1x256xf32>, vector<256x128xf32>, vector<1x128xf32> -> vector<1x128xf32>
      %c0_187 = arith.constant 0 : index
      %c0_188 = arith.constant 0 : index
      %278 = vector.load %arg10[%c0_187, %c0_188] : memref<1x128xf32, #tpu.memory_space<vmem>>, vector<1x128xf32>
      %279 = arith.addf %277, %278 : vector<1x128xf32>
      %280 = arith.negf %279 : vector<1x128xf32>
      %281 = math.exp %280 : vector<1x128xf32>
      %cst_189 = arith.constant 1.000000e+00 : f32
      %282 = vector.broadcast %cst_189 : f32 to vector<1x128xf32>
      %283 = arith.addf %282, %281 : vector<1x128xf32>
      %284 = arith.divf %282, %283 : vector<1x128xf32>
      %cst_190 = arith.constant 1.000000e+01 : f32
      %285 = vector.broadcast %cst_190 : f32 to vector<1x128xf32>
      %286 = arith.mulf %284, %285 : vector<1x128xf32>
      %287 = vector.shape_cast %286 : vector<1x128xf32> to vector<1x1x128xf32>
      %c0_191 = arith.constant 0 : index
      %c0_192 = arith.constant 0 : index
      %c0_193 = arith.constant 0 : index
      %288 = vector.load %arg11[%c0_191, %c0_192, %c0_193] : memref<1x1x128xf32, #tpu.memory_space<vmem>>, vector<1x1x128xf32>
      tpu.vector_store %arg11[%c0_191, %c0_192, %c0_193], %287 {strides = array<i32>} : memref<1x1x128xf32, #tpu.memory_space<vmem>>, vector<1x1x128xf32>,
    } else {
    }
    return
  }
  func.func @transform_0(%arg0: i32, %arg1: i32) -> (i32, i32, i32, i32) {
    %c0_i32 = arith.constant 0 : i32
    %c0_i32_0 = arith.constant 0 : i32
    %c0_i32_1 = arith.constant 0 : i32
    return %arg0, %arg1, %c0_i32, %c0_i32_0 : i32, i32, i32, i32
  }
  func.func @transform_1(%arg0: i32, %arg1: i32) -> (i32, i32) {
    %c0_i32 = arith.constant 0 : i32
    %c0_i32_0 = arith.constant 0 : i32
    %c0_i32_1 = arith.constant 0 : i32
    return %c0_i32, %c0_i32_0 : i32, i32
  }
  func.func @transform_2(%arg0: i32, %arg1: i32) -> (i32, i32) {
    %c0_i32 = arith.constant 0 : i32
    %c0_i32_0 = arith.constant 0 : i32
    %c0_i32_1 = arith.constant 0 : i32
    return %c0_i32, %c0_i32_0 : i32, i32
  }
  func.func @transform_3(%arg0: i32, %arg1: i32) -> (i32, i32, i32) {
    %c0_i32 = arith.constant 0 : i32
    %c0_i32_0 = arith.constant 0 : i32
    %c0_i32_1 = arith.constant 0 : i32
    %c0_i32_2 = arith.constant 0 : i32
    return %c0_i32, %c0_i32_0, %c0_i32_1 : i32, i32, i32
  }
  func.func @transform_4(%arg0: i32, %arg1: i32) -> (i32, i32) {
    %c0_i32 = arith.constant 0 : i32
    %c0_i32_0 = arith.constant 0 : i32
    %c0_i32_1 = arith.constant 0 : i32
    return %c0_i32, %c0_i32_0 : i32, i32
  }
  func.func @transform_5(%arg0: i32, %arg1: i32) -> (i32, i32) {
    %c0_i32 = arith.constant 0 : i32
    %c0_i32_0 = arith.constant 0 : i32
    %c0_i32_1 = arith.constant 0 : i32
    return %c0_i32, %c0_i32_0 : i32, i32
  }
  func.func @transform_6(%arg0: i32, %arg1: i32) -> (i32, i32) {
    %c0_i32 = arith.constant 0 : i32
    %c0_i32_0 = arith.constant 0 : i32
    %c0_i32_1 = arith.constant 0 : i32
    return %c0_i32, %c0_i32_0 : i32, i32
  }
  func.func @transform_7(%arg0: i32, %arg1: i32) -> (i32, i32) {
    %c0_i32 = arith.constant 0 : i32
    %c0_i32_0 = arith.constant 0 : i32
    %c0_i32_1 = arith.constant 0 : i32
    return %c0_i32, %c0_i32_0 : i32, i32
  }
  func.func @transform_8(%arg0: i32, %arg1: i32) -> (i32, i32) {
    %c0_i32 = arith.constant 0 : i32
    %c0_i32_0 = arith.constant 0 : i32
    %c0_i32_1 = arith.constant 0 : i32
    return %c0_i32, %c0_i32_0 : i32, i32
  }
  func.func @transform_9(%arg0: i32, %arg1: i32) -> (i32, i32, i32) {
    %c0_i32 = arith.constant 0 : i32
    %c0_i32_0 = arith.constant 0 : i32
    %c0_i32_1 = arith.constant 0 : i32
    return %arg0, %c0_i32, %c0_i32_0 : i32, i32, i32
  }
}

</mosaic_0001>

<bundles_post_ra>
// kernel: video_score_predictor.1
= control target key start
LH: loop header
LB: loop body
LE: loop exit
PB: predicated region body
PF: predicated region fallthrough
CT: control target
= control target key end

     0   :  { %s15030_s0 = inlined_call_operand.hbm [shape: f32[2,4,96,32], index: 0, kind: input, shape index: {}]   ;;  %s15031_s1 = inlined_call_operand.vmem [shape: f32[32,16], index: 1, kind: input, shape index: {}]   ;;  %s15032_s2 = inlined_call_operand.vmem [shape: f32[48,96], index: 2, kind: input, shape index: {}]   ;;  %s15033_s3 = inlined_call_operand.hbm [shape: f32[48,16,768], index: 3, kind: input, shape index: {}]   ;;  %s15034_s4 = inlined_call_operand.hbm [shape: f32[1,768], index: 4, kind: input, shape index: {}]   ;;  %s15035_s5 = inlined_call_operand.hbm [shape: f32[768,256], index: 5, kind: input, shape index: {}]   ;;  %s15036_s6 = inlined_call_operand.hbm [shape: f32[1,256], index: 6, kind: input, shape index: {}]   ;;  %s15037_s7 = inlined_call_operand.vmem [shape: f32[256,128], index: 7, kind: input, shape index: {}]   ;;  %s15038_s8 = inlined_call_operand.vmem [shape: f32[1,128], index: 8, kind: input, shape index: {}]   ;;  %s15039_s9 = inlined_call_operand.vmem [shape: f32[2,1,128], index: 9, kind: output, shape index: {}]  }
   0x1   :  { %15048 = sst [smem:[#allocation21_spill]] %s15033_s3 }
   0x2   :  { %15049 = sst [smem:[#allocation22_spill]] %s15034_s4 }
   0x3   :  { %15050 = sst [smem:[#allocation23_spill]] %s15035_s5 }
   0x4   :  { %15051 = sst [smem:[#allocation24_spill]] %s15036_s6 }
   0x5   :  { %14 = vsyncpa [#allocation4], 0 }
   0x6   :  { %16 = vsyncpa [#allocation4 + $0x1], 0 }
   0x7   :  { %17 = vsyncpa [#allocation6], 0 }
   0x8   :  { %18 = vsyncpa [#allocation9], 0  ;;  %s13519_s30 = smov 0   ;;  %s13521_s10 = smov 0  }
   0x9   :  { %s13523_s11 = smov 0   ;;  %s13525_s12 = smov 0  }
   0xa   :  { %s13527_s13 = smov 0   ;;  %s13529_s14 = smov 0  }
   0xb LB: > { %s12812_s15 = sadd.s32 4294967295, %s13455_s14   ;;  %p58_p0 = scmp.ne.s32.totalorder %s13439_s10, %s13435_s30  ;;  %s13455_s14 = sphi %s13529_s14, %s24_s14   ;;  %s13451_s13 = sphi %s13527_s13, %s15082_s13   ;;  %s13447_s12 = sphi %s13525_s12, %s15081_s12   ;;  %s13443_s11 = sphi %s13523_s11, %s15080_s11   ;;  %s13439_s10 = sphi %s13521_s10, %s15079_s10   ;;  %s13435_s30 = sphi %s13519_s30, %s15078_s30  }
   0xc   : > { %p13549_p1 = scmp.eq.s32.totalorder %s12812_s15, 0  ;;  %p12814_p2 = scmp.ge.s32.totalorder %s13455_s14, 1 }
   0xd   : > { %p263_p3 = scmp.lt.s32.totalorder %s13455_s14, 3  ;;  %s13457_s19 = smov [#allocation5]  }
   0xe   : > { %s15052_s16 = scalar_select %p13549_p1, 1, 0 }
   0xf   : > { %p13557_p4 = por %p13549_p1, %p58_p0  ;;  %p13561_p5 = pnand %p12814_p2, %p263_p3 }
  0x10   : > { %s281_s20 = sshll.u32 %s13457_s19, 4  ;;  %s13458_s22 = smov [#allocation8]   ;;  %s282_s20 = int_to_ptr.vmem [resolvable:$true] %s281_s20 }
  0x11   : > { %s15053_s17 = scalar_select %p13557_p4, 1, 0 }
  0x12   : > { %s15054_s18 = scalar_select %p13561_p5, 1, 0 }
  0x13   : > { %p13176_p6 = pneg %p13561_p5  ;;  %s305_s23 = sshll.u32 %s13458_s22, 4  ;;  %s306_s23 = int_to_ptr.vmem [resolvable:$true] %s305_s23 }
  0x14   : > { %s13276_s24 = scalar_lea.vmem %s282_s20, 73728  ;;  %p13284_p12 = scmp.lt.s32.totalorder %s282_s20, %s282_s20 }
  0x15   : > { %p13569_p7 = pnand %p13176_p6, %p13549_p1  ;;  %p13277_p9 = scmp.ne.s32.totalorder %s282_s20, %s13276_s24 }
  0x16   : > { %p13285_p13 = scmp.lt.s32.totalorder %s13276_s24, %s13276_s24 }
  0x17   : > { %p13267_p8 = pneg %p13569_p7 }
  0x18   : > { %p13286_p0 = por %p13285_p13, %p13284_p12 }
  0x19   : > { %p13279_p10 = pnand %p13277_p9, %p13267_p8 }
  0x1b   : > { %p13280_p11 = pneg %p13279_p10 }
  0x1d   : > { %p13287_p2 = pnand %p13286_p0, %p13280_p11 }
  0x1f   : > { %13290 = shalt.err (!%p13287_p2)
}
  0x20   : > { %s13459_s25 = smov 768   ;;  %s13460_s26 = smov 48  }
  0x21   : > { %s15056_s3 = sld [smem:[#allocation21_spill]]  ;;  %s13302_s29 = scalar_lea.vmem %s306_s23, 24576 }
  0x22   : > { %p13303_p3 = scmp.ne.s32.totalorder %s306_s23, %s13302_s29  ;;  %p13310_p10 = scmp.lt.s32.totalorder %s306_s23, %s306_s23 }
  0x23   : > { %p13311_p1 = scmp.lt.s32.totalorder %s13302_s29, %s13302_s29 }
  0x24   : > { %p13305_p6 = pnand %p13303_p3, %p13267_p8 }
  0x25   : > { %p13312_p12 = por %p13311_p1, %p13310_p10 }
  0x26   : > { %p13306_p9 = pneg %p13305_p6 }
  0x27   : > { %13179 = dma.hbm_to_vmem [thread:$0]  (!%p13569_p7), %s15056_s3, 73728, %s282_s20, [#allocation6], %s13459_s25, %s13459_s25, %s13460_s26  }
  0x28   : > { %p13313_p11 = pnand %p13312_p12, %p13306_p9 }
  0x2a   : > { %13316 = shalt.err (!%p13313_p11)
}
  0x2b   : > { %s13461_s30 = smov 256   ;;  %s13462_s15 = smov 16  }
  0x2c   : > { %s15057_s5 = sld [smem:[#allocation23_spill]]  ;;  %s13463_s20 = smov [#allocation7]  }
  0x2d   : > { %s295_s24 = sshll.u32 %s13463_s20, 4  ;;  %s13464_s25 = smov [#allocation10]   ;;  %s296_s24 = int_to_ptr.vmem [resolvable:$true] %s295_s24 }
  0x2e   : > { %s319_s26 = sshll.u32 %s13464_s25, 4  ;;  %s13328_s27 = scalar_lea.vmem %s296_s24, 96  ;;  %s320_s26 = int_to_ptr.vmem [resolvable:$true] %s319_s26 }
  0x2f   : > { %p13329_p13 = scmp.ne.s32.totalorder %s296_s24, %s13328_s27  ;;  %p13336_p2 = scmp.lt.s32.totalorder %s296_s24, %s296_s24 }
  0x30   : > { %p13337_p3 = scmp.lt.s32.totalorder %s13328_s27, %s13328_s27 }
  0x31   : > { %p13331_p1 = pnand %p13329_p13, %p13267_p8 }
  0x32   : > { %13185 = dma.hbm_to_vmem [thread:$0]  (!%p13569_p7), %s15057_s5, 24576, %s306_s23, [#allocation9], %s13461_s30, %s13461_s30, %s13462_s15  }
  0x33   : > { %p13332_p0 = pneg %p13331_p1  ;;  %p13338_p6 = por %p13337_p3, %p13336_p2 }
  0x35   : > { %p13339_p9 = pnand %p13338_p6, %p13332_p0 }
  0x37   : > { %13342 = shalt.err (!%p13339_p9)
}
  0x38   : > { %s15058_s4 = sld [smem:[#allocation22_spill]]  ;;  %s13354_s29 = scalar_lea.vmem %s320_s26, 32 }
  0x39   : > { %p13355_p10 = scmp.ne.s32.totalorder %s320_s26, %s13354_s29  ;;  %p13362_p13 = scmp.lt.s32.totalorder %s320_s26, %s320_s26 }
  0x3a   : > { %p13363_p1 = scmp.lt.s32.totalorder %s13354_s29, %s13354_s29 }
  0x3b   : > { %p13357_p12 = pnand %p13355_p10, %p13267_p8 }
  0x3c   : > { %p13364_p4 = por %p13363_p1, %p13362_p13 }
  0x3d   : > { %p13358_p11 = pneg %p13357_p12 }
  0x3e   : > { %13182 = dma.hbm_to_vmem [thread:$0]  (!%p13569_p7), %s15058_s4, 96, %s296_s24, [#allocation6]  }
  0x3f   : > { %p13365_p5 = pnand %p13364_p4, %p13358_p11 }
  0x41   : > { %13368 = shalt.err (!%p13365_p5)
}
  0x42   : > { %s15059_s6 = sld [smem:[#allocation24_spill]]  ;;  %s36_s19 = sadd.s32 1, %s13451_s13 }
  0x43   : > { %s45_s22 = sadd.s32 1, %s13443_s11  ;;  %p38_p4 = scmp.ge.s32.totalorder %s36_s19, 2 }
  0x44   : > { %p52_p5 = scmp.ne.s32.totalorder %s13443_s11, %s13439_s10  ;;  %p53_p8 = scmp.eq.s32.totalorder %s13455_s14, 0 }
  0x45   : > { %p13197_p0 = scmp.lt.s32.totalorder %s13455_s14, 2  ;;  %s15084_s19 = smov (%p38_p4, %s36_s19), 0 }
  0x46   : > { %p54_p2 = por %p53_p8, %p52_p5  ;;  %s336_s21 = sand.u32 1, %s13443_s11  }
  0x47   : > { %s40_s20 = ssub.s32 %s13451_s13, %s15084_s19  ;;  %s13155_s24 = smul.u32 384, %s336_s21 }
  0x48   : > { %13188 = dma.hbm_to_vmem [thread:$0]  (!%p13569_p7), %s15059_s6, 32, %s320_s26, [#allocation9]  }
  0x49   : > { %p43_p3 = scmp.eq.s32.totalorder %s40_s20, 0  ;;  %s13156_s25 = smul.u32 6144, %s13451_s13 }
  0x4a   : > { %p13619_p6 = pnand %p13197_p0, %p54_p2  ;;  %s340_s30 = scalar_lea.vmem [#allocation3], %s13155_s24 }
  0x4b   : > { %s13624_s26 = scalar_select %p43_p3, %s13443_s11, %s45_s22  }
  0x4c   : > { %s349_s29 = scalar_lea.hbm %s15030_s0, %s13156_s25  ;;  %s350_s15 = sshll.u32 %s340_s30, 4  ;;  %s351_s15 = int_to_ptr.vmem [resolvable:$true] %s350_s15 }
  0x4d   : > { %s337_s3 = scalar_lea.sflag [#allocation4], %s336_s21  ;;  %p13371_p7 = pneg %p13619_p6 }
  0x4e   : > { %s13382_s20 = scalar_lea.vmem %s351_s15, 6144  ;;  %s13465_s4 = smov [#allocation3]  }
  0x4f   : > { %p13383_p9 = scmp.ne.s32.totalorder %s351_s15, %s13382_s20  ;;  %s13387_s5 = sshll.u32 %s13465_s4, 4  ;;  %s13388_s5 = int_to_ptr.vmem [resolvable:$false] %s13387_s5 }
  0x50   : > { %s13389_s6 = scalar_lea.vmem %s13388_s5, 12288  ;;  %p13390_p11 = scmp.lt.s32.totalorder %s351_s15, %s13388_s5 }
  0x51   : > { %p13385_p10 = pnand %p13383_p9, %p13371_p7  ;;  %p13391_p13 = scmp.lt.s32.totalorder %s13389_s6, %s13382_s20 }
  0x53   : > { %p13386_p12 = pneg %p13385_p10  ;;  %p13392_p1 = por %p13391_p13, %p13390_p11 }
  0x55   : > { %p13393_p4 = pnand %p13392_p1, %p13386_p12 }
  0x57   : > { %13396 = shalt.err (!%p13393_p4)
}
  0x58   : > { %s13466_s22 = smov 128   ;;  %s13467_s24 = smov 8  }
  0x59   : > { %13192 = dma.hbm_to_vmem [thread:$0]  (!%p13619_p6), %s349_s29, 6144, %s351_s15, %s337_s3, %s13466_s22, %s13466_s22, %s13467_s24  }
  0x5a   : > { %p15061_p5 = scmp.ne.s32.totalorder %s15054_s18, 0 }
  0x5c   : > { %362 = sbr.rel (%p15061_p5) target bundleno = 1683 (0x693), region = 56 }
  0x61   : > { %s364_s21 = sand.u32 1, %s13439_s10   ;;  %p15062_p8 = scmp.ne.s32.totalorder %s15053_s17, 0 }
  0x62   : > { %s13157_s25 = smul.u32 384, %s364_s21  ;;  %s365_s4 = scalar_lea.sflag [#allocation4], %s364_s21 }
  0x64   : > { %s13636_s23 = scalar_lea.vmem [#allocation3], %s13157_s25 }
  0x65   : > { %13422 = dma.done.wait (%p15062_p8), %s365_s4, 6144  }
  0x66   : > { %13424 = vsyncadd (%p15062_p8), %s365_s4, 4294961152  ;;  %p15063_p0 = scmp.ne.s32.totalorder %s15052_s16, 0 }
  0x68   : > { %13426 = dma.done.wait (%p15063_p0), [#allocation6], 73824  }
  0x69   : > { %13428 = vsyncadd (%p15063_p0), [#allocation6], 4294893472 }
  0x6a   : > { %13430 = dma.done.wait (%p15063_p0), [#allocation9], 24608  }
  0x6b   : > { %13432 = vsyncadd (%p15063_p0), [#allocation9], 4294942688  ;;  %vm425_vm0 = vcmask 261120   ;;  %v13468_v0 = vmov 0.0   ;;  %v580_v1 = vld [vmem:[%s15031_s1 + $0x18] sm:$0xff]  ;;  %v579_v2 = vld [vmem:[%s15031_s1 + $0x10] sm:$0xff] }
  0x6c   : > { %426 = vst.msk [vmem:[#allocation2] sm:$0xff] %vm425_vm0, %v13468_v0  ;;  %427 = vst.msk [vmem:[#allocation2 + $0x8] sm:$0xff] %vm425_vm0, %v13468_v0  ;;  %956 = vmatprep.mubr.f32.mxu1 %v13468_v0  ;;  %13096 = vmatprep.subr.mxu0 %v580_v1  ;;  %v578_v3 = vld [vmem:[%s15031_s1 + $0x8] sm:$0xff]  ;;  %v438_v4 = vld [vmem:[%s13636_s23] sm:$0xff]  ;;  %vm748_vm1 = vcmask 785408   ;;  %vm889_vm2 = vcmask 130048  }
  0x6d   : > { %428 = vst.msk [vmem:[#allocation2 + $0x10] sm:$0xff] %vm425_vm0, %v13468_v0  ;;  %429 = vst.msk [vmem:[#allocation2 + $0x18] sm:$0xff] %vm425_vm0, %v13468_v0  ;;  %v12826_v5 = vld [vmem:[%s13636_s23 + $0x60] sm:$0xff]  ;;  %13097 = vmatpush3.msra.mxu0 %v580_v1  ;;  %v439_v10 = vld [vmem:[%s13636_s23 + $0x8] sm:$0xff]  ;;  %p418_p2 = scmp.lt.s32.totalorder %s13447_s12, 1 }
  0x6e   : > { %430 = vst.msk [vmem:[#allocation2 + $0x20] sm:$0xff] %vm425_vm0, %v13468_v0  ;;  %431 = vst.msk [vmem:[#allocation2 + $0x28] sm:$0xff] %vm425_vm0, %v13468_v0  ;;  %v577_v6 = vld [vmem:[%s15031_s1] sm:$0xff]  ;;  %v463_v7 = vadd.f32 %v12826_v5, %v438_v4  ;;  %13098 = vmatprep.subr.mxu0 %v579_v2  ;;  %v12827_v11 = vld [vmem:[%s13636_s23 + $0x68] sm:$0xff] }
  0x6f   : > { %432 = vst.msk [vmem:[#allocation2 + $0x30] sm:$0xff] %vm425_vm0, %v13468_v0  ;;  %433 = vst.msk [vmem:[#allocation2 + $0x38] sm:$0xff] %vm425_vm0, %v13468_v0  ;;  %v12838_v8 = vld [vmem:[%s13636_s23 + $0xc0] sm:$0xff]  ;;  %v12839_v12 = vld [vmem:[%s13636_s23 + $0xc8] sm:$0xff]  ;;  %13099 = vmatpush3.msra.mxu0 %v579_v2  ;;  %v464_v15 = vadd.f32 %v12827_v11, %v439_v10  ;;  %s15086_s12 = smov (!%p418_p2, %s13447_s12), 1 }
  0x70   : > { %434 = vst.msk [vmem:[#allocation2 + $0x40] sm:$0xff] %vm425_vm0, %v13468_v0  ;;  %435 = vst.msk [vmem:[#allocation2 + $0x48] sm:$0xff] %vm425_vm0, %v13468_v0  ;;  %v12850_v9 = vld [vmem:[%s13636_s23 + $0x120] sm:$0xff]  ;;  %v488_v13 = vadd.f32 %v12838_v8, %v463_v7  ;;  %v12851_v16 = vld [vmem:[%s13636_s23 + $0x128] sm:$0xff]  ;;  %13100 = vmatprep.subr.mxu0 %v578_v3  ;;  %s420_s4 = scalar_lea.vmem %s15039_s9, %s15086_s12 }
  0x71   : > { %436 = vst.msk [vmem:[#allocation2 + $0x50] sm:$0xff] %vm425_vm0, %v13468_v0  ;;  %437 = vst.msk [vmem:[#allocation2 + $0x58] sm:$0xff] %vm425_vm0, %v13468_v0  ;;  %v440_v17 = vld [vmem:[%s13636_s23 + $0x10] sm:$0xff]  ;;  %13101 = vmatpush3.msra.mxu0 %v578_v3  ;;  %v489_v22 = vadd.f32 %v12839_v12, %v464_v15  ;;  %v441_v25 = vld [vmem:[%s13636_s23 + $0x18] sm:$0xff] }
  0x72   : > { %v12828_v19 = vld [vmem:[%s13636_s23 + $0x70] sm:$0xff]  ;;  %v513_v21 = vadd.f32 %v12850_v9, %v488_v13  ;;  %v12829_v26 = vld [vmem:[%s13636_s23 + $0x78] sm:$0xff]  ;;  %13102 = vmatprep.subr.mxu0 %v577_v6  ;;  %v442_v34 = vld [vmem:[%s13636_s23 + $0x20] sm:$0xff] }
  0x73   : > { %v525_v14 = vld [vmem:[#allocation2] sm:$0xff]  ;;  %v526_v18 = vld [vmem:[#allocation2 + $0x8] sm:$0xff]  ;;  %v12840_v20 = vld [vmem:[%s13636_s23 + $0xd0] sm:$0xff]  ;;  %v465_v23 = vadd.f32 %v12828_v19, %v440_v17  ;;  %v466_v28 = vadd.f32 %v12829_v26, %v441_v25  ;;  %13103 = vmatpush3.msra.mxu0 %v577_v6  ;;  %v514_v32 = vadd.f32 %v12851_v16, %v489_v22 }
  0x74   : > { %v12852_v24 = vld [vmem:[%s13636_s23 + $0x130] sm:$0xff]  ;;  %v12841_v29 = vld [vmem:[%s13636_s23 + $0xd8] sm:$0xff]  ;;  %v537_v31 = vadd.f32 %v525_v14, %v513_v21  ;;  %v12830_v35 = vld [vmem:[%s13636_s23 + $0x80] sm:$0xff] }
  0x75   : > { %v527_v27 = vld [vmem:[#allocation2 + $0x10] sm:$0xff]  ;;  %v12853_v30 = vld [vmem:[%s13636_s23 + $0x138] sm:$0xff]  ;;  %v490_v33 = vadd.f32 %v12840_v20, %v465_v23  ;;  %v12842_v36 = vld [vmem:[%s13636_s23 + $0xe0] sm:$0xff]  ;;  %v491_v37 = vadd.f32 %v12841_v29, %v466_v28  ;;  %v467_v39 = vadd.f32 %v12830_v35, %v442_v34  ;;  %v538_v42 = vadd.f32 %v526_v18, %v514_v32 }
  0x76   : > { %v528_v38 = vld [vmem:[#allocation2 + $0x18] sm:$0xff]  ;;  %v12854_v40 = vld [vmem:[%s13636_s23 + $0x140] sm:$0xff]  ;;  %v443_v41 = vld [vmem:[%s13636_s23 + $0x28] sm:$0xff]  ;;  %550 = vst.msk [vmem:[#allocation2] sm:$0xff] %vm425_vm0, %v537_v31 }
  0x77   : > { %v515_v43 = vadd.f32 %v12852_v24, %v490_v33  ;;  %v529_v44 = vld [vmem:[#allocation2 + $0x20] sm:$0xff]  ;;  %v12831_v45 = vld [vmem:[%s13636_s23 + $0x88] sm:$0xff]  ;;  %v516_v47 = vadd.f32 %v12853_v30, %v491_v37  ;;  %v492_v48 = vadd.f32 %v12842_v36, %v467_v39  ;;  %v444_v51 = vld [vmem:[%s13636_s23 + $0x30] sm:$0xff]  ;;  %551 = vst.msk [vmem:[#allocation2 + $0x8] sm:$0xff] %vm425_vm0, %v538_v42 }
  0x78   : > { %v12843_v46 = vld [vmem:[%s13636_s23 + $0xe8] sm:$0xff]  ;;  %v468_v49 = vadd.f32 %v12831_v45, %v443_v41  ;;  %v12832_v52 = vld [vmem:[%s13636_s23 + $0x90] sm:$0xff]  ;;  %v445_v61 = vld [vmem:[%s13636_s23 + $0x38] sm:$0xff] }
  0x79   : > { %v12855_v50 = vld [vmem:[%s13636_s23 + $0x148] sm:$0xff]  ;;  %v539_v53 = vadd.f32 %v527_v27, %v515_v43  ;;  %v469_v55 = vadd.f32 %v12832_v52, %v444_v51  ;;  %v12844_v56 = vld [vmem:[%s13636_s23 + $0xf0] sm:$0xff]  ;;  %v540_v58 = vadd.f32 %v528_v38, %v516_v47  ;;  %v517_v59 = vadd.f32 %v12854_v40, %v492_v48  ;;  %v12833_v62 = vld [vmem:[%s13636_s23 + $0x98] sm:$0xff] }
  0x7a   : > { %v530_v54 = vld [vmem:[#allocation2 + $0x28] sm:$0xff]  ;;  %v12856_v57 = vld [vmem:[%s13636_s23 + $0x150] sm:$0xff]  ;;  %v493_v60 = vadd.f32 %v12843_v46, %v468_v49  ;;  %v12845_v63 = vld [vmem:[%s13636_s23 + $0xf8] sm:$0xff]  ;;  %v470_v3 = vadd.f32 %v12833_v62, %v445_v61 }
  0x7b   : > { %552 = vst.msk [vmem:[#allocation2 + $0x10] sm:$0xff] %vm425_vm0, %v539_v53  ;;  %v494_v1 = vadd.f32 %v12844_v56, %v469_v55  ;;  %v531_v2 = vld [vmem:[#allocation2 + $0x30] sm:$0xff]  ;;  %v12857_v4 = vld [vmem:[%s13636_s23 + $0x158] sm:$0xff]  ;;  %v446_v5 = vld [vmem:[%s13636_s23 + $0x40] sm:$0xff]  ;;  %v541_v6 = vadd.f32 %v529_v44, %v517_v59 }
  0x7c   : > { %553 = vst.msk [vmem:[#allocation2 + $0x18] sm:$0xff] %vm425_vm0, %v540_v58  ;;  %v518_v7 = vadd.f32 %v12855_v50, %v493_v60  ;;  %v532_v8 = vld [vmem:[#allocation2 + $0x38] sm:$0xff]  ;;  %v12834_v9 = vld [vmem:[%s13636_s23 + $0xa0] sm:$0xff]  ;;  %v495_v12 = vadd.f32 %v12845_v63, %v470_v3  ;;  %v447_v15 = vld [vmem:[%s13636_s23 + $0x48] sm:$0xff] }
  0x7d   : > { %v12846_v10 = vld [vmem:[%s13636_s23 + $0x100] sm:$0xff]  ;;  %v519_v11 = vadd.f32 %v12856_v57, %v494_v1  ;;  %v471_v13 = vadd.f32 %v12834_v9, %v446_v5  ;;  %v12835_v16 = vld [vmem:[%s13636_s23 + $0xa8] sm:$0xff]  ;;  %554 = vst.msk [vmem:[#allocation2 + $0x20] sm:$0xff] %vm425_vm0, %v541_v6  ;;  %v448_v26 = vld [vmem:[%s13636_s23 + $0x50] sm:$0xff] }
  0x7e   : > { %v12858_v14 = vld [vmem:[%s13636_s23 + $0x160] sm:$0xff]  ;;  %v542_v18 = vadd.f32 %v530_v54, %v518_v7  ;;  %v472_v20 = vadd.f32 %v12835_v16, %v447_v15  ;;  %v12847_v21 = vld [vmem:[%s13636_s23 + $0x108] sm:$0xff]  ;;  %v520_v23 = vadd.f32 %v12857_v4, %v495_v12  ;;  %v12836_v27 = vld [vmem:[%s13636_s23 + $0xb0] sm:$0xff] }
  0x7f   : > { %v565_v17 = vld [vmem:[#allocation2] sm:$0xff]  ;;  %v543_v22 = vadd.f32 %v531_v2, %v519_v11  ;;  %v496_v24 = vadd.f32 %v12846_v10, %v471_v13  ;;  %v12859_v25 = vld [vmem:[%s13636_s23 + $0x168] sm:$0xff]  ;;  %v473_v31 = vadd.f32 %v12836_v27, %v448_v26  ;;  %v12848_v32 = vld [vmem:[%s13636_s23 + $0x110] sm:$0xff] }
  0x80   : > { %v533_v19 = vld [vmem:[#allocation2 + $0x40] sm:$0xff]  ;;  %13104 = vmatprep.mubr.msk.f32.mxu0 %vm425_vm0, %v565_v17  ;;  %v566_v28 = vld [vmem:[#allocation2 + $0x8] sm:$0xff]  ;;  %555 = vst.msk [vmem:[#allocation2 + $0x28] sm:$0xff] %vm425_vm0, %v542_v18  ;;  %v497_v29 = vadd.f32 %v12847_v21, %v472_v20  ;;  %v544_v33 = vadd.f32 %v532_v8, %v520_v23  ;;  %v12860_v35 = vld [vmem:[%s13636_s23 + $0x170] sm:$0xff] }
  0x81   : > { %v534_v30 = vld [vmem:[#allocation2 + $0x48] sm:$0xff]  ;;  %13105 = vmatmul.mubr.msk.f32.vlgmr.msra.gmra.mxu0 %vm425_vm0, %v566_v28  ;;  %556 = vst.msk [vmem:[#allocation2 + $0x30] sm:$0xff] %vm425_vm0, %v543_v22  ;;  %v521_v34 = vadd.f32 %v12858_v14, %v496_v24  ;;  %v449_v36 = vld [vmem:[%s13636_s23 + $0x58] sm:$0xff]  ;;  %v498_v40 = vadd.f32 %v12848_v32, %v473_v31  ;;  %v535_v45 = vld [vmem:[#allocation2 + $0x50] sm:$0xff] }
  0x82   : > { %v12837_v37 = vld [vmem:[%s13636_s23 + $0xb8] sm:$0xff]  ;;  %v567_v38 = vld [vmem:[#allocation2 + $0x10] sm:$0xff]  ;;  %v522_v39 = vadd.f32 %v12859_v25, %v497_v29  ;;  %557 = vst.msk [vmem:[#allocation2 + $0x38] sm:$0xff] %vm425_vm0, %v544_v33  ;;  %v742_v62 = vld [vmem:[%s15032_s2] sm:$0xff] }
  0x83   : > { %v474_v41 = vadd.f32 %v12837_v37, %v449_v36  ;;  %v12849_v42 = vld [vmem:[%s13636_s23 + $0x118] sm:$0xff]  ;;  %13107 = vmatprep.mubr.msk.f32.mxu0 %vm425_vm0, %v567_v38  ;;  %v545_v44 = vadd.f32 %v533_v19, %v521_v34  ;;  %v523_v48 = vadd.f32 %v12860_v35, %v498_v40  ;;  %v743_v12 = vld [vmem:[%s15032_s2 + $0x8] sm:$0xff]  ;;  %v744_v14 = vld [vmem:[%s15032_s2 + $0x10] sm:$0xff] }
  0x84   : > { %v568_v43 = vld [vmem:[#allocation2 + $0x18] sm:$0xff]  ;;  %v546_v47 = vadd.f32 %v534_v30, %v522_v39  ;;  %v569_v50 = vld [vmem:[#allocation2 + $0x20] sm:$0xff]  ;;  %v747_v17 = vld [vmem:[%s15032_s2 + $0x28] sm:$0xff] }
  0x85   : > { %v12861_v46 = vld [vmem:[%s13636_s23 + $0x178] sm:$0xff]  ;;  %v499_v49 = vadd.f32 %v12849_v42, %v474_v41  ;;  %13108 = vmatmul.mubr.msk.f32.gmra.mxu0 %vm425_vm0, %v568_v43  ;;  %558 = vst.msk [vmem:[#allocation2 + $0x40] sm:$0xff] %vm425_vm0, %v545_v44  ;;  %v547_v52 = vadd.f32 %v535_v45, %v523_v48  ;;  %v746_v16 = vld [vmem:[%s15032_s2 + $0x20] sm:$0xff]  ;;  %v868_v18 = vld [vmem:[#allocation5 + $0x30] sm:$0xff] }
  0x86   : > { %v536_v51 = vld [vmem:[#allocation2 + $0x58] sm:$0xff]  ;;  %13110 = vmatprep.mubr.msk.f32.mxu0 %vm425_vm0, %v569_v50  ;;  %559 = vst.msk [vmem:[#allocation2 + $0x48] sm:$0xff] %vm425_vm0, %v546_v47  ;;  %v863_v20 = vld [vmem:[#allocation5 + $0x8] sm:$0xff]  ;;  %v881_v21 = vld [vmem:[#allocation5 + $0x90] sm:$0xff] }
  0x87   : > { %v524_v53 = vadd.f32 %v12861_v46, %v499_v49  ;;  %v570_v54 = vld [vmem:[#allocation2 + $0x28] sm:$0xff]  ;;  %560 = vst.msk [vmem:[#allocation2 + $0x50] sm:$0xff] %vm425_vm0, %v547_v52  ;;  %v869_v13 = vld [vmem:[#allocation5 + $0x38] sm:$0xff]  ;;  %v862_v22 = vld [vmem:[#allocation5] sm:$0xff] }
  0x88   : > { %v571_v55 = vld [vmem:[#allocation2 + $0x30] sm:$0xff]  ;;  %v745_v15 = vld [vmem:[%s15032_s2 + $0x18] sm:$0xff]  ;;  %v876_v23 = vld [vmem:[#allocation5 + $0x68] sm:$0xff] }
  0x89   : > { %v548_v56 = vadd.f32 %v536_v51, %v524_v53  ;;  %13111 = vmatmul.mubr.msk.f32.gmra.mxu0 %vm425_vm0, %v570_v54  ;;  %v572_v57 = vld [vmem:[#allocation2 + $0x38] sm:$0xff]  ;;  %v875_v25 = vld [vmem:[#allocation5 + $0x60] sm:$0xff]  ;;  %v884_v26 = vld [vmem:[#allocation5 + $0xa8] sm:$0xff] }
  0x8a   : > { %13113 = vmatprep.mubr.msk.f32.mxu0 %vm425_vm0, %v571_v55  ;;  %v882_v19 = vld [vmem:[#allocation5 + $0x98] sm:$0xff]  ;;  %v872_v28 = vld [vmem:[#allocation5 + $0x50] sm:$0xff]  ;;  %v867_v30 = vld [vmem:[#allocation5 + $0x28] sm:$0xff] }
  0x8b   : > { %561 = vst.msk [vmem:[#allocation2 + $0x58] sm:$0xff] %vm425_vm0, %v548_v56  ;;  %920 = vmatprep.subr.mxu1 %v882_v19  ;;  %v873_v24 = vld [vmem:[#allocation5 + $0x58] sm:$0xff]  ;;  %v883_v32 = vld [vmem:[#allocation5 + $0xa0] sm:$0xff]  ;;  %v1330_v35 = vld [vmem:[#allocation5 + $0x108] sm:$0xff] }
  0x8c   : > { %v573_v58 = vld [vmem:[#allocation2 + $0x40] sm:$0xff]  ;;  %921 = vmatpush1.msra.mxu1 %v881_v21  ;;  %v878_v34 = vld [vmem:[#allocation5 + $0x78] sm:$0xff]  ;;  %v877_v36 = vld [vmem:[#allocation5 + $0x70] sm:$0xff] }
  0x8d   : > { %13114 = vmatmul.mubr.msk.f32.gmra.mxu0 %vm425_vm0, %v572_v57  ;;  %v574_v59 = vld [vmem:[#allocation2 + $0x48] sm:$0xff]  ;;  %922 = vmatprep.subr.mxu1 %v876_v23  ;;  %v866_v33 = vld [vmem:[#allocation5 + $0x20] sm:$0xff]  ;;  %v886_v38 = vld [vmem:[#allocation5 + $0xb8] sm:$0xff] }
  0x8e   : > { %13116 = vmatprep.mubr.msk.f32.mxu0 %vm425_vm0, %v573_v58  ;;  %v575_v60 = vld [vmem:[#allocation2 + $0x50] sm:$0xff]  ;;  %923 = vmatpush1.msra.mxu1 %v875_v25  ;;  %v1329_v37 = vld [vmem:[#allocation5 + $0x100] sm:$0xff]  ;;  %v1324_v39 = vld [vmem:[#allocation5 + $0xd8] sm:$0xff] }
  0x8f   : > { %991 = vmatprep.subr.mxu1 %v884_v26  ;;  %v885_v40 = vld [vmem:[#allocation5 + $0xb0] sm:$0xff]  ;;  %v880_v42 = vld [vmem:[#allocation5 + $0x88] sm:$0xff]  ;;  %v1563_v44 = vld [vmem:[#allocation5 + $0x158] sm:$0xff] }
  0x90   : > { %v1323_v41 = vld [vmem:[#allocation5 + $0xd0] sm:$0xff]  ;;  %v879_v45 = vld [vmem:[#allocation5 + $0x80] sm:$0xff]  ;;  %v871_v47 = vld [vmem:[#allocation5 + $0x48] sm:$0xff] }
  0x91   : > { %13117 = vmatmul.mubr.msk.f32.gmra.mxu0 %vm425_vm0, %v574_v59  ;;  %v1562_v46 = vld [vmem:[#allocation5 + $0x150] sm:$0xff]  ;;  %v1557_v48 = vld [vmem:[#allocation5 + $0x128] sm:$0xff]  ;;  %v870_v49 = vld [vmem:[#allocation5 + $0x40] sm:$0xff] }
  0x92   : > { %13119 = vmatprep.mubr.msk.f32.mxu0 %vm425_vm0, %v575_v60  ;;  %v576_v61 = vld [vmem:[#allocation2 + $0x58] sm:$0xff]  ;;  %v1556_v50 = vld [vmem:[#allocation5 + $0x120] sm:$0xff]  ;;  %v864_v54 = vld [vmem:[#allocation5 + $0x10] sm:$0xff] }
  0x93   : > { %v865_v51 = vld [vmem:[#allocation5 + $0x18] sm:$0xff]  ;;  %v1566_v55 = vld [vmem:[#allocation5 + $0x170] sm:$0xff]  ;;  %v1561_v57 = vld [vmem:[#allocation5 + $0x148] sm:$0xff] }
  0x94   : > { %v1567_v53 = vld [vmem:[#allocation5 + $0x178] sm:$0xff]  ;;  %v1327_v58 = vld [vmem:[#allocation5 + $0xf0] sm:$0xff]  ;;  %v1560_v59 = vld [vmem:[#allocation5 + $0x140] sm:$0xff] }
  0x95   : > { %13120 = vmatmul.mubr.msk.f32.gmra.mxu0 %vm425_vm0, %v576_v61  ;;  %v1328_v56 = vld [vmem:[#allocation5 + $0xf8] sm:$0xff]  ;;  %v1322_v60 = vld [vmem:[#allocation5 + $0xc8] sm:$0xff]  ;;  %v1797_v21 = vld [vmem:[#allocation5 + $0x1b0] sm:$0xff] }
  0x96   : > { %13146 = vmatprep.mubr.msk.f32.mxu0 %vm748_vm1, %v742_v62  ;;  %v1800_v61 = vld [vmem:[#allocation5 + $0x1c8] sm:$0xff]  ;;  %v1321_v62 = vld [vmem:[#allocation5 + $0xc0] sm:$0xff]  ;;  %v1798_v19 = vld [vmem:[#allocation5 + $0x1b8] sm:$0xff] }
  0x97   : > { %v1792_v23 = vld [vmem:[#allocation5 + $0x188] sm:$0xff]  ;;  %v1791_v25 = vld [vmem:[#allocation5 + $0x180] sm:$0xff] }
  0x98   : > { %v2269_v26 = vld [vmem:[#allocation5 + $0x280] sm:$0xff] }
 0x141   : > { %v13106_v63 = vpop.f32.mrf.mxu0 }
 0x143   : > { %v683_v1 = vpop.f32.mrf.mxu0 }
 0x145   : > { %v13109_v2 = vpop.f32.mrf.mxu0 }
 0x147   : > { %v693_v3 = vpop.f32.mrf.mxu0 }
 0x149   : > { %v13112_v4 = vpop.f32.mrf.mxu0 }
 0x14b   : > { %v703_v5 = vpop.f32.mrf.mxu0 }
 0x14d   : > { %v13115_v6 = vpop.f32.mrf.mxu0 }
 0x14f   : > { %v713_v7 = vpop.f32.mrf.mxu0 }
 0x151   : > { %v13118_v8 = vpop.f32.mrf.mxu0 }
 0x153   : > { %v723_v9 = vpop.f32.mrf.mxu0 }
 0x155   : > { %v13121_v10 = vpop.f32.mrf.mxu0 }
 0x156   : > { %13122 = vmatprep.subr.mxu0 %v13121_v10 }
 0x157   : > { %v733_v11 = vpop.f32.mrf.mxu0  ;;  %13123 = vmatpush3.msra.mxu0 %v13121_v10  ;;  %v1565_v10 = vld [vmem:[#allocation5 + $0x168] sm:$0xff] }
 0x158   : > { %13124 = vmatprep.subr.mxu0 %v733_v11 }
 0x159   : > { %13125 = vmatpush3.msra.mxu0 %v733_v11  ;;  %v2027_v11 = vld [vmem:[#allocation5 + $0x1e8] sm:$0xff] }
 0x15a   : > { %13126 = vmatprep.subr.mxu0 %v13118_v8 }
 0x15b   : > { %13127 = vmatpush3.msra.mxu0 %v13118_v8  ;;  %v1325_v8 = vld [vmem:[#allocation5 + $0xe0] sm:$0xff] }
 0x15c   : > { %13128 = vmatprep.subr.mxu0 %v723_v9 }
 0x15d   : > { %13129 = vmatpush3.msra.mxu0 %v723_v9  ;;  %v2032_v9 = vld [vmem:[#allocation5 + $0x210] sm:$0xff] }
 0x15e   : > { %13130 = vmatprep.subr.mxu0 %v13115_v6 }
 0x15f   : > { %13131 = vmatpush3.msra.mxu0 %v13115_v6 }
 0x160   : > { %13132 = vmatprep.subr.mxu0 %v713_v7 }
 0x161   : > { %13133 = vmatpush3.msra.mxu0 %v713_v7  ;;  %v2033_v7 = vld [vmem:[#allocation5 + $0x218] sm:$0xff] }
 0x162   : > { %13134 = vmatprep.subr.mxu0 %v13112_v4 }
 0x163   : > { %13135 = vmatpush3.msra.mxu0 %v13112_v4  ;;  %v1793_v4 = vld [vmem:[#allocation5 + $0x190] sm:$0xff] }
 0x164   : > { %13136 = vmatprep.subr.mxu0 %v703_v5 }
 0x165   : > { %13137 = vmatpush3.msra.mxu0 %v703_v5  ;;  %v1326_v5 = vld [vmem:[#allocation5 + $0xe8] sm:$0xff] }
 0x166   : > { %13138 = vmatprep.subr.mxu0 %v13109_v2 }
 0x167   : > { %13139 = vmatpush3.msra.mxu0 %v13109_v2  ;;  %v1794_v2 = vld [vmem:[#allocation5 + $0x198] sm:$0xff] }
 0x168   : > { %13140 = vmatprep.subr.mxu0 %v693_v3 }
 0x169   : > { %13141 = vmatpush3.msra.mxu0 %v693_v3  ;;  %v1331_v3 = vld [vmem:[#allocation5 + $0x110] sm:$0xff] }
 0x16a   : > { %13142 = vmatprep.subr.mxu0 %v13106_v63 }
 0x16b   : > { %13143 = vmatpush3.msra.mxu0 %v13106_v63  ;;  %v1799_v63 = vld [vmem:[#allocation5 + $0x1c0] sm:$0xff] }
 0x16c   : > { %13144 = vmatprep.subr.mxu0 %v683_v1 }
 0x16d   : > { %13145 = vmatpush3.msra.mxu0 %v683_v1  ;;  %v1332_v1 = vld [vmem:[#allocation5 + $0x118] sm:$0xff] }
 0x16e   : > { %13147 = vmatmul.mubr.msk.f32.vlgmr.msra.gmra.mxu0 %vm748_vm1, %v743_v12  ;;  %1135 = vmatprep.subr.mxu0 %v869_v13  ;;  %v1564_v12 = vld [vmem:[#allocation5 + $0x160] sm:$0xff] }
 0x16f   : > { %13149 = vmatprep.mubr.msk.f32.mxu0 %vm748_vm1, %v744_v14  ;;  %1136 = vmatpush1.msra.mxu0 %v868_v18  ;;  %v2026_v13 = vld [vmem:[#allocation5 + $0x1e0] sm:$0xff]  ;;  %v1559_v14 = vld [vmem:[#allocation5 + $0x138] sm:$0xff]  ;;  %v2036_v18 = vld [vmem:[#allocation5 + $0x230] sm:$0xff] }
 0x170   : > { %1137 = vmatprep.subr.mxu0 %v863_v20  ;;  %v2031_v20 = vld [vmem:[#allocation5 + $0x208] sm:$0xff] }
 0x171   : > { %1138 = vmatpush1.msra.mxu0 %v862_v22  ;;  %v2030_v22 = vld [vmem:[#allocation5 + $0x200] sm:$0xff] }
 0x172   : > { %13150 = vmatmul.mubr.msk.f32.gmra.mxu0 %vm748_vm1, %v745_v15  ;;  %1277 = vmatprep.subr.mxu0 %v873_v24  ;;  %v2270_v24 = vld [vmem:[#allocation5 + $0x288] sm:$0xff] }
 0x173   : > { %13152 = vmatprep.mubr.msk.f32.mxu0 %vm748_vm1, %v746_v16  ;;  %v2037_v16 = vld [vmem:[#allocation5 + $0x238] sm:$0xff] }
 0x176   : > { %13153 = vmatmul.mubr.msk.f32.gmra.mxu0 %vm748_vm1, %v747_v17  ;;  %v1558_v17 = vld [vmem:[#allocation5 + $0x130] sm:$0xff] }
 0x177   : > { %1171 = vmatprep.mubr.f32.mxu0 %v13468_v0 }
 0x22e   : > { %v13784_v27 = vpop.f32.mrf.mxu0 }
 0x230   : > { %v13786_v29 = vpop.f32.mrf.mxu0 }
 0x231   : > { %12883 = vmatmul.mubr.msk.f32.vlgmr.msra.gmra.mxu0 %vm889_vm2, %v13786_v29  ;;  %v888_v31 = vrot.slane %v13786_v29, 1  ;;  %v13798_v43 = vrot.slane %v13786_v29, 2  ;;  %v13806_v52 = vrot.slane %v13786_v29, 3  ;;  %v13821_v6 = vrot.slane %v13786_v29, 4 }
 0x232   : > { %1278 = vmatpush1.msra.mxu0 %v872_v28  ;;  %1313 = vmatprep.mubr.f32.mxu0 %v13468_v0  ;;  %v13830_v15 = vrot.slane %v13786_v29, 5  ;;  %v1802_v28 = vld [vmem:[#allocation5 + $0x1d8] sm:$0xff] }
 0x233   : > { %12880 = vmatmul.mubr.msk.f32.vlgmr.msra.gmra.mxu1 %vm889_vm2, %v888_v31  ;;  %1279 = vmatprep.subr.mxu0 %v867_v30  ;;  %v2264_v30 = vld [vmem:[#allocation5 + $0x258] sm:$0xff] }
 0x234   : > { %992 = vmatpush1.msra.mxu1 %v883_v32  ;;  %1280 = vmatpush1.msra.mxu0 %v866_v33  ;;  %v2263_v32 = vld [vmem:[#allocation5 + $0x250] sm:$0xff]  ;;  %v1796_v33 = vld [vmem:[#allocation5 + $0x1a8] sm:$0xff] }
 0x235   : > { %993 = vmatprep.subr.mxu1 %v878_v34  ;;  %12885 = vmatmul.mubr.msk.f32.vlgmr.msra.gmra.mxu0 %vm889_vm2, %v13786_v29  ;;  %v13845_v34 = vrot.slane %v13786_v29, 6 }
 0x236   : > { %1435 = vmatprep.subr.mxu0 %v1330_v35  ;;  %994 = vmatpush1.msra.mxu1 %v877_v36  ;;  %v2503_v35 = vld [vmem:[#allocation5 + $0x2d8] sm:$0xff]  ;;  %v1795_v36 = vld [vmem:[#allocation5 + $0x1a0] sm:$0xff] }
 0x237   : > { %1027 = vmatprep.mubr.f32.mxu1 %v13468_v0  ;;  %1436 = vmatpush1.msra.mxu0 %v1329_v37  ;;  %v2502_v37 = vld [vmem:[#allocation5 + $0x2d0] sm:$0xff] }
 0x238   : > { %12881 = vmatmul.mubr.msk.f32.vlgmr.msra.gmra.mxu1 %vm889_vm2, %v888_v31  ;;  %1062 = vmatprep.subr.mxu1 %v886_v38  ;;  %v2035_v38 = vld [vmem:[#allocation5 + $0x228] sm:$0xff] }
 0x239   : > { %1437 = vmatprep.subr.mxu0 %v1324_v39  ;;  %1063 = vmatpush1.msra.mxu1 %v885_v40  ;;  %v2497_v39 = vld [vmem:[#allocation5 + $0x2a8] sm:$0xff]  ;;  %v2034_v40 = vld [vmem:[#allocation5 + $0x220] sm:$0xff] }
 0x23a   : > { %1438 = vmatpush1.msra.mxu0 %v1323_v41  ;;  %1471 = vmatprep.mubr.f32.mxu0 %v13468_v0  ;;  %v2496_v41 = vld [vmem:[#allocation5 + $0x2a0] sm:$0xff] }
 0x23b   : > { %1064 = vmatprep.subr.mxu1 %v880_v42  ;;  %12887 = vmatmul.mubr.msk.f32.vlgmr.msra.gmra.mxu0 %vm889_vm2, %v13798_v43  ;;  %v2029_v42 = vld [vmem:[#allocation5 + $0x1f8] sm:$0xff] }
 0x23c   : > { %1599 = vmatprep.subr.mxu0 %v1563_v44  ;;  %1065 = vmatpush1.msra.mxu1 %v879_v45  ;;  %v2507_v44 = vld [vmem:[#allocation5 + $0x2f8] sm:$0xff]  ;;  %v2028_v45 = vld [vmem:[#allocation5 + $0x1f0] sm:$0xff] }
 0x23d   : > { %1098 = vmatprep.mubr.f32.mxu1 %v13468_v0  ;;  %1600 = vmatpush1.msra.mxu0 %v1562_v46  ;;  %v2506_v46 = vld [vmem:[#allocation5 + $0x2f0] sm:$0xff] }
 0x23e   : > { %12882 = vmatmul.mubr.msk.f32.vlgmr.msra.gmra.mxu1 %vm889_vm2, %v888_v31  ;;  %1206 = vmatprep.subr.mxu1 %v871_v47  ;;  %v1801_v31 = vld [vmem:[#allocation5 + $0x1d0] sm:$0xff]  ;;  %v2268_v47 = vld [vmem:[#allocation5 + $0x278] sm:$0xff] }
 0x23f   : > { %1601 = vmatprep.subr.mxu0 %v1557_v48  ;;  %1207 = vmatpush1.msra.mxu1 %v870_v49  ;;  %v2501_v48 = vld [vmem:[#allocation5 + $0x2c8] sm:$0xff]  ;;  %v2267_v49 = vld [vmem:[#allocation5 + $0x270] sm:$0xff] }
 0x240   : > { %1602 = vmatpush1.msra.mxu0 %v1556_v50  ;;  %1635 = vmatprep.mubr.f32.mxu0 %v13468_v0  ;;  %v2262_v50 = vld [vmem:[#allocation5 + $0x248] sm:$0xff] }
 0x241   : > { %1208 = vmatprep.subr.mxu1 %v865_v51  ;;  %12889 = vmatmul.mubr.msk.f32.vlgmr.msra.gmra.mxu0 %vm889_vm2, %v13806_v52  ;;  %v2740_v51 = vld [vmem:[#allocation5 + $0x348] sm:$0xff] }
 0x242   : > { %1741 = vmatprep.subr.mxu0 %v1567_v53  ;;  %1209 = vmatpush1.msra.mxu1 %v864_v54  ;;  %v2739_v53 = vld [vmem:[#allocation5 + $0x340] sm:$0xff]  ;;  %v2272_v54 = vld [vmem:[#allocation5 + $0x298] sm:$0xff] }
 0x243   : > { %1242 = vmatprep.mubr.f32.mxu1 %v13468_v0  ;;  %1742 = vmatpush1.msra.mxu0 %v1566_v55  ;;  %v2734_v55 = vld [vmem:[#allocation5 + $0x318] sm:$0xff] }
 0x244   : > { %12884 = vmatmul.mubr.msk.f32.vlgmr.msra.gmra.mxu1 %vm889_vm2, %v13786_v29  ;;  %1364 = vmatprep.subr.mxu1 %v1328_v56  ;;  %v2271_v56 = vld [vmem:[#allocation5 + $0x290] sm:$0xff] }
 0x245   : > { %1743 = vmatprep.subr.mxu0 %v1561_v57  ;;  %1365 = vmatpush1.msra.mxu1 %v1327_v58  ;;  %v2733_v57 = vld [vmem:[#allocation5 + $0x310] sm:$0xff]  ;;  %v2266_v58 = vld [vmem:[#allocation5 + $0x268] sm:$0xff] }
 0x246   : > { %1744 = vmatpush1.msra.mxu0 %v1560_v59  ;;  %1777 = vmatprep.mubr.f32.mxu0 %v13468_v0  ;;  %v2973_v59 = vld [vmem:[#allocation5 + $0x398] sm:$0xff] }
 0x247   : > { %1366 = vmatprep.subr.mxu1 %v1322_v60  ;;  %12891 = vmatmul.mubr.msk.f32.vlgmr.msra.gmra.mxu0 %vm889_vm2, %v13806_v52  ;;  %v2265_v60 = vld [vmem:[#allocation5 + $0x260] sm:$0xff] }
 0x248   : > { %1905 = vmatprep.subr.mxu0 %v1800_v61  ;;  %1367 = vmatpush1.msra.mxu1 %v1321_v62  ;;  %v2972_v61 = vld [vmem:[#allocation5 + $0x390] sm:$0xff]  ;;  %v2505_v62 = vld [vmem:[#allocation5 + $0x2e8] sm:$0xff] }
 0x249   : > { %1400 = vmatprep.mubr.f32.mxu1 %v13468_v0  ;;  %1906 = vmatpush1.msra.mxu0 %v1799_v63  ;;  %v2967_v63 = vld [vmem:[#allocation5 + $0x368] sm:$0xff] }
 0x24a   : > { %12886 = vmatmul.mubr.msk.f32.vlgmr.msra.gmra.mxu1 %vm889_vm2, %v13798_v43  ;;  %1506 = vmatprep.subr.mxu1 %v1332_v1  ;;  %v2504_v1 = vld [vmem:[#allocation5 + $0x2e0] sm:$0xff] }
 0x24b   : > { %1907 = vmatprep.subr.mxu0 %v1794_v2  ;;  %1507 = vmatpush1.msra.mxu1 %v1331_v3  ;;  %v2966_v2 = vld [vmem:[#allocation5 + $0x360] sm:$0xff]  ;;  %v2499_v3 = vld [vmem:[#allocation5 + $0x2b8] sm:$0xff] }
 0x24c   : > { %1908 = vmatpush1.msra.mxu0 %v1793_v4  ;;  %1941 = vmatprep.mubr.f32.mxu0 %v13468_v0  ;;  %v13875_v4 = vrot.slane %v13784_v27, 1 }
 0x24d   : > { %1508 = vmatprep.subr.mxu1 %v1326_v5  ;;  %12893 = vmatmul.mubr.msk.f32.vlgmr.msra.gmra.mxu0 %vm889_vm2, %v13821_v6  ;;  %v2977_v5 = vld [vmem:[#allocation5 + $0x3b8] sm:$0xff] }
 0x24e   : > { %2069 = vmatprep.subr.mxu0 %v2033_v7  ;;  %1509 = vmatpush1.msra.mxu1 %v1325_v8  ;;  %v2976_v7 = vld [vmem:[#allocation5 + $0x3b0] sm:$0xff]  ;;  %v2738_v8 = vld [vmem:[#allocation5 + $0x338] sm:$0xff] }
 0x24f   : > { %1542 = vmatprep.mubr.f32.mxu1 %v13468_v0  ;;  %2070 = vmatpush1.msra.mxu0 %v2032_v9  ;;  %v2971_v9 = vld [vmem:[#allocation5 + $0x388] sm:$0xff] }
 0x250   : > { %12888 = vmatmul.mubr.msk.f32.vlgmr.msra.gmra.mxu1 %vm889_vm2, %v13798_v43  ;;  %1670 = vmatprep.subr.mxu1 %v1565_v10  ;;  %v13854_v43 = vrot.slane %v13786_v29, 7  ;;  %v2500_v29 = vld [vmem:[#allocation5 + $0x2c0] sm:$0xff]  ;;  %v2737_v10 = vld [vmem:[#allocation5 + $0x330] sm:$0xff] }
 0x251   : > { %2071 = vmatprep.subr.mxu0 %v2027_v11  ;;  %1671 = vmatpush1.msra.mxu1 %v1564_v12  ;;  %v2970_v11 = vld [vmem:[#allocation5 + $0x380] sm:$0xff]  ;;  %v2732_v12 = vld [vmem:[#allocation5 + $0x308] sm:$0xff] }
 0x252   : > { %2072 = vmatpush1.msra.mxu0 %v2026_v13  ;;  %2105 = vmatprep.mubr.f32.mxu0 %v13468_v0  ;;  %v3210_v13 = vld [vmem:[#allocation5 + $0x408] sm:$0xff] }
 0x253   : > { %1672 = vmatprep.subr.mxu1 %v1559_v14  ;;  %12895 = vmatmul.mubr.msk.f32.vlgmr.msra.gmra.mxu0 %vm889_vm2, %v13830_v15  ;;  %v2731_v14 = vld [vmem:[#allocation5 + $0x300] sm:$0xff] }
 0x254   : > { %2211 = vmatprep.subr.mxu0 %v2037_v16  ;;  %1673 = vmatpush1.msra.mxu1 %v1558_v17  ;;  %v2742_v16 = vld [vmem:[#allocation5 + $0x358] sm:$0xff] }
 0x255   : > { %1706 = vmatprep.mubr.f32.mxu1 %v13468_v0  ;;  %2212 = vmatpush1.msra.mxu0 %v2036_v18  ;;  %v3204_v17 = vld [vmem:[#allocation5 + $0x3d8] sm:$0xff]  ;;  %v2741_v18 = vld [vmem:[#allocation5 + $0x350] sm:$0xff] }
 0x256   : > { %12890 = vmatmul.mubr.msk.f32.vlgmr.msra.gmra.mxu1 %vm889_vm2, %v13806_v52  ;;  %1834 = vmatprep.subr.mxu1 %v1798_v19  ;;  %v2261_v52 = vld [vmem:[#allocation5 + $0x240] sm:$0xff]  ;;  %v3203_v19 = vld [vmem:[#allocation5 + $0x3d0] sm:$0xff] }
 0x257   : > { %2213 = vmatprep.subr.mxu0 %v2031_v20  ;;  %1835 = vmatpush1.msra.mxu1 %v1797_v21  ;;  %v2736_v20 = vld [vmem:[#allocation5 + $0x328] sm:$0xff]  ;;  %v13890_v21 = vrot.slane %v13784_v27, 2 }
 0x258   : > { %2214 = vmatpush1.msra.mxu0 %v2030_v22  ;;  %2247 = vmatprep.mubr.f32.mxu0 %v13468_v0  ;;  %v3443_v22 = vld [vmem:[#allocation5 + $0x458] sm:$0xff] }
 0x259   : > { %1836 = vmatprep.subr.mxu1 %v1792_v23  ;;  %12897 = vmatmul.mubr.msk.f32.vlgmr.msra.gmra.mxu0 %vm889_vm2, %v13830_v15  ;;  %v2735_v23 = vld [vmem:[#allocation5 + $0x320] sm:$0xff] }
 0x25a   : > { %2375 = vmatprep.subr.mxu0 %v2270_v24  ;;  %1837 = vmatpush1.msra.mxu1 %v1791_v25  ;;  %v3442_v24 = vld [vmem:[#allocation5 + $0x450] sm:$0xff]  ;;  %v2975_v25 = vld [vmem:[#allocation5 + $0x3a8] sm:$0xff] }
 0x25b   : > { %1870 = vmatprep.mubr.f32.mxu1 %v13468_v0  ;;  %2376 = vmatpush1.msra.mxu0 %v2269_v26  ;;  %v3437_v26 = vld [vmem:[#allocation5 + $0x428] sm:$0xff] }
 0x25c   : > { %12892 = vmatmul.mubr.msk.f32.vlgmr.msra.gmra.mxu1 %vm889_vm2, %v13821_v6  ;;  %1976 = vmatprep.subr.mxu1 %v1802_v28  ;;  %v2974_v28 = vld [vmem:[#allocation5 + $0x3a0] sm:$0xff] }
 0x25d   : > { %2377 = vmatprep.subr.mxu0 %v2264_v30  ;;  %1977 = vmatpush1.msra.mxu1 %v1801_v31  ;;  %v3436_v30 = vld [vmem:[#allocation5 + $0x420] sm:$0xff]  ;;  %v2969_v31 = vld [vmem:[#allocation5 + $0x378] sm:$0xff] }
 0x25e   : > { %2378 = vmatpush1.msra.mxu0 %v2263_v32  ;;  %2411 = vmatprep.mubr.f32.mxu0 %v13468_v0  ;;  %v13899_v32 = vrot.slane %v13784_v27, 3 }
 0x25f   : > { %1978 = vmatprep.subr.mxu1 %v1796_v33  ;;  %12899 = vmatmul.mubr.msk.f32.vlgmr.msra.gmra.mxu0 %vm889_vm2, %v13845_v34  ;;  %v3447_v33 = vld [vmem:[#allocation5 + $0x478] sm:$0xff] }
 0x260   : > { %2539 = vmatprep.subr.mxu0 %v2503_v35  ;;  %1979 = vmatpush1.msra.mxu1 %v1795_v36  ;;  %v3446_v35 = vld [vmem:[#allocation5 + $0x470] sm:$0xff]  ;;  %v3208_v36 = vld [vmem:[#allocation5 + $0x3f8] sm:$0xff] }
 0x261   : > { %2012 = vmatprep.mubr.f32.mxu1 %v13468_v0  ;;  %2540 = vmatpush1.msra.mxu0 %v2502_v37  ;;  %v3441_v37 = vld [vmem:[#allocation5 + $0x448] sm:$0xff] }
 0x262   : > { %12894 = vmatmul.mubr.msk.f32.vlgmr.msra.gmra.mxu1 %vm889_vm2, %v13821_v6  ;;  %2140 = vmatprep.subr.mxu1 %v2035_v38  ;;  %v2498_v6 = vld [vmem:[#allocation5 + $0x2b0] sm:$0xff] }
 0x263   : > { %2541 = vmatprep.subr.mxu0 %v2497_v39  ;;  %2141 = vmatpush1.msra.mxu1 %v2034_v40  ;;  %v3207_v38 = vld [vmem:[#allocation5 + $0x3f0] sm:$0xff]  ;;  %v3440_v39 = vld [vmem:[#allocation5 + $0x440] sm:$0xff]  ;;  %v3202_v40 = vld [vmem:[#allocation5 + $0x3c8] sm:$0xff] }
 0x264   : > { %2542 = vmatpush1.msra.mxu0 %v2496_v41  ;;  %2575 = vmatprep.mubr.f32.mxu0 %v13468_v0  ;;  %v3680_v41 = vld [vmem:[#allocation5 + $0x4c8] sm:$0xff] }
 0x265   : > { %2142 = vmatprep.subr.mxu1 %v2029_v42  ;;  %12901 = vmatmul.mubr.msk.f32.vlgmr.msra.gmra.mxu0 %vm889_vm2, %v13854_v43  ;;  %v3201_v42 = vld [vmem:[#allocation5 + $0x3c0] sm:$0xff] }
 0x266   : > { %2681 = vmatprep.subr.mxu0 %v2507_v44  ;;  %2143 = vmatpush1.msra.mxu1 %v2028_v45  ;;  %v3212_v44 = vld [vmem:[#allocation5 + $0x418] sm:$0xff] }
 0x267   : > { %2176 = vmatprep.mubr.f32.mxu1 %v13468_v0  ;;  %2682 = vmatpush1.msra.mxu0 %v2506_v46  ;;  %v3674_v45 = vld [vmem:[#allocation5 + $0x498] sm:$0xff]  ;;  %v3211_v46 = vld [vmem:[#allocation5 + $0x410] sm:$0xff] }
 0x268   : > { %12896 = vmatmul.mubr.msk.f32.vlgmr.msra.gmra.mxu1 %vm889_vm2, %v13830_v15  ;;  %2304 = vmatprep.subr.mxu1 %v2268_v47  ;;  %v3209_v15 = vld [vmem:[#allocation5 + $0x400] sm:$0xff]  ;;  %v3673_v47 = vld [vmem:[#allocation5 + $0x490] sm:$0xff] }
 0x269   : > { %2683 = vmatprep.subr.mxu0 %v2501_v48  ;;  %2305 = vmatpush1.msra.mxu1 %v2267_v49  ;;  %v3206_v48 = vld [vmem:[#allocation5 + $0x3e8] sm:$0xff]  ;;  %v13914_v49 = vrot.slane %v13784_v27, 4 }
 0x26a   : > { %2684 = vmatpush1.msra.mxu0 %v2500_v29  ;;  %2717 = vmatprep.mubr.f32.mxu0 %v13468_v0  ;;  %v3913_v29 = vld [vmem:[#allocation5 + $0x518] sm:$0xff] }
 0x26b   : > { %2306 = vmatprep.subr.mxu1 %v2262_v50  ;;  %12903 = vmatmul.mubr.msk.f32.vlgmr.msra.gmra.mxu0 %vm889_vm2, %v13854_v43  ;;  %v3205_v50 = vld [vmem:[#allocation5 + $0x3e0] sm:$0xff] }
 0x26c   : > { %2845 = vmatprep.subr.mxu0 %v2740_v51  ;;  %2307 = vmatpush1.msra.mxu1 %v2261_v52  ;;  %v3912_v51 = vld [vmem:[#allocation5 + $0x510] sm:$0xff]  ;;  %v3445_v52 = vld [vmem:[#allocation5 + $0x468] sm:$0xff] }
 0x26d   : > { %2340 = vmatprep.mubr.f32.mxu1 %v13468_v0  ;;  %2846 = vmatpush1.msra.mxu0 %v2739_v53  ;;  %v3907_v53 = vld [vmem:[#allocation5 + $0x4e8] sm:$0xff] }
 0x26e   : > { %12898 = vmatmul.mubr.msk.f32.vlgmr.msra.gmra.mxu1 %vm889_vm2, %v13845_v34  ;;  %2446 = vmatprep.subr.mxu1 %v2272_v54  ;;  %v3444_v54 = vld [vmem:[#allocation5 + $0x460] sm:$0xff] }
 0x26f   : > { %2847 = vmatprep.subr.mxu0 %v2734_v55  ;;  %2447 = vmatpush1.msra.mxu1 %v2271_v56  ;;  %v3906_v55 = vld [vmem:[#allocation5 + $0x4e0] sm:$0xff]  ;;  %v3439_v56 = vld [vmem:[#allocation5 + $0x438] sm:$0xff] }
 0x270   : > { %2848 = vmatpush1.msra.mxu0 %v2733_v57  ;;  %2881 = vmatprep.mubr.f32.mxu0 %v13468_v0  ;;  %v13923_v57 = vrot.slane %v13784_v27, 5 }
 0x271   : > { %2448 = vmatprep.subr.mxu1 %v2266_v58  ;;  %12905 = vmatmul.mubr.msk.f32.vlgmr.msra.gmra.mxu0 %vm889_vm2, %v13784_v27  ;;  %v3917_v58 = vld [vmem:[#allocation5 + $0x538] sm:$0xff] }
 0x272   : > { %3009 = vmatprep.subr.mxu0 %v2973_v59  ;;  %2449 = vmatpush1.msra.mxu1 %v2265_v60  ;;  %v3438_v59 = vld [vmem:[#allocation5 + $0x430] sm:$0xff] }
 0x273   : > { %2482 = vmatprep.mubr.f32.mxu1 %v13468_v0  ;;  %3010 = vmatpush1.msra.mxu0 %v2972_v61  ;;  %v3916_v60 = vld [vmem:[#allocation5 + $0x530] sm:$0xff]  ;;  %v3678_v61 = vld [vmem:[#allocation5 + $0x4b8] sm:$0xff] }
 0x274   : > { %12900 = vmatmul.mubr.msk.f32.vlgmr.msra.gmra.mxu1 %vm889_vm2, %v13845_v34  ;;  %2610 = vmatprep.subr.mxu1 %v2505_v62  ;;  %v2968_v34 = vld [vmem:[#allocation5 + $0x370] sm:$0xff]  ;;  %v3911_v62 = vld [vmem:[#allocation5 + $0x508] sm:$0xff] }
 0x275   : > { %3011 = vmatprep.subr.mxu0 %v2967_v63  ;;  %2611 = vmatpush1.msra.mxu1 %v2504_v1  ;;  %v3677_v63 = vld [vmem:[#allocation5 + $0x4b0] sm:$0xff]  ;;  %v3910_v1 = vld [vmem:[#allocation5 + $0x500] sm:$0xff] }
 0x276   : > { %3012 = vmatpush1.msra.mxu0 %v2966_v2  ;;  %3045 = vmatprep.mubr.f32.mxu0 %v13468_v0  ;;  %v3672_v2 = vld [vmem:[#allocation5 + $0x488] sm:$0xff] }
 0x277   : > { %2612 = vmatprep.subr.mxu1 %v2499_v3  ;;  %12907 = vmatmul.mubr.msk.f32.vlgmr.msra.gmra.mxu0 %vm889_vm2, %v13875_v4  ;;  %v4150_v3 = vld [vmem:[#allocation5 + $0x588] sm:$0xff] }
 0x278   : > { %3151 = vmatprep.subr.mxu0 %v2977_v5  ;;  %2613 = vmatpush1.msra.mxu1 %v2498_v6  ;;  %v4149_v5 = vld [vmem:[#allocation5 + $0x580] sm:$0xff]  ;;  %v3682_v6 = vld [vmem:[#allocation5 + $0x4d8] sm:$0xff] }
 0x279   : > { %2646 = vmatprep.mubr.f32.mxu1 %v13468_v0  ;;  %3152 = vmatpush1.msra.mxu0 %v2976_v7  ;;  %v4144_v7 = vld [vmem:[#allocation5 + $0x558] sm:$0xff] }
 0x27a   : > { %12902 = vmatmul.mubr.msk.f32.vlgmr.msra.gmra.mxu1 %vm889_vm2, %v13854_v43  ;;  %2774 = vmatprep.subr.mxu1 %v2738_v8  ;;  %v3679_v43 = vld [vmem:[#allocation5 + $0x4c0] sm:$0xff]  ;;  %v3681_v8 = vld [vmem:[#allocation5 + $0x4d0] sm:$0xff] }
 0x27b   : > { %3153 = vmatprep.subr.mxu0 %v2971_v9  ;;  %2775 = vmatpush1.msra.mxu1 %v2737_v10  ;;  %v4143_v9 = vld [vmem:[#allocation5 + $0x550] sm:$0xff]  ;;  %v3676_v10 = vld [vmem:[#allocation5 + $0x4a8] sm:$0xff] }
 0x27c   : > { %3154 = vmatpush1.msra.mxu0 %v2970_v11  ;;  %3187 = vmatprep.mubr.f32.mxu0 %v13468_v0  ;;  %v13938_v11 = vrot.slane %v13784_v27, 6 }
 0x27d   : > { %2776 = vmatprep.subr.mxu1 %v2732_v12  ;;  %12909 = vmatmul.mubr.msk.f32.vlgmr.msra.gmra.mxu0 %vm889_vm2, %v13875_v4  ;;  %v4383_v12 = vld [vmem:[#allocation5 + $0x5d8] sm:$0xff] }
 0x27e   : > { %3315 = vmatprep.subr.mxu0 %v3210_v13  ;;  %2777 = vmatpush1.msra.mxu1 %v2731_v14  ;;  %v3675_v13 = vld [vmem:[#allocation5 + $0x4a0] sm:$0xff]  ;;  %v4382_v14 = vld [vmem:[#allocation5 + $0x5d0] sm:$0xff] }
 0x27f   : > { %2810 = vmatprep.mubr.f32.mxu1 %v13468_v0  ;;  %3316 = vmatpush1.msra.mxu0 %v3209_v15  ;;  %v3915_v15 = vld [vmem:[#allocation5 + $0x528] sm:$0xff] }
 0x280   : > { %12904 = vmatmul.mubr.msk.f32.vlgmr.msra.gmra.mxu1 %vm889_vm2, %v13784_v27  ;;  %2916 = vmatprep.subr.mxu1 %v2742_v16  ;;  %v4377_v16 = vld [vmem:[#allocation5 + $0x5a8] sm:$0xff] }
 0x281   : > { %3317 = vmatprep.subr.mxu0 %v3204_v17  ;;  %2917 = vmatpush1.msra.mxu1 %v2741_v18  ;;  %v3914_v17 = vld [vmem:[#allocation5 + $0x520] sm:$0xff] }
 0x282   : > { %3318 = vmatpush1.msra.mxu0 %v3203_v19  ;;  %3351 = vmatprep.mubr.f32.mxu0 %v13468_v0  ;;  %v4376_v18 = vld [vmem:[#allocation5 + $0x5a0] sm:$0xff]  ;;  %v3909_v19 = vld [vmem:[#allocation5 + $0x4f8] sm:$0xff] }
 0x283   : > { %2918 = vmatprep.subr.mxu1 %v2736_v20  ;;  %12911 = vmatmul.mubr.msk.f32.vlgmr.msra.gmra.mxu0 %vm889_vm2, %v13890_v21  ;;  %v13947_v20 = vrot.slane %v13784_v27, 7 }
 0x284   : > { %3479 = vmatprep.subr.mxu0 %v3443_v22  ;;  %2919 = vmatpush1.msra.mxu1 %v2735_v23  ;;  %v3908_v22 = vld [vmem:[#allocation5 + $0x4f0] sm:$0xff] }
 0x285   : > { %2952 = vmatprep.mubr.f32.mxu1 %v13468_v0  ;;  %3480 = vmatpush1.msra.mxu0 %v3442_v24  ;;  %v4386_v23 = vld [vmem:[#allocation5 + $0x5f0] sm:$0xff]  ;;  %v4148_v24 = vld [vmem:[#allocation5 + $0x578] sm:$0xff] }
 0x286   : > { %12906 = vmatmul.mubr.msk.f32.vlgmr.msra.gmra.mxu1 %vm889_vm2, %v13784_v27  ;;  %3080 = vmatprep.subr.mxu1 %v2975_v25  ;;  %v4381_v25 = vld [vmem:[#allocation5 + $0x5c8] sm:$0xff]  ;;  %v4380_v27 = vld [vmem:[#allocation5 + $0x5c0] sm:$0xff] }
 0x287   : > { %3481 = vmatprep.subr.mxu0 %v3437_v26  ;;  %3081 = vmatpush1.msra.mxu1 %v2974_v28  ;;  %v4147_v26 = vld [vmem:[#allocation5 + $0x570] sm:$0xff]  ;;  %v4142_v28 = vld [vmem:[#allocation5 + $0x548] sm:$0xff] }
 0x288   : > { %3482 = vmatpush1.msra.mxu0 %v3436_v30  ;;  %3515 = vmatprep.mubr.f32.mxu0 %v13468_v0  ;;  %v4620_v30 = vld [vmem:[#allocation5 + $0x648] sm:$0xff] }
 0x289   : > { %3082 = vmatprep.subr.mxu1 %v2969_v31  ;;  %12913 = vmatmul.mubr.msk.f32.vlgmr.msra.gmra.mxu0 %vm889_vm2, %v13899_v32  ;;  %v4141_v31 = vld [vmem:[#allocation5 + $0x540] sm:$0xff] }
 0x28a   : > { %3621 = vmatprep.subr.mxu0 %v3447_v33  ;;  %3083 = vmatpush1.msra.mxu1 %v2968_v34  ;;  %v4619_v33 = vld [vmem:[#allocation5 + $0x640] sm:$0xff]  ;;  %v4152_v34 = vld [vmem:[#allocation5 + $0x598] sm:$0xff] }
 0x28b   : > { %3116 = vmatprep.mubr.f32.mxu1 %v13468_v0  ;;  %3622 = vmatpush1.msra.mxu0 %v3446_v35  ;;  %v4614_v35 = vld [vmem:[#allocation5 + $0x618] sm:$0xff] }
 0x28c   : > { %12908 = vmatmul.mubr.msk.f32.vlgmr.msra.gmra.mxu1 %vm889_vm2, %v13875_v4  ;;  %3244 = vmatprep.subr.mxu1 %v3208_v36  ;;  %v3671_v4 = vld [vmem:[#allocation5 + $0x480] sm:$0xff]  ;;  %v4151_v36 = vld [vmem:[#allocation5 + $0x590] sm:$0xff] }
 0x28d   : > { %3623 = vmatprep.subr.mxu0 %v3441_v37  ;;  %3245 = vmatpush1.msra.mxu1 %v3207_v38  ;;  %v4613_v37 = vld [vmem:[#allocation5 + $0x610] sm:$0xff] }
 0x28e   : > { %3624 = vmatpush1.msra.mxu0 %v3440_v39  ;;  %3657 = vmatprep.mubr.f32.mxu0 %v13468_v0  ;;  %v4146_v39 = vld [vmem:[#allocation5 + $0x568] sm:$0xff] }
 0x28f   : > { %3246 = vmatprep.subr.mxu1 %v3202_v40  ;;  %12915 = vmatmul.mubr.msk.f32.vlgmr.msra.gmra.mxu0 %vm889_vm2, %v13899_v32  ;;  %v4853_v40 = vld [vmem:[#allocation5 + $0x698] sm:$0xff] }
 0x290   : > { %3785 = vmatprep.subr.mxu0 %v3680_v41  ;;  %3247 = vmatpush1.msra.mxu1 %v3201_v42  ;;  %v4145_v41 = vld [vmem:[#allocation5 + $0x560] sm:$0xff]  ;;  %v4852_v42 = vld [vmem:[#allocation5 + $0x690] sm:$0xff] }
 0x291   : > { %3280 = vmatprep.mubr.f32.mxu1 %v13468_v0  ;;  %3786 = vmatpush1.msra.mxu0 %v3679_v43  ;;  %v4385_v43 = vld [vmem:[#allocation5 + $0x5e8] sm:$0xff] }
 0x292   : > { %12910 = vmatmul.mubr.msk.f32.vlgmr.msra.gmra.mxu1 %vm889_vm2, %v13890_v21  ;;  %3386 = vmatprep.subr.mxu1 %v3212_v44  ;;  %v4847_v44 = vld [vmem:[#allocation5 + $0x668] sm:$0xff] }
 0x293   : > { %3787 = vmatprep.subr.mxu0 %v3674_v45  ;;  %3387 = vmatpush1.msra.mxu1 %v3211_v46  ;;  %v4384_v45 = vld [vmem:[#allocation5 + $0x5e0] sm:$0xff] }
 0x294   : > { %3788 = vmatpush1.msra.mxu0 %v3673_v47  ;;  %3821 = vmatprep.mubr.f32.mxu0 %v13468_v0  ;;  %v4846_v46 = vld [vmem:[#allocation5 + $0x660] sm:$0xff] }
 0x295   : > { %3388 = vmatprep.subr.mxu1 %v3206_v48  ;;  %12917 = vmatmul.mubr.msk.f32.vlgmr.msra.gmra.mxu0 %vm889_vm2, %v13914_v49  ;;  %v4379_v48 = vld [vmem:[#allocation5 + $0x5b8] sm:$0xff] }
 0x296   : > { %3949 = vmatprep.subr.mxu0 %v3913_v29  ;;  %3389 = vmatpush1.msra.mxu1 %v3205_v50  ;;  %v4378_v29 = vld [vmem:[#allocation5 + $0x5b0] sm:$0xff] }
 0x297   : > { %3422 = vmatprep.mubr.f32.mxu1 %v13468_v0  ;;  %3950 = vmatpush1.msra.mxu0 %v3912_v51  ;;  %v4856_v50 = vld [vmem:[#allocation5 + $0x6b0] sm:$0xff]  ;;  %v4618_v51 = vld [vmem:[#allocation5 + $0x638] sm:$0xff] }
 0x298   : > { %12912 = vmatmul.mubr.msk.f32.vlgmr.msra.gmra.mxu1 %vm889_vm2, %v13890_v21  ;;  %3550 = vmatprep.subr.mxu1 %v3445_v52  ;;  %v4387_v21 = vld [vmem:[#allocation5 + $0x5f8] sm:$0xff]  ;;  %v4851_v52 = vld [vmem:[#allocation5 + $0x688] sm:$0xff] }
 0x299   : > { %3951 = vmatprep.subr.mxu0 %v3907_v53  ;;  %3551 = vmatpush1.msra.mxu1 %v3444_v54  ;;  %v4617_v53 = vld [vmem:[#allocation5 + $0x630] sm:$0xff]  ;;  %v4850_v54 = vld [vmem:[#allocation5 + $0x680] sm:$0xff] }
 0x29a   : > { %3952 = vmatpush1.msra.mxu0 %v3906_v55  ;;  %3985 = vmatprep.mubr.f32.mxu0 %v13468_v0  ;;  %v4612_v55 = vld [vmem:[#allocation5 + $0x608] sm:$0xff] }
 0x29b   : > { %3552 = vmatprep.subr.mxu1 %v3439_v56  ;;  %12919 = vmatmul.mubr.msk.f32.vlgmr.msra.gmra.mxu0 %vm889_vm2, %v13923_v57  ;;  %v5090_v56 = vld [vmem:[#allocation5 + $0x708] sm:$0xff] }
 0x29c   : > { %4091 = vmatprep.subr.mxu0 %v3917_v58  ;;  %3553 = vmatpush1.msra.mxu1 %v3438_v59  ;;  %v5089_v58 = vld [vmem:[#allocation5 + $0x700] sm:$0xff]  ;;  %v4622_v59 = vld [vmem:[#allocation5 + $0x658] sm:$0xff] }
 0x29d   : > { %3586 = vmatprep.mubr.f32.mxu1 %v13468_v0  ;;  %4092 = vmatpush1.msra.mxu0 %v3916_v60  ;;  %v5084_v60 = vld [vmem:[#allocation5 + $0x6d8] sm:$0xff] }
 0x29e   : > { %12914 = vmatmul.mubr.msk.f32.vlgmr.msra.gmra.mxu1 %vm889_vm2, %v13899_v32  ;;  %3714 = vmatprep.subr.mxu1 %v3678_v61  ;;  %v13956_v32 = vpop.f32.mrf.mxu0  ;;  %v4621_v61 = vld [vmem:[#allocation5 + $0x650] sm:$0xff] }
 0x29f   : > { %4093 = vmatprep.subr.mxu0 %v3911_v62  ;;  %3715 = vmatpush1.msra.mxu1 %v3677_v63  ;;  %v5083_v62 = vld [vmem:[#allocation5 + $0x6d0] sm:$0xff]  ;;  %v4616_v63 = vld [vmem:[#allocation5 + $0x628] sm:$0xff] }
 0x2a0   : > { %4094 = vmatpush1.msra.mxu0 %v3910_v1  ;;  %4127 = vmatprep.mubr.f32.mxu0 %v13468_v0  ;;  %v13963_v38 = vpop.f32.mrf.mxu0 }
 0x2a1   : > { %3716 = vmatprep.subr.mxu1 %v3672_v2  ;;  %12921 = vmatmul.mubr.msk.f32.vlgmr.msra.gmra.mxu0 %vm889_vm2, %v13923_v57  ;;  %v13970_v47 = vrot.slane %v13963_v38, 1  ;;  %v13987_v1 = vrot.slane %v13963_v38, 2  ;;  %v5323_v2 = vld [vmem:[#allocation5 + $0x758] sm:$0xff] }
 0x2a2   : > { %4255 = vmatprep.subr.mxu0 %v4150_v3  ;;  %3717 = vmatpush1.msra.mxu1 %v3671_v4  ;;  %v4615_v3 = vld [vmem:[#allocation5 + $0x620] sm:$0xff]  ;;  %v5322_v4 = vld [vmem:[#allocation5 + $0x750] sm:$0xff] }
 0x2a3   : > { %3750 = vmatprep.mubr.f32.mxu1 %v13468_v0  ;;  %4256 = vmatpush1.msra.mxu0 %v4149_v5  ;;  %v4855_v5 = vld [vmem:[#allocation5 + $0x6a8] sm:$0xff] }
 0x2a4   : > { %12916 = vmatmul.mubr.msk.f32.vlgmr.msra.gmra.mxu1 %vm889_vm2, %v13914_v49  ;;  %3856 = vmatprep.subr.mxu1 %v3682_v6  ;;  %v5317_v6 = vld [vmem:[#allocation5 + $0x728] sm:$0xff] }
 0x2a5   : > { %4257 = vmatprep.subr.mxu0 %v4144_v7  ;;  %3857 = vmatpush1.msra.mxu1 %v3681_v8  ;;  %v4854_v7 = vld [vmem:[#allocation5 + $0x6a0] sm:$0xff] }
 0x2a6   : > { %4258 = vmatpush1.msra.mxu0 %v4143_v9  ;;  %4291 = vmatprep.mubr.f32.mxu0 %v13468_v0  ;;  %v5316_v8 = vld [vmem:[#allocation5 + $0x720] sm:$0xff]  ;;  %v4849_v9 = vld [vmem:[#allocation5 + $0x678] sm:$0xff] }
 0x2a7   : > { %3858 = vmatprep.subr.mxu1 %v3676_v10  ;;  %12923 = vmatmul.mubr.msk.f32.vlgmr.msra.gmra.mxu0 %vm889_vm2, %v13938_v11  ;;  %v13996_v10 = vrot.slane %v13963_v38, 3 }
 0x2a8   : > { %4419 = vmatprep.subr.mxu0 %v4383_v12  ;;  %3859 = vmatpush1.msra.mxu1 %v3675_v13  ;;  %v4848_v12 = vld [vmem:[#allocation5 + $0x670] sm:$0xff] }
 0x2a9   : > { %3892 = vmatprep.mubr.f32.mxu1 %v13468_v0  ;;  %4420 = vmatpush1.msra.mxu0 %v4382_v14  ;;  %v5326_v13 = vld [vmem:[#allocation5 + $0x770] sm:$0xff]  ;;  %v5088_v14 = vld [vmem:[#allocation5 + $0x6f8] sm:$0xff] }
 0x2aa   : > { %12918 = vmatmul.mubr.msk.f32.vlgmr.msra.gmra.mxu1 %vm889_vm2, %v13914_v49  ;;  %4020 = vmatprep.subr.mxu1 %v3915_v15  ;;  %v4857_v49 = vld [vmem:[#allocation5 + $0x6b8] sm:$0xff]  ;;  %v5321_v15 = vld [vmem:[#allocation5 + $0x748] sm:$0xff] }
 0x2ab   : > { %4421 = vmatprep.subr.mxu0 %v4377_v16  ;;  %4021 = vmatpush1.msra.mxu1 %v3914_v17  ;;  %v5087_v16 = vld [vmem:[#allocation5 + $0x6f0] sm:$0xff]  ;;  %v5320_v17 = vld [vmem:[#allocation5 + $0x740] sm:$0xff] }
 0x2ac   : > { %4422 = vmatpush1.msra.mxu0 %v4376_v18  ;;  %4455 = vmatprep.mubr.f32.mxu0 %v13468_v0  ;;  %v5082_v18 = vld [vmem:[#allocation5 + $0x6c8] sm:$0xff] }
 0x2ad   : > { %4022 = vmatprep.subr.mxu1 %v3909_v19  ;;  %12925 = vmatmul.mubr.msk.f32.vlgmr.msra.gmra.mxu0 %vm889_vm2, %v13947_v20  ;;  %v5560_v19 = vld [vmem:[#allocation5 + $0x7c8] sm:$0xff] }
 0x2ae   : > { %4561 = vmatprep.subr.mxu0 %v4387_v21  ;;  %4023 = vmatpush1.msra.mxu1 %v3908_v22  ;;  %v5559_v21 = vld [vmem:[#allocation5 + $0x7c0] sm:$0xff]  ;;  %v5092_v22 = vld [vmem:[#allocation5 + $0x718] sm:$0xff] }
 0x2af   : > { %4056 = vmatprep.mubr.f32.mxu1 %v13468_v0  ;;  %4562 = vmatpush1.msra.mxu0 %v4386_v23  ;;  %v5554_v23 = vld [vmem:[#allocation5 + $0x798] sm:$0xff] }
 0x2b0   : > { %12920 = vmatmul.mubr.msk.f32.vlgmr.msra.gmra.mxu1 %vm889_vm2, %v13923_v57  ;;  %4184 = vmatprep.subr.mxu1 %v4148_v24  ;;  %v4611_v57 = vld [vmem:[#allocation5 + $0x600] sm:$0xff]  ;;  %v5091_v24 = vld [vmem:[#allocation5 + $0x710] sm:$0xff] }
 0x2b1   : > { %4563 = vmatprep.subr.mxu0 %v4381_v25  ;;  %4185 = vmatpush1.msra.mxu1 %v4147_v26  ;;  %v5553_v25 = vld [vmem:[#allocation5 + $0x790] sm:$0xff]  ;;  %v5086_v26 = vld [vmem:[#allocation5 + $0x6e8] sm:$0xff] }
 0x2b2   : > { %4564 = vmatpush1.msra.mxu0 %v4380_v27  ;;  %4597 = vmatprep.mubr.f32.mxu0 %v13468_v0  ;;  %v14011_v27 = vrot.slane %v13963_v38, 4 }
 0x2b3   : > { %4186 = vmatprep.subr.mxu1 %v4142_v28  ;;  %12927 = vmatmul.mubr.msk.f32.vlgmr.msra.gmra.mxu0 %vm889_vm2, %v13947_v20  ;;  %v5793_v28 = vld [vmem:[#allocation5 + $0x818] sm:$0xff] }
 0x2b4   : > { %4725 = vmatprep.subr.mxu0 %v4620_v30  ;;  %4187 = vmatpush1.msra.mxu1 %v4141_v31  ;;  %v5085_v30 = vld [vmem:[#allocation5 + $0x6e0] sm:$0xff]  ;;  %v5792_v31 = vld [vmem:[#allocation5 + $0x810] sm:$0xff] }
 0x2b5   : > { %4220 = vmatprep.mubr.f32.mxu1 %v13468_v0  ;;  %4726 = vmatpush1.msra.mxu0 %v4619_v33  ;;  %v5325_v33 = vld [vmem:[#allocation5 + $0x768] sm:$0xff] }
 0x2b6   : > { %12922 = vmatmul.mubr.msk.f32.vlgmr.msra.gmra.mxu1 %vm889_vm2, %v13938_v11  ;;  %4326 = vmatprep.subr.mxu1 %v4152_v34  ;;  %v5787_v34 = vld [vmem:[#allocation5 + $0x7e8] sm:$0xff] }
 0x2b7   : > { %4727 = vmatprep.subr.mxu0 %v4614_v35  ;;  %4327 = vmatpush1.msra.mxu1 %v4151_v36  ;;  %v5324_v35 = vld [vmem:[#allocation5 + $0x760] sm:$0xff] }
 0x2b8   : > { %4728 = vmatpush1.msra.mxu0 %v4613_v37  ;;  %4761 = vmatprep.mubr.f32.mxu0 %v13468_v0  ;;  %v5786_v36 = vld [vmem:[#allocation5 + $0x7e0] sm:$0xff]  ;;  %v5319_v37 = vld [vmem:[#allocation5 + $0x738] sm:$0xff] }
 0x2b9   : > { %4328 = vmatprep.subr.mxu1 %v4146_v39  ;;  %12929 = vmatmul.mubr.msk.f32.vlgmr.msra.gmra.mxu0 %vm889_vm2, %v13963_v38  ;;  %v14020_v39 = vrot.slane %v13963_v38, 5 }
 0x2ba   : > { %4889 = vmatprep.subr.mxu0 %v4853_v40  ;;  %4329 = vmatpush1.msra.mxu1 %v4145_v41  ;;  %v5797_v40 = vld [vmem:[#allocation5 + $0x838] sm:$0xff]  ;;  %v5318_v41 = vld [vmem:[#allocation5 + $0x730] sm:$0xff] }
 0x2bb   : > { %4362 = vmatprep.mubr.f32.mxu1 %v13468_v0  ;;  %4890 = vmatpush1.msra.mxu0 %v4852_v42  ;;  %v5796_v42 = vld [vmem:[#allocation5 + $0x830] sm:$0xff] }
 0x2bc   : > { %12924 = vmatmul.mubr.msk.f32.vlgmr.msra.gmra.mxu1 %vm889_vm2, %v13938_v11  ;;  %4490 = vmatprep.subr.mxu1 %v4385_v43  ;;  %v5327_v11 = vld [vmem:[#allocation5 + $0x778] sm:$0xff] }
 0x2bd   : > { %4891 = vmatprep.subr.mxu0 %v4847_v44  ;;  %4491 = vmatpush1.msra.mxu1 %v4384_v45  ;;  %v5558_v43 = vld [vmem:[#allocation5 + $0x7b8] sm:$0xff]  ;;  %v5791_v44 = vld [vmem:[#allocation5 + $0x808] sm:$0xff]  ;;  %v5557_v45 = vld [vmem:[#allocation5 + $0x7b0] sm:$0xff] }
 0x2be   : > { %4892 = vmatpush1.msra.mxu0 %v4846_v46  ;;  %4925 = vmatprep.mubr.f32.mxu0 %v13468_v0  ;;  %v5790_v46 = vld [vmem:[#allocation5 + $0x800] sm:$0xff] }
 0x2bf   : > { %4492 = vmatprep.subr.mxu1 %v4379_v48  ;;  %12931 = vmatmul.mubr.msk.f32.vlgmr.msra.gmra.mxu0 %vm889_vm2, %v13970_v47  ;;  %v6030_v48 = vld [vmem:[#allocation5 + $0x888] sm:$0xff] }
 0x2c0   : > { %5031 = vmatprep.subr.mxu0 %v4857_v49  ;;  %4493 = vmatpush1.msra.mxu1 %v4378_v29  ;;  %v5551_v49 = vld [vmem:[#allocation5 + $0x780] sm:$0xff] }
 0x2c1   : > { %4526 = vmatprep.mubr.f32.mxu1 %v13468_v0  ;;  %5032 = vmatpush1.msra.mxu0 %v4856_v50  ;;  %v6029_v29 = vld [vmem:[#allocation5 + $0x880] sm:$0xff]  ;;  %v5562_v50 = vld [vmem:[#allocation5 + $0x7d8] sm:$0xff] }
 0x2c2   : > { %12926 = vmatmul.mubr.msk.f32.vlgmr.msra.gmra.mxu1 %vm889_vm2, %v13947_v20  ;;  %4654 = vmatprep.subr.mxu1 %v4618_v51  ;;  %v5081_v20 = vld [vmem:[#allocation5 + $0x6c0] sm:$0xff]  ;;  %v6024_v51 = vld [vmem:[#allocation5 + $0x858] sm:$0xff] }
 0x2c3   : > { %5033 = vmatprep.subr.mxu0 %v4851_v52  ;;  %4655 = vmatpush1.msra.mxu1 %v4617_v53  ;;  %v5561_v52 = vld [vmem:[#allocation5 + $0x7d0] sm:$0xff] }
 0x2c4   : > { %5034 = vmatpush1.msra.mxu0 %v4850_v54  ;;  %5067 = vmatprep.mubr.f32.mxu0 %v13468_v0  ;;  %v6023_v53 = vld [vmem:[#allocation5 + $0x850] sm:$0xff]  ;;  %v14032_v54 = vpop.f32.mrf.mxu0 }
 0x2c5   : > { %4656 = vmatprep.subr.mxu1 %v4612_v55  ;;  %12933 = vmatmul.mubr.msk.f32.vlgmr.msra.gmra.mxu0 %vm889_vm2, %v13970_v47  ;;  %v5556_v55 = vld [vmem:[#allocation5 + $0x7a8] sm:$0xff] }
 0x2c6   : > { %5195 = vmatprep.subr.mxu0 %v5090_v56  ;;  %4657 = vmatpush1.msra.mxu1 %v4611_v57  ;;  %v14037_v56 = vrot.slane %v13963_v38, 6  ;;  %v6263_v57 = vld [vmem:[#allocation5 + $0x8d8] sm:$0xff] }
 0x2c7   : > { %4690 = vmatprep.mubr.f32.mxu1 %v13468_v0  ;;  %5196 = vmatpush1.msra.mxu0 %v5089_v58  ;;  %v5555_v58 = vld [vmem:[#allocation5 + $0x7a0] sm:$0xff] }
 0x2c8   : > { %12928 = vmatmul.mubr.msk.f32.vlgmr.msra.gmra.mxu1 %vm889_vm2, %v13963_v38  ;;  %4796 = vmatprep.subr.mxu1 %v4622_v59  ;;  %v6262_v59 = vld [vmem:[#allocation5 + $0x8d0] sm:$0xff] }
 0x2c9   : > { %5197 = vmatprep.subr.mxu0 %v5084_v60  ;;  %4797 = vmatpush1.msra.mxu1 %v4621_v61  ;;  %v5795_v60 = vld [vmem:[#allocation5 + $0x828] sm:$0xff]  ;;  %v14042_v61 = vpop.f32.mrf.mxu0 }
 0x2ca   : > { %5198 = vmatpush1.msra.mxu0 %v5083_v62  ;;  %5231 = vmatprep.mubr.f32.mxu0 %v13468_v0  ;;  %v6257_v62 = vld [vmem:[#allocation5 + $0x8a8] sm:$0xff] }
 0x2cb   : > { %4798 = vmatprep.subr.mxu1 %v4616_v63  ;;  %12935 = vmatmul.mubr.msk.f32.vlgmr.msra.gmra.mxu0 %vm889_vm2, %v13987_v1  ;;  %v5794_v63 = vld [vmem:[#allocation5 + $0x820] sm:$0xff] }
 0x2cc   : > { %5359 = vmatprep.subr.mxu0 %v5323_v2  ;;  %4799 = vmatpush1.msra.mxu1 %v4615_v3  ;;  %v5789_v3 = vld [vmem:[#allocation5 + $0x7f8] sm:$0xff] }
 0x2cd   : > { %4832 = vmatprep.mubr.f32.mxu1 %v13468_v0  ;;  %5360 = vmatpush1.msra.mxu0 %v5322_v4  ;;  %v14048_v4 = vrot.slane %v13963_v38, 7 }
 0x2ce   : > { %12930 = vmatmul.mubr.msk.f32.vlgmr.msra.gmra.mxu1 %vm889_vm2, %v13963_v38  ;;  %4960 = vmatprep.subr.mxu1 %v4855_v5  ;;  %v6267_v5 = vld [vmem:[#allocation5 + $0x8f8] sm:$0xff] }
 0x2cf   : > { %5361 = vmatprep.subr.mxu0 %v5317_v6  ;;  %4961 = vmatpush1.msra.mxu1 %v4854_v7  ;;  %v5788_v6 = vld [vmem:[#allocation5 + $0x7f0] sm:$0xff] }
 0x2d0   : > { %5362 = vmatpush1.msra.mxu0 %v5316_v8  ;;  %5395 = vmatprep.mubr.f32.mxu0 %v13468_v0 }
 0x2d1   : > { %4962 = vmatprep.subr.mxu1 %v4849_v9  ;;  %12937 = vmatmul.mubr.msk.f32.vlgmr.msra.gmra.mxu0 %vm889_vm2, %v13996_v10  ;;  %v6266_v9 = vld [vmem:[#allocation5 + $0x8f0] sm:$0xff] }
 0x2d2   : > { %5501 = vmatprep.subr.mxu0 %v5327_v11  ;;  %4963 = vmatpush1.msra.mxu1 %v4848_v12  ;;  %v6028_v11 = vld [vmem:[#allocation5 + $0x878] sm:$0xff] }
 0x2d3   : > { %4996 = vmatprep.mubr.f32.mxu1 %v13468_v0  ;;  %5502 = vmatpush1.msra.mxu0 %v5326_v13  ;;  %v6261_v13 = vld [vmem:[#allocation5 + $0x8c8] sm:$0xff] }
 0x2d4   : > { %12932 = vmatmul.mubr.msk.f32.vlgmr.msra.gmra.mxu1 %vm889_vm2, %v13970_v47  ;;  %5124 = vmatprep.subr.mxu1 %v5088_v14  ;;  %v5552_v47 = vld [vmem:[#allocation5 + $0x788] sm:$0xff]  ;;  %v6027_v14 = vld [vmem:[#allocation5 + $0x870] sm:$0xff] }
 0x2d5   : > { %5503 = vmatprep.subr.mxu0 %v5321_v15  ;;  %5125 = vmatpush1.msra.mxu1 %v5087_v16  ;;  %v6260_v15 = vld [vmem:[#allocation5 + $0x8c0] sm:$0xff] }
 0x2d6   : > { %5504 = vmatpush1.msra.mxu0 %v5320_v17  ;;  %5537 = vmatprep.mubr.f32.mxu0 %v13468_v0  ;;  %v6022_v17 = vld [vmem:[#allocation5 + $0x848] sm:$0xff] }
 0x2d7   : > { %5126 = vmatprep.subr.mxu1 %v5082_v18  ;;  %12939 = vmatmul.mubr.msk.f32.vlgmr.msra.gmra.mxu0 %vm889_vm2, %v13996_v10 }
 0x2d8   : > { %5665 = vmatprep.subr.mxu0 %v5560_v19  ;;  %5127 = vmatpush1.msra.mxu1 %v5081_v20  ;;  %v6500_v19 = vld [vmem:[#allocation5 + $0x948] sm:$0xff]  ;;  %v6021_v20 = vld [vmem:[#allocation5 + $0x840] sm:$0xff] }
 0x2d9   : > { %5160 = vmatprep.mubr.f32.mxu1 %v13468_v0  ;;  %5666 = vmatpush1.msra.mxu0 %v5559_v21  ;;  %v6499_v21 = vld [vmem:[#allocation5 + $0x940] sm:$0xff] }
 0x2da   : > { %12934 = vmatmul.mubr.msk.f32.vlgmr.msra.gmra.mxu1 %vm889_vm2, %v13987_v1  ;;  %5266 = vmatprep.subr.mxu1 %v5092_v22 }
 0x2db   : > { %5667 = vmatprep.subr.mxu0 %v5554_v23  ;;  %5267 = vmatpush1.msra.mxu1 %v5091_v24  ;;  %v6032_v23 = vld [vmem:[#allocation5 + $0x898] sm:$0xff] }
 0x2dc   : > { %5668 = vmatpush1.msra.mxu0 %v5553_v25  ;;  %5701 = vmatprep.mubr.f32.mxu0 %v13468_v0  ;;  %v6494_v25 = vld [vmem:[#allocation5 + $0x918] sm:$0xff] }
 0x2dd   : > { %5268 = vmatprep.subr.mxu1 %v5086_v26  ;;  %12941 = vmatmul.mubr.msk.f32.vlgmr.msra.gmra.mxu0 %vm889_vm2, %v14011_v27  ;;  %v6031_v26 = vld [vmem:[#allocation5 + $0x890] sm:$0xff] }
 0x2de   : > { %5829 = vmatprep.subr.mxu0 %v5793_v28  ;;  %5269 = vmatpush1.msra.mxu1 %v5085_v30  ;;  %v6026_v30 = vld [vmem:[#allocation5 + $0x868] sm:$0xff] }
 0x2df   : > { %5302 = vmatprep.mubr.f32.mxu1 %v13468_v0  ;;  %5830 = vmatpush1.msra.mxu0 %v5792_v31 }
 0x2e0   : > { %12936 = vmatmul.mubr.msk.f32.vlgmr.msra.gmra.mxu1 %vm889_vm2, %v13987_v1  ;;  %5430 = vmatprep.subr.mxu1 %v5325_v33  ;;  %v6256_v1 = vld [vmem:[#allocation5 + $0x8a0] sm:$0xff]  ;;  %v6733_v33 = vld [vmem:[#allocation5 + $0x998] sm:$0xff] }
 0x2e1   : > { %5831 = vmatprep.subr.mxu0 %v5787_v34  ;;  %5431 = vmatpush1.msra.mxu1 %v5324_v35  ;;  %v6025_v34 = vld [vmem:[#allocation5 + $0x860] sm:$0xff] }
 0x2e2   : > { %5832 = vmatpush1.msra.mxu0 %v5786_v36  ;;  %5865 = vmatprep.mubr.f32.mxu0 %v13468_v0  ;;  %v6732_v36 = vld [vmem:[#allocation5 + $0x990] sm:$0xff] }
 0x2e3   : > { %5432 = vmatprep.subr.mxu1 %v5319_v37  ;;  %12943 = vmatmul.mubr.msk.f32.vlgmr.msra.gmra.mxu0 %vm889_vm2, %v14020_v39 }
 0x2e4   : > { %5971 = vmatprep.subr.mxu0 %v5797_v40  ;;  %5433 = vmatpush1.msra.mxu1 %v5318_v41  ;;  %v6727_v41 = vld [vmem:[#allocation5 + $0x968] sm:$0xff] }
 0x2e5   : > { %5466 = vmatprep.mubr.f32.mxu1 %v13468_v0  ;;  %5972 = vmatpush1.msra.mxu0 %v5796_v42  ;;  %v6264_v42 = vld [vmem:[#allocation5 + $0x8e0] sm:$0xff] }
 0x2e6   : > { %12938 = vmatmul.mubr.msk.f32.vlgmr.msra.gmra.mxu1 %vm889_vm2, %v13996_v10  ;;  %5594 = vmatprep.subr.mxu1 %v5558_v43  ;;  %v6726_v43 = vld [vmem:[#allocation5 + $0x960] sm:$0xff] }
 0x2e7   : > { %5973 = vmatprep.subr.mxu0 %v5791_v44  ;;  %5595 = vmatpush1.msra.mxu1 %v5557_v45  ;;  %v6259_v45 = vld [vmem:[#allocation5 + $0x8b8] sm:$0xff] }
 0x2e8   : > { %5974 = vmatpush1.msra.mxu0 %v5790_v46  ;;  %6007 = vmatprep.mubr.f32.mxu0 %v13468_v0 }
 0x2e9   : > { %5596 = vmatprep.subr.mxu1 %v5552_v47  ;;  %12945 = vmatmul.mubr.msk.f32.vlgmr.msra.gmra.mxu0 %vm889_vm2, %v14020_v39  ;;  %v14087_v47 = vrot.slane %v13956_v32, 1 }
 0x2ea   : > { %6135 = vmatprep.subr.mxu0 %v6030_v48  ;;  %5597 = vmatpush1.msra.mxu1 %v5551_v49  ;;  %v6737_v48 = vld [vmem:[#allocation5 + $0x9b8] sm:$0xff]  ;;  %v6258_v49 = vld [vmem:[#allocation5 + $0x8b0] sm:$0xff] }
 0x2eb   : > { %5630 = vmatprep.mubr.f32.mxu1 %v13468_v0  ;;  %6136 = vmatpush1.msra.mxu0 %v6029_v29 }
 0x2ec   : > { %12940 = vmatmul.mubr.msk.f32.vlgmr.msra.gmra.mxu1 %vm889_vm2, %v14011_v27  ;;  %5736 = vmatprep.subr.mxu1 %v5562_v50  ;;  %v6736_v50 = vld [vmem:[#allocation5 + $0x9b0] sm:$0xff] }
 0x2ed   : > { %6137 = vmatprep.subr.mxu0 %v6024_v51  ;;  %5737 = vmatpush1.msra.mxu1 %v5561_v52  ;;  %v6498_v52 = vld [vmem:[#allocation5 + $0x938] sm:$0xff] }
 0x2ee   : > { %6138 = vmatpush1.msra.mxu0 %v6023_v53  ;;  %6171 = vmatprep.mubr.f32.mxu0 %v13468_v0 }
 0x2ef   : > { %5738 = vmatprep.subr.mxu1 %v5556_v55  ;;  %12947 = vmatmul.mubr.msk.f32.vlgmr.msra.gmra.mxu0 %vm889_vm2, %v14037_v56 }
 0x2f0   : > { %6299 = vmatprep.subr.mxu0 %v6263_v57  ;;  %5739 = vmatpush1.msra.mxu1 %v5555_v58  ;;  %v6497_v57 = vld [vmem:[#allocation5 + $0x930] sm:$0xff]  ;;  %v6730_v58 = vld [vmem:[#allocation5 + $0x980] sm:$0xff] }
 0x2f1   : > { %5772 = vmatprep.mubr.f32.mxu1 %v13468_v0  ;;  %6300 = vmatpush1.msra.mxu0 %v6262_v59  ;;  %v1173_v2 = vpop.f32.mrf.mxu0 }
 0x2f2   : > { %12942 = vmatmul.mubr.msk.f32.vlgmr.msra.gmra.mxu1 %vm889_vm2, %v14011_v27  ;;  %5900 = vmatprep.subr.mxu1 %v5795_v60  ;;  %v6493_v27 = vld [vmem:[#allocation5 + $0x910] sm:$0xff]  ;;  %v6492_v60 = vld [vmem:[#allocation5 + $0x908] sm:$0xff] }
 0x2f3   : > { %6301 = vmatprep.subr.mxu0 %v6257_v62  ;;  %5901 = vmatpush1.msra.mxu1 %v5794_v63  ;;  %v958_v7 = vpop.f32.mrf.mxu1  ;;  %v14050_v8 = vpop.f32.mrf.mxu0  ;;  %v6970_v63 = vld [vmem:[#allocation5 + $0xa08] sm:$0xff] }
 0x2f4   : > { %6302 = vmatpush1.msra.mxu0 %v6256_v1  ;;  %6335 = vmatprep.mubr.f32.mxu0 %v13468_v0  ;;  %v14053_v10 = vadd.f32 %v1173_v2, %v958_v7  ;;  %v6491_v1 = vld [vmem:[#allocation5 + $0x900] sm:$0xff] }
 0x2f5   : > { %5902 = vmatprep.subr.mxu1 %v5789_v3  ;;  %12949 = vmatmul.mubr.msk.f32.vlgmr.msra.gmra.mxu0 %vm889_vm2, %v14048_v4  ;;  %v14057_v12 = vpop.f32.mrf.mxu1  ;;  %v1315_v38 = vpop.f32.mrf.mxu0  ;;  %v6969_v3 = vld [vmem:[#allocation5 + $0xa00] sm:$0xff] }
 0x2f6   : > { %6441 = vmatprep.subr.mxu0 %v6267_v5  ;;  %5903 = vmatpush1.msra.mxu1 %v5788_v6 }
 0x2f7   : > { %5936 = vmatprep.mubr.f32.mxu1 %v13468_v0  ;;  %6442 = vmatpush1.msra.mxu0 %v6266_v9  ;;  %v14060_v16 = vpop.f32.mrf.mxu0  ;;  %v6964_v9 = vld [vmem:[#allocation5 + $0x9d8] sm:$0xff] }
 0x2f8   : > { %12944 = vmatmul.mubr.msk.f32.vlgmr.msra.gmra.mxu1 %vm889_vm2, %v14020_v39  ;;  %6064 = vmatprep.subr.mxu1 %v6028_v11  ;;  %v1029_v18 = vpop.f32.mrf.mxu1  ;;  %v6265_v39 = vld [vmem:[#allocation5 + $0x8e8] sm:$0xff]  ;;  %v6501_v11 = vld [vmem:[#allocation5 + $0x950] sm:$0xff] }
 0x2f9   : > { %6443 = vmatprep.subr.mxu0 %v6261_v13  ;;  %6065 = vmatpush1.msra.mxu1 %v6027_v14  ;;  %v6496_v13 = vld [vmem:[#allocation5 + $0x928] sm:$0xff] }
 0x2fa   : > { %6444 = vmatpush1.msra.mxu0 %v6260_v15  ;;  %6477 = vmatprep.mubr.f32.mxu0 %v13468_v0  ;;  %v14065_v22 = vpop.f32.mrf.mxu1  ;;  %v14115_v15 = vrot.slane %v13956_v32, 2 }
 0x2fb   : > { %6066 = vmatprep.subr.mxu1 %v6022_v17  ;;  %12951 = vmatmul.mubr.msk.f32.vlgmr.msra.gmra.mxu0 %vm889_vm2, %v14048_v4  ;;  %v1473_v24 = vpop.f32.mrf.mxu0  ;;  %v7203_v17 = vld [vmem:[#allocation5 + $0xa58] sm:$0xff] }
 0x2fc   : > { %6605 = vmatprep.subr.mxu0 %v6500_v19  ;;  %6067 = vmatpush1.msra.mxu1 %v6021_v20  ;;  %v7202_v20 = vld [vmem:[#allocation5 + $0xa50] sm:$0xff] }
 0x2fd   : > { %6100 = vmatprep.mubr.f32.mxu1 %v13468_v0  ;;  %6606 = vmatpush1.msra.mxu0 %v6499_v21  ;;  %v14070_v28 = vpop.f32.mrf.mxu0 }
 0x2fe   : > { %12946 = vmatmul.mubr.msk.f32.vlgmr.msra.gmra.mxu1 %vm889_vm2, %v14037_v56  ;;  %6206 = vmatprep.subr.mxu1 %v6032_v23  ;;  %v1100_v31 = vpop.f32.mrf.mxu1  ;;  %v6735_v23 = vld [vmem:[#allocation5 + $0x9a8] sm:$0xff] }
 0x2ff   : > { %6607 = vmatprep.subr.mxu0 %v6494_v25  ;;  %6207 = vmatpush1.msra.mxu1 %v6031_v26  ;;  %v14074_v35 = vadd.f32 %v1315_v38, %v1100_v31  ;;  %v7197_v26 = vld [vmem:[#allocation5 + $0xa28] sm:$0xff] }
 0x300   : > { %6608 = vmatpush1.msra.mxu0 %v6493_v27  ;;  %6641 = vmatprep.mubr.f32.mxu0 %v13468_v0  ;;  %v14077_v37 = vpop.f32.mrf.mxu1  ;;  %v6734_v27 = vld [vmem:[#allocation5 + $0x9a0] sm:$0xff] }
 0x301   : > { %6208 = vmatprep.subr.mxu1 %v6026_v30  ;;  %12953 = vmatmul.mubr.msk.f32.vlgmr.msra.gmra.mxu0 %vm889_vm2, %v13956_v32  ;;  %v1637_v40 = vpop.f32.mrf.mxu0  ;;  %v7196_v30 = vld [vmem:[#allocation5 + $0xa20] sm:$0xff] }
 0x302   : > { %6769 = vmatprep.subr.mxu0 %v6733_v33  ;;  %6209 = vmatpush1.msra.mxu1 %v6025_v34  ;;  %v6729_v33 = vld [vmem:[#allocation5 + $0x978] sm:$0xff] }
 0x303   : > { %6242 = vmatprep.mubr.f32.mxu1 %v13468_v0  ;;  %6770 = vmatpush1.msra.mxu0 %v6732_v36  ;;  %v14082_v44 = vpop.f32.mrf.mxu0  ;;  %v7207_v36 = vld [vmem:[#allocation5 + $0xa78] sm:$0xff] }
 0x304   : > { %12948 = vmatmul.mubr.msk.f32.vlgmr.msra.gmra.mxu1 %vm889_vm2, %v14037_v56  ;;  %6370 = vmatprep.subr.mxu1 %v6265_v39  ;;  %v1244_v46 = vpop.f32.mrf.mxu1  ;;  %v6731_v56 = vld [vmem:[#allocation5 + $0x988] sm:$0xff]  ;;  %v6728_v39 = vld [vmem:[#allocation5 + $0x970] sm:$0xff] }
 0x305   : > { %6771 = vmatprep.subr.mxu0 %v6727_v41  ;;  %6371 = vmatpush1.msra.mxu1 %v6264_v42  ;;  %v1245_v29 = vadd.f32 %v1244_v46, %v1029_v18  ;;  %v6495_v18 = vld [vmem:[#allocation5 + $0x920] sm:$0xff]  ;;  %v7206_v41 = vld [vmem:[#allocation5 + $0xa70] sm:$0xff] }
 0x306   : > { %6772 = vmatpush1.msra.mxu0 %v6726_v43  ;;  %6805 = vmatprep.mubr.f32.mxu0 %v13468_v0  ;;  %v14090_v51 = vpop.f32.mrf.mxu1  ;;  %v6968_v43 = vld [vmem:[#allocation5 + $0x9f8] sm:$0xff] }
 0x307   : > { %6372 = vmatprep.subr.mxu1 %v6259_v45  ;;  %12955 = vmatmul.mubr.msk.f32.vlgmr.msra.gmra.mxu0 %vm889_vm2, %v14087_v47  ;;  %v1779_v53 = vpop.f32.mrf.mxu0  ;;  %v14094_v55 = vadd.f32 %v1473_v24, %v1245_v29  ;;  %v7200_v29 = vld [vmem:[#allocation5 + $0xa40] sm:$0xff] }
 0x308   : > { %6911 = vmatprep.subr.mxu0 %v6737_v48  ;;  %6373 = vmatpush1.msra.mxu1 %v6258_v49  ;;  %v7201_v48 = vld [vmem:[#allocation5 + $0xa48] sm:$0xff]  ;;  %v6967_v49 = vld [vmem:[#allocation5 + $0x9f0] sm:$0xff] }
 0x309   : > { %6406 = vmatprep.mubr.f32.mxu1 %v13468_v0  ;;  %6912 = vmatpush1.msra.mxu0 %v6736_v50  ;;  %v14097_v59 = vpop.f32.mrf.mxu0 }
 0x30a   : > { %12950 = vmatmul.mubr.msk.f32.vlgmr.msra.gmra.mxu1 %vm889_vm2, %v14048_v4  ;;  %6534 = vmatprep.subr.mxu1 %v6498_v52  ;;  %v1402_v62 = vpop.f32.mrf.mxu1  ;;  %v6502_v4 = vld [vmem:[#allocation5 + $0x958] sm:$0xff]  ;;  %v6962_v52 = vld [vmem:[#allocation5 + $0x9c8] sm:$0xff] }
 0x30b   : > { %6913 = vmatprep.subr.mxu0 %v6731_v56  ;;  %6535 = vmatpush1.msra.mxu1 %v6497_v57  ;;  %v1549_v2 = vadd.f32 %v1402_v62, %v14053_v10  ;;  %v6963_v10 = vld [vmem:[#allocation5 + $0x9d0] sm:$0xff]  ;;  %v6961_v56 = vld [vmem:[#allocation5 + $0x9c0] sm:$0xff] }
 0x30c   : > { %6914 = vmatpush1.msra.mxu0 %v6730_v58  ;;  %6947 = vmatprep.mubr.f32.mxu0 %v13468_v0  ;;  %v14103_v5 = vpop.f32.mrf.mxu1  ;;  %v7439_v58 = vld [vmem:[#allocation5 + $0xac0] sm:$0xff] }
 0x30d   : > { %6536 = vmatprep.subr.mxu1 %v6492_v60  ;;  %12957 = vmatmul.mubr.msk.f32.vlgmr.msra.gmra.mxu0 %vm889_vm2, %v14087_v47  ;;  %v1943_v6 = vpop.f32.mrf.mxu0  ;;  %v14107_v7 = vadd.f32 %v1637_v40, %v1549_v2  ;;  %v6971_v2 = vld [vmem:[#allocation5 + $0xa10] sm:$0xff] }
 0x30e   : > { %7075 = vmatprep.subr.mxu0 %v6970_v63  ;;  %6537 = vmatpush1.msra.mxu1 %v6491_v1  ;;  %v7434_v1 = vld [vmem:[#allocation5 + $0xa98] sm:$0xff] }
 0x30f   : > { %6570 = vmatprep.mubr.f32.mxu1 %v13468_v0  ;;  %7076 = vmatpush1.msra.mxu0 %v6969_v3  ;;  %v14110_v38 = vpop.f32.mrf.mxu0  ;;  %v7433_v3 = vld [vmem:[#allocation5 + $0xa90] sm:$0xff] }
 0x310   : > { %12952 = vmatmul.mubr.msk.f32.vlgmr.msra.gmra.mxu1 %vm889_vm2, %v13956_v32  ;;  %6676 = vmatprep.subr.mxu1 %v6502_v4  ;;  %v1544_v14 = vpop.f32.mrf.mxu1 }
 0x311   : > { %7077 = vmatprep.subr.mxu0 %v6964_v9  ;;  %6677 = vmatpush1.msra.mxu1 %v6501_v11  ;;  %v1553_v19 = vadd.f32 %v1544_v14, %v14074_v35  ;;  %v14131_v35 = vrot.slane %v13956_v32, 3  ;;  %v14160_v9 = vrot.slane %v13956_v32, 4  ;;  %v7673_v11 = vld [vmem:[#allocation5 + $0xb18] sm:$0xff]  ;;  %v7672_v14 = vld [vmem:[#allocation5 + $0xb10] sm:$0xff] }
 0x312   : > { %7078 = vmatpush1.msra.mxu0 %v6963_v10  ;;  %7111 = vmatprep.mubr.f32.mxu0 %v13468_v0  ;;  %v14119_v21 = vpop.f32.mrf.mxu1  ;;  %v6965_v10 = vld [vmem:[#allocation5 + $0x9e0] sm:$0xff] }
 0x313   : > { %6678 = vmatprep.subr.mxu1 %v6496_v13  ;;  %12959 = vmatmul.mubr.msk.f32.vlgmr.msra.gmra.mxu0 %vm889_vm2, %v14115_v15  ;;  %v2107_v24 = vpop.f32.mrf.mxu0  ;;  %v14123_v25 = vadd.f32 %v1779_v53, %v1553_v19 }
 0x314   : > { %7239 = vmatprep.subr.mxu0 %v7203_v17  ;;  %6679 = vmatpush1.msra.mxu1 %v6495_v18  ;;  %v7205_v18 = vld [vmem:[#allocation5 + $0xa68] sm:$0xff] }
 0x315   : > { %6712 = vmatprep.mubr.f32.mxu1 %v13468_v0  ;;  %7240 = vmatpush1.msra.mxu0 %v7202_v20  ;;  %v14126_v31 = vpop.f32.mrf.mxu0 }
 0x316   : > { %12954 = vmatmul.mubr.msk.f32.vlgmr.msra.gmra.mxu1 %vm889_vm2, %v13956_v32  ;;  %6840 = vmatprep.subr.mxu1 %v6735_v23  ;;  %v1708_v34 = vpop.f32.mrf.mxu1  ;;  %v7667_v23 = vld [vmem:[#allocation5 + $0xae8] sm:$0xff] }
 0x317   : > { %7241 = vmatprep.subr.mxu0 %v7197_v26  ;;  %6841 = vmatpush1.msra.mxu1 %v6734_v27  ;;  %v1786_v40 = vadd.f32 %v1708_v34, %v14094_v55  ;;  %v7440_v55 = vld [vmem:[#allocation5 + $0xac8] sm:$0xff]  ;;  %v7199_v27 = vld [vmem:[#allocation5 + $0xa38] sm:$0xff] }
 0x318   : > { %7242 = vmatpush1.msra.mxu0 %v7196_v30  ;;  %7275 = vmatprep.mubr.f32.mxu0 %v13468_v0  ;;  %v14135_v42 = vpop.f32.mrf.mxu1  ;;  %v7677_v34 = vld [vmem:[#allocation5 + $0xb38] sm:$0xff] }
 0x319   : > { %6842 = vmatprep.subr.mxu1 %v6729_v33  ;;  %12961 = vmatmul.mubr.msk.f32.vlgmr.msra.gmra.mxu0 %vm889_vm2, %v14131_v35  ;;  %v2249_v45 = vpop.f32.mrf.mxu0  ;;  %v14139_v46 = vadd.f32 %v1943_v6, %v1786_v40  ;;  %v6966_v6 = vld [vmem:[#allocation5 + $0x9e8] sm:$0xff]  ;;  %v14176_v33 = vrot.slane %v13956_v32, 5  ;;  %v7676_v40 = vld [vmem:[#allocation5 + $0xb30] sm:$0xff] }
 0x31a   : > { %7381 = vmatprep.subr.mxu0 %v7207_v36  ;;  %6843 = vmatpush1.msra.mxu1 %v6728_v39  ;;  %v7198_v36 = vld [vmem:[#allocation5 + $0xa30] sm:$0xff] }
 0x31b   : > { %6876 = vmatprep.mubr.f32.mxu1 %v13468_v0  ;;  %7382 = vmatpush1.msra.mxu0 %v7206_v41  ;;  %v14142_v50 = vpop.f32.mrf.mxu0 }
 0x31c   : > { %12956 = vmatmul.mubr.msk.f32.vlgmr.msra.gmra.mxu1 %vm889_vm2, %v14087_v47  ;;  %7004 = vmatprep.subr.mxu1 %v6968_v43  ;;  %v1872_v53 = vpop.f32.mrf.mxu1  ;;  %v6972_v47 = vld [vmem:[#allocation5 + $0xa18] sm:$0xff] }
 0x31d   : > { %7383 = vmatprep.subr.mxu0 %v7201_v48  ;;  %7005 = vmatpush1.msra.mxu1 %v6967_v49  ;;  %v2019_v57 = vadd.f32 %v1872_v53, %v14107_v7  ;;  %v7671_v48 = vld [vmem:[#allocation5 + $0xb08] sm:$0xff]  ;;  %v7437_v49 = vld [vmem:[#allocation5 + $0xab0] sm:$0xff] }
 0x31e   : > { %7384 = vmatpush1.msra.mxu0 %v7200_v29  ;;  %7417 = vmatprep.mubr.f32.mxu0 %v13468_v0  ;;  %v14148_v60 = vpop.f32.mrf.mxu1 }
 0x31f   : > { %7006 = vmatprep.subr.mxu1 %v6962_v52  ;;  %12963 = vmatmul.mubr.msk.f32.vlgmr.msra.gmra.mxu0 %vm889_vm2, %v14131_v35  ;;  %v2413_v62 = vpop.f32.mrf.mxu0  ;;  %v14152_v63 = vadd.f32 %v2107_v24, %v2019_v57  ;;  %v7204_v24 = vld [vmem:[#allocation5 + $0xa60] sm:$0xff]  ;;  %v7432_v52 = vld [vmem:[#allocation5 + $0xa88] sm:$0xff] }
 0x320   : > { %7545 = vmatprep.subr.mxu0 %v7440_v55  ;;  %7007 = vmatpush1.msra.mxu1 %v6961_v56  ;;  %v7910_v55 = vld [vmem:[#allocation5 + $0xb88] sm:$0xff]  ;;  %v7431_v56 = vld [vmem:[#allocation5 + $0xa80] sm:$0xff] }
 0x321   : > { %7040 = vmatprep.mubr.f32.mxu1 %v13468_v0  ;;  %7546 = vmatpush1.msra.mxu0 %v7439_v58  ;;  %v14155_v4 = vpop.f32.mrf.mxu0  ;;  %v7909_v58 = vld [vmem:[#allocation5 + $0xb80] sm:$0xff] }
 0x322   : > { %12958 = vmatmul.mubr.msk.f32.vlgmr.msra.gmra.mxu1 %vm889_vm2, %v14115_v15  ;;  %7146 = vmatprep.subr.mxu1 %v6972_v47  ;;  %v2014_v7 = vpop.f32.mrf.mxu1 }
 0x323   : > { %7547 = vmatprep.subr.mxu0 %v7434_v1  ;;  %7147 = vmatpush1.msra.mxu1 %v6971_v2  ;;  %v2023_v13 = vadd.f32 %v2014_v7, %v14123_v25  ;;  %v7666_v25 = vld [vmem:[#allocation5 + $0xae0] sm:$0xff]  ;;  %v7904_v2 = vld [vmem:[#allocation5 + $0xb58] sm:$0xff]  ;;  %v7436_v7 = vld [vmem:[#allocation5 + $0xaa8] sm:$0xff] }
 0x324   : > { %7548 = vmatpush1.msra.mxu0 %v7433_v3  ;;  %7581 = vmatprep.mubr.f32.mxu0 %v13468_v0  ;;  %v14164_v17 = vpop.f32.mrf.mxu1  ;;  %v7441_v3 = vld [vmem:[#allocation5 + $0xad0] sm:$0xff] }
 0x325   : > { %7148 = vmatprep.subr.mxu1 %v6966_v6  ;;  %12965 = vmatmul.mubr.msk.f32.vlgmr.msra.gmra.mxu0 %vm889_vm2, %v14160_v9  ;;  %v2577_v19 = vpop.f32.mrf.mxu0  ;;  %v14168_v20 = vadd.f32 %v2249_v45, %v2023_v13  ;;  %v8143_v13 = vld [vmem:[#allocation5 + $0xbd8] sm:$0xff] }
 0x326   : > { %7709 = vmatprep.subr.mxu0 %v7673_v11  ;;  %7149 = vmatpush1.msra.mxu1 %v6965_v10  ;;  %v14205_v10 = vrot.slane %v13956_v32, 6 }
 0x327   : > { %7182 = vmatprep.mubr.f32.mxu1 %v13468_v0  ;;  %7710 = vmatpush1.msra.mxu0 %v7672_v14  ;;  %v14171_v26 = vpop.f32.mrf.mxu0  ;;  %v7435_v14 = vld [vmem:[#allocation5 + $0xaa0] sm:$0xff] }
 0x328   : > { %12960 = vmatmul.mubr.msk.f32.vlgmr.msra.gmra.mxu1 %vm889_vm2, %v14115_v15  ;;  %7310 = vmatprep.subr.mxu1 %v7205_v18  ;;  %v2178_v30 = vpop.f32.mrf.mxu1  ;;  %v7438_v15 = vld [vmem:[#allocation5 + $0xab8] sm:$0xff] }
 0x329   : > { %7711 = vmatprep.subr.mxu0 %v7667_v23  ;;  %7311 = vmatpush1.msra.mxu1 %v7204_v24  ;;  %v2256_v39 = vadd.f32 %v2178_v30, %v14139_v46  ;;  %v7670_v46 = vld [vmem:[#allocation5 + $0xb00] sm:$0xff]  ;;  %v7675_v24 = vld [vmem:[#allocation5 + $0xb28] sm:$0xff] }
 0x32a   : > { %7712 = vmatpush1.msra.mxu0 %v7666_v25  ;;  %7745 = vmatprep.mubr.f32.mxu0 %v13468_v0  ;;  %v14180_v41 = vpop.f32.mrf.mxu1  ;;  %v8137_v30 = vld [vmem:[#allocation5 + $0xba8] sm:$0xff] }
 0x32b   : > { %7312 = vmatprep.subr.mxu1 %v7199_v27  ;;  %12967 = vmatmul.mubr.msk.f32.vlgmr.msra.gmra.mxu0 %vm889_vm2, %v14176_v33  ;;  %v2719_v43 = vpop.f32.mrf.mxu0  ;;  %v14184_v45 = vadd.f32 %v2413_v62, %v2256_v39  ;;  %v7669_v39 = vld [vmem:[#allocation5 + $0xaf8] sm:$0xff] }
 0x32c   : > { %7851 = vmatprep.subr.mxu0 %v7677_v34  ;;  %7313 = vmatpush1.msra.mxu1 %v7198_v36  ;;  %v7674_v34 = vld [vmem:[#allocation5 + $0xb20] sm:$0xff] }
 0x32d   : > { %7346 = vmatprep.mubr.f32.mxu1 %v13468_v0  ;;  %7852 = vmatpush1.msra.mxu0 %v7676_v40  ;;  %v14187_v29 = vpop.f32.mrf.mxu0 }
 0x32e   : > { %12962 = vmatmul.mubr.msk.f32.vlgmr.msra.gmra.mxu1 %vm889_vm2, %v14131_v35  ;;  %7474 = vmatprep.subr.mxu1 %v7438_v15  ;;  %v2342_v53 = vpop.f32.mrf.mxu1  ;;  %v7442_v35 = vld [vmem:[#allocation5 + $0xad8] sm:$0xff]  ;;  %v14221_v15 = vrot.slane %v13956_v32, 7  ;;  %v8141_v32 = vld [vmem:[#allocation5 + $0xbc8] sm:$0xff] }
 0x32f   : > { %7853 = vmatprep.subr.mxu0 %v7671_v48  ;;  %7475 = vmatpush1.msra.mxu1 %v7437_v49  ;;  %v2489_v57 = vadd.f32 %v2342_v53, %v14152_v63  ;;  %v7903_v63 = vld [vmem:[#allocation5 + $0xb50] sm:$0xff] }
 0x330   : > { %7854 = vmatpush1.msra.mxu0 %v7670_v46  ;;  %7887 = vmatprep.mubr.f32.mxu0 %v13468_v0  ;;  %v14193_v47 = vpop.f32.mrf.mxu1  ;;  %v7668_v48 = vld [vmem:[#allocation5 + $0xaf0] sm:$0xff] }
 0x331   : > { %7476 = vmatprep.subr.mxu1 %v7432_v52  ;;  %12969 = vmatmul.mubr.msk.f32.vlgmr.msra.gmra.mxu0 %vm889_vm2, %v14176_v33  ;;  %v2883_v62 = vpop.f32.mrf.mxu0  ;;  %v14197_v1 = vadd.f32 %v2577_v19, %v2489_v57  ;;  %v8142_v19 = vld [vmem:[#allocation5 + $0xbd0] sm:$0xff] }
 0x332   : > { %8015 = vmatprep.subr.mxu0 %v7910_v55  ;;  %7477 = vmatpush1.msra.mxu1 %v7431_v56  ;;  %v8146_v46 = vld [vmem:[#allocation5 + $0xbf0] sm:$0xff] }
 0x333   : > { %7510 = vmatprep.mubr.f32.mxu1 %v13468_v0  ;;  %8016 = vmatpush1.msra.mxu0 %v7909_v58  ;;  %v14200_v6 = vpop.f32.mrf.mxu0  ;;  %v7907_v56 = vld [vmem:[#allocation5 + $0xb70] sm:$0xff]  ;;  %v7902_v58 = vld [vmem:[#allocation5 + $0xb48] sm:$0xff] }
 0x334   : > { %12964 = vmatmul.mubr.msk.f32.vlgmr.msra.gmra.mxu1 %vm889_vm2, %v14160_v9  ;;  %7616 = vmatprep.subr.mxu1 %v7442_v35  ;;  %v2484_v11 = vpop.f32.mrf.mxu1 }
 0x335   : > { %8017 = vmatprep.subr.mxu0 %v7904_v2  ;;  %7617 = vmatpush1.msra.mxu1 %v7441_v3  ;;  %v2493_v18 = vadd.f32 %v2484_v11, %v14168_v20  ;;  %v8136_v20 = vld [vmem:[#allocation5 + $0xba0] sm:$0xff] }
 0x336   : > { %8018 = vmatpush1.msra.mxu0 %v7903_v63  ;;  %8051 = vmatprep.mubr.f32.mxu0 %v13468_v0  ;;  %v14209_v23 = vpop.f32.mrf.mxu1  ;;  %v7901_v2 = vld [vmem:[#allocation5 + $0xb40] sm:$0xff] }
 0x337   : > { %7618 = vmatprep.subr.mxu1 %v7436_v7  ;;  %12971 = vmatmul.mubr.msk.f32.vlgmr.msra.gmra.mxu0 %vm889_vm2, %v14205_v10  ;;  %v3047_v25 = vpop.f32.mrf.mxu0  ;;  %v14213_v27 = vadd.f32 %v2719_v43, %v2493_v18  ;;  %v8147_v43 = vld [vmem:[#allocation5 + $0xbf8] sm:$0xff]  ;;  %v8379_v63 = vld [vmem:[#allocation5 + $0xc40] sm:$0xff]  ;;  %v7911_v18 = vld [vmem:[#allocation5 + $0xb90] sm:$0xff] }
 0x338   : > { %8179 = vmatprep.subr.mxu0 %v8143_v13  ;;  %7619 = vmatpush1.msra.mxu1 %v7435_v14  ;;  %v8374_v14 = vld [vmem:[#allocation5 + $0xc18] sm:$0xff] }
 0x339   : > { %7652 = vmatprep.mubr.f32.mxu1 %v13468_v0  ;;  %8180 = vmatpush1.msra.mxu0 %v8142_v19  ;;  %v14216_v36 = vpop.f32.mrf.mxu0 }
 0x33a   : > { %12966 = vmatmul.mubr.msk.f32.vlgmr.msra.gmra.mxu1 %vm889_vm2, %v14160_v9  ;;  %7780 = vmatprep.subr.mxu1 %v7675_v24  ;;  %v2648_v40 = vpop.f32.mrf.mxu1  ;;  %v7908_v9 = vld [vmem:[#allocation5 + $0xb78] sm:$0xff]  ;;  %v7906_v24 = vld [vmem:[#allocation5 + $0xb68] sm:$0xff] }
 0x33b   : > { %8181 = vmatprep.subr.mxu0 %v8137_v30  ;;  %7781 = vmatpush1.msra.mxu1 %v7674_v34  ;;  %v2726_v49 = vadd.f32 %v2648_v40, %v14184_v45  ;;  %v8140_v45 = vld [vmem:[#allocation5 + $0xbc0] sm:$0xff]  ;;  %v8612_v40 = vld [vmem:[#allocation5 + $0xc90] sm:$0xff] }
 0x33c   : > { %8182 = vmatpush1.msra.mxu0 %v8136_v20  ;;  %8215 = vmatprep.mubr.f32.mxu0 %v13468_v0  ;;  %v14225_v52 = vpop.f32.mrf.mxu1  ;;  %v7905_v34 = vld [vmem:[#allocation5 + $0xb60] sm:$0xff]  ;;  %v1176_v20 = vadd.f32 %v14050_v8, %v14057_v12  ;;  %v8607_v8 = vld [vmem:[#allocation5 + $0xc68] sm:$0xff] }
 0x33d   : > { %7782 = vmatprep.subr.mxu1 %v7669_v39  ;;  %12973 = vmatmul.mubr.msk.f32.vlgmr.msra.gmra.mxu0 %vm889_vm2, %v14221_v15  ;;  %v3189_v53 = vpop.f32.mrf.mxu0  ;;  %v14229_v55 = vadd.f32 %v2883_v62, %v2726_v49  ;;  %v8380_v62 = vld [vmem:[#allocation5 + $0xc48] sm:$0xff]  ;;  %v8144_v12 = vld [vmem:[#allocation5 + $0xbe0] sm:$0xff] }
 0x33e   : > { %8321 = vmatprep.subr.mxu0 %v8147_v43  ;;  %7783 = vmatpush1.msra.mxu1 %v7668_v48  ;;  %v8145_v48 = vld [vmem:[#allocation5 + $0xbe8] sm:$0xff]  ;;  %v1550_v49 = vadd.f32 %v14103_v5, %v1176_v20  ;;  %v8139_v5 = vld [vmem:[#allocation5 + $0xbb8] sm:$0xff]  ;;  %v8849_v20 = vld [vmem:[#allocation5 + $0xd00] sm:$0xff] }
 0x33f   : > { %7816 = vmatprep.mubr.f32.mxu1 %v13468_v0  ;;  %8322 = vmatpush1.msra.mxu0 %v8146_v46  ;;  %v14232_v57 = vpop.f32.mrf.mxu0 }
 0x340   : > { %12968 = vmatmul.mubr.msk.f32.vlgmr.msra.gmra.mxu1 %vm889_vm2, %v14176_v33  ;;  %7944 = vmatprep.subr.mxu1 %v7908_v9  ;;  %v2812_v35 = vpop.f32.mrf.mxu1  ;;  %v7912_v33 = vld [vmem:[#allocation5 + $0xb98] sm:$0xff] }
 0x341   : > { %8323 = vmatprep.subr.mxu0 %v8141_v32  ;;  %7945 = vmatpush1.msra.mxu1 %v7907_v56  ;;  %v2959_v3 = vadd.f32 %v2812_v35, %v14197_v1  ;;  %v8373_v1 = vld [vmem:[#allocation5 + $0xc10] sm:$0xff]  ;;  %v14264_v32 = vrot.slane %v14042_v61, 1  ;;  %v1318_v35 = vadd.f32 %v14060_v16, %v14077_v37 }
 0x342   : > { %8324 = vmatpush1.msra.mxu0 %v8140_v45  ;;  %8357 = vmatprep.mubr.f32.mxu0 %v13468_v0  ;;  %v14238_v7 = vpop.f32.mrf.mxu1  ;;  %v8617_v45 = vld [vmem:[#allocation5 + $0xcb8] sm:$0xff] }
 0x343   : > { %7946 = vmatprep.subr.mxu1 %v7902_v58  ;;  %12975 = vmatmul.mubr.msk.f32.vlgmr.msra.gmra.mxu0 %vm889_vm2, %v14221_v15  ;;  %v3353_v11 = vpop.f32.mrf.mxu0  ;;  %v14242_v13 = vadd.f32 %v3047_v25, %v2959_v3  ;;  %v8613_v25 = vld [vmem:[#allocation5 + $0xc98] sm:$0xff]  ;;  %v8138_v58 = vld [vmem:[#allocation5 + $0xbb0] sm:$0xff]  ;;  %v1554_v16 = vadd.f32 %v14119_v21, %v1318_v35  ;;  %v8372_v21 = vld [vmem:[#allocation5 + $0xc08] sm:$0xff] }
 0x344   : > { %8485 = vmatprep.subr.mxu0 %v8380_v62  ;;  %7947 = vmatpush1.msra.mxu1 %v7901_v2  ;;  %v1785_v62 = vadd.f32 %v14082_v44, %v1550_v49  ;;  %v8616_v3 = vld [vmem:[#allocation5 + $0xcb0] sm:$0xff] }
 0x345   : > { %7980 = vmatprep.mubr.f32.mxu1 %v13468_v0  ;;  %8486 = vmatpush1.msra.mxu0 %v8379_v63  ;;  %v14245_v19 = vpop.f32.mrf.mxu0  ;;  %v8843_v49 = vld [vmem:[#allocation5 + $0xcd0] sm:$0xff] }
 0x346   : > { %12970 = vmatmul.mubr.msk.f32.vlgmr.msra.gmra.mxu1 %vm889_vm2, %v14205_v10  ;;  %8086 = vmatprep.subr.mxu1 %v7912_v33  ;;  %v2954_v30 = vpop.f32.mrf.mxu1  ;;  %v8378_v33 = vld [vmem:[#allocation5 + $0xc38] sm:$0xff]  ;;  %v2020_v37 = vadd.f32 %v14148_v60, %v1785_v62  ;;  %v9082_v35 = vld [vmem:[#allocation5 + $0xd50] sm:$0xff] }
 0x347   : > { %8487 = vmatprep.subr.mxu0 %v8374_v14  ;;  %8087 = vmatpush1.msra.mxu1 %v7911_v18  ;;  %v2963_v39 = vadd.f32 %v2954_v30, %v14213_v27  ;;  %v8606_v27 = vld [vmem:[#allocation5 + $0xc60] sm:$0xff]  ;;  %v8611_v14 = vld [vmem:[#allocation5 + $0xc88] sm:$0xff]  ;;  %v8377_v18 = vld [vmem:[#allocation5 + $0xc30] sm:$0xff]  ;;  %v1789_v30 = vadd.f32 %v14097_v59, %v1554_v16 }
 0x348   : > { %8488 = vmatpush1.msra.mxu0 %v8373_v1  ;;  %8521 = vmatprep.mubr.f32.mxu0 %v13468_v0  ;;  %v14253_v43 = vpop.f32.mrf.mxu1 }
 0x349   : > { %8088 = vmatprep.subr.mxu1 %v7906_v24  ;;  %12977 = vmatmul.mubr.msk.f32.vlgmr.msra.gmra.mxu0 %vm889_vm2, %v14042_v61  ;;  %v14258_v46 = vpop.f32.mrf.mxu0  ;;  %v14260_v9 = vadd.f32 %v3189_v53, %v2963_v39  ;;  %v8371_v24 = vld [vmem:[#allocation5 + $0xc00] sm:$0xff] }
 0x34a   : > { %8649 = vmatprep.subr.mxu0 %v8613_v25  ;;  %8089 = vmatpush1.msra.mxu1 %v7905_v34  ;;  %v2255_v25 = vadd.f32 %v14126_v31, %v2020_v37 }
 0x34b   : > { %8122 = vmatprep.mubr.f32.mxu1 %v13468_v0  ;;  %8650 = vmatpush1.msra.mxu0 %v8612_v40  ;;  %v14266_v56 = vpop.f32.mrf.mxu0  ;;  %v2024_v40 = vadd.f32 %v14164_v17, %v1789_v30  ;;  %v8376_v17 = vld [vmem:[#allocation5 + $0xc28] sm:$0xff] }
 0x34c   : > { %12972 = vmatmul.mubr.msk.f32.vlgmr.msra.gmra.mxu1 %vm889_vm2, %v14205_v10  ;;  %8250 = vmatprep.subr.mxu1 %v8145_v48  ;;  %v3118_v53 = vpop.f32.mrf.mxu1  ;;  %v1247_v10 = vadd.f32 %v14090_v51, %v14065_v22  ;;  %v8610_v22 = vld [vmem:[#allocation5 + $0xc80] sm:$0xff]  ;;  %v2490_v59 = vadd.f32 %v14193_v47, %v2255_v25  ;;  %v8844_v48 = vld [vmem:[#allocation5 + $0xcd8] sm:$0xff]  ;;  %v9081_v25 = vld [vmem:[#allocation5 + $0xd48] sm:$0xff] }
 0x34d   : > { %8651 = vmatprep.subr.mxu0 %v8607_v8  ;;  %8251 = vmatpush1.msra.mxu1 %v8144_v12  ;;  %v3196_v2 = vadd.f32 %v3118_v53, %v14229_v55  ;;  %v2259_v53 = vadd.f32 %v14142_v50, %v2024_v40  ;;  %v8841_v40 = vld [vmem:[#allocation5 + $0xcc0] sm:$0xff] }
 0x34e   : > { %8652 = vmatpush1.msra.mxu0 %v8606_v27  ;;  %8685 = vmatprep.mubr.f32.mxu0 %v13468_v0  ;;  %v14277_v63 = vpop.f32.mrf.mxu1  ;;  %v1552_v60 = vadd.f32 %v14070_v28, %v1247_v10  ;;  %v8382_v28 = vld [vmem:[#allocation5 + $0xc58] sm:$0xff]  ;;  %v9077_v10 = vld [vmem:[#allocation5 + $0xd28] sm:$0xff] }
 0x34f   : > { %8252 = vmatprep.subr.mxu1 %v8139_v5  ;;  %12979 = vmatmul.mubr.msk.f32.vlgmr.msra.gmra.mxu0 %vm889_vm2, %v14264_v32  ;;  %v14283_v44 = vpop.f32.mrf.mxu0  ;;  %v14285_v55 = vadd.f32 %v3353_v11, %v3196_v2  ;;  %v8850_v11 = vld [vmem:[#allocation5 + $0xd08] sm:$0xff]  ;;  %v9083_v27 = vld [vmem:[#allocation5 + $0xd58] sm:$0xff]  ;;  %v8375_v5 = vld [vmem:[#allocation5 + $0xc20] sm:$0xff] }
 0x350   : > { %8791 = vmatprep.subr.mxu0 %v8617_v45  ;;  %8253 = vmatpush1.msra.mxu1 %v8138_v58  ;;  %v2725_v45 = vadd.f32 %v14171_v26, %v2490_v59  ;;  %v8615_v2 = vld [vmem:[#allocation5 + $0xca8] sm:$0xff] }
 0x351   : > { %8286 = vmatprep.mubr.f32.mxu1 %v13468_v0  ;;  %8792 = vmatpush1.msra.mxu0 %v8616_v3  ;;  %v14288_v51 = vpop.f32.mrf.mxu0  ;;  %v2494_v3 = vadd.f32 %v14209_v23, %v2259_v53  ;;  %v8609_v23 = vld [vmem:[#allocation5 + $0xc78] sm:$0xff]  ;;  %v8846_v53 = vld [vmem:[#allocation5 + $0xce8] sm:$0xff] }
 0x352   : > { %12974 = vmatmul.mubr.msk.f32.vlgmr.msra.gmra.mxu1 %vm889_vm2, %v14221_v15  ;;  %8414 = vmatprep.subr.mxu1 %v8378_v33  ;;  %v3282_v1 = vpop.f32.mrf.mxu1  ;;  %v1787_v15 = vadd.f32 %v14135_v42, %v1552_v60  ;;  %v8381_v42 = vld [vmem:[#allocation5 + $0xc50] sm:$0xff]  ;;  %v2960_v50 = vadd.f32 %v14238_v7, %v2725_v45  ;;  %v9076_v33 = vld [vmem:[#allocation5 + $0xd20] sm:$0xff] }
 0x353   : > { %8793 = vmatprep.subr.mxu0 %v8611_v14  ;;  %8415 = vmatpush1.msra.mxu1 %v8377_v18  ;;  %v3429_v34 = vadd.f32 %v3282_v1, %v14242_v13  ;;  %v9087_v14 = vld [vmem:[#allocation5 + $0xd78] sm:$0xff]  ;;  %v8608_v18 = vld [vmem:[#allocation5 + $0xc70] sm:$0xff] }
 0x354   : > { %8794 = vmatpush1.msra.mxu0 %v8610_v22  ;;  %8827 = vmatprep.mubr.f32.mxu0 %v13468_v0  ;;  %v14298_v39 = vpop.f32.mrf.mxu1  ;;  %v2022_v47 = vadd.f32 %v14110_v38, %v1787_v15  ;;  %v2729_v22 = vadd.f32 %v14187_v29, %v2494_v3  ;;  %v9086_v1 = vld [vmem:[#allocation5 + $0xd70] sm:$0xff] }
 0x355   : > { %8416 = vmatprep.subr.mxu1 %v8372_v21  ;;  %12981 = vmatmul.mubr.msk.f32.vlgmr.msra.gmra.mxu0 %vm889_vm2, %v14264_v32  ;;  %v14304_v31 = vpop.f32.mrf.mxu0  ;;  %v14307_v13 = vadd.f32 %v14258_v46, %v3429_v34  ;;  %v14316_v46 = vrot.slane %v14042_v61, 2  ;;  %v3195_v21 = vadd.f32 %v14216_v36, %v2960_v50  ;;  %v9080_v34 = vld [vmem:[#allocation5 + $0xd40] sm:$0xff]  ;;  %v9552_v50 = vld [vmem:[#allocation5 + $0xe10] sm:$0xff] }
 0x356   : > { %8955 = vmatprep.subr.mxu0 %v8850_v11  ;;  %8417 = vmatpush1.msra.mxu1 %v8371_v24  ;;  %v2257_v38 = vadd.f32 %v14180_v41, %v2022_v47  ;;  %v8614_v41 = vld [vmem:[#allocation5 + $0xca0] sm:$0xff]  ;;  %v8848_v24 = vld [vmem:[#allocation5 + $0xcf8] sm:$0xff]  ;;  %v2964_v30 = vadd.f32 %v14253_v43, %v2729_v22  ;;  %v8842_v43 = vld [vmem:[#allocation5 + $0xcc8] sm:$0xff]  ;;  %v14406_v22 = vrot.slane %v14042_v61, 5 }
 0x357   : > { %8450 = vmatprep.mubr.f32.mxu1 %v13468_v0  ;;  %8956 = vmatpush1.msra.mxu0 %v8849_v20  ;;  %v14310_v8 = vpop.f32.mrf.mxu0  ;;  %v3430_v29 = vadd.f32 %v14298_v39, %v3195_v21  ;;  %v9557_v21 = vld [vmem:[#allocation5 + $0xe38] sm:$0xff] }
 0x358   : > { %12976 = vmatmul.mubr.msk.f32.vlgmr.msra.gmra.mxu1 %vm889_vm2, %v14042_v61  ;;  %8556 = vmatprep.subr.mxu1 %v8382_v28  ;;  %v3424_v12 = vpop.f32.mrf.mxu1  ;;  %v2492_v7 = vadd.f32 %v14155_v4, %v2257_v38  ;;  %v9320_v28 = vld [vmem:[#allocation5 + $0xdc8] sm:$0xff]  ;;  %v3199_v59 = vadd.f32 %v14232_v57, %v2964_v30  ;;  %v8845_v38 = vld [vmem:[#allocation5 + $0xce0] sm:$0xff] }
 0x359   : > { %8957 = vmatprep.subr.mxu0 %v8844_v48  ;;  %8557 = vmatpush1.msra.mxu1 %v8381_v42  ;;  %v3433_v58 = vadd.f32 %v3424_v12, %v14260_v9  ;;  %v3665_v48 = vadd.f32 %v14266_v56, %v3430_v29  ;;  %v9319_v42 = vld [vmem:[#allocation5 + $0xdc0] sm:$0xff]  ;;  %v9314_v56 = vld [vmem:[#allocation5 + $0xd98] sm:$0xff]  ;;  %v8851_v12 = vld [vmem:[#allocation5 + $0xd10] sm:$0xff] }
 0x35a   : > { %8958 = vmatpush1.msra.mxu0 %v8843_v49  ;;  %8991 = vmatprep.mubr.f32.mxu0 %v13468_v0  ;;  %v14323_v62 = vpop.f32.mrf.mxu1  ;;  %v2727_v4 = vadd.f32 %v14225_v52, %v2492_v7  ;;  %v8847_v52 = vld [vmem:[#allocation5 + $0xcf0] sm:$0xff] }
 0x35b   : > { %8558 = vmatprep.subr.mxu1 %v8376_v17  ;;  %12983 = vmatmul.mubr.msk.f32.vlgmr.msra.gmra.mxu0 %vm889_vm2, %v14316_v46  ;;  %v14329_v26 = vpop.f32.mrf.mxu0  ;;  %v14332_v9 = vadd.f32 %v14283_v44, %v3433_v58  ;;  %v14341_v44 = vrot.slane %v14042_v61, 3  ;;  %v3434_v17 = vadd.f32 %v14323_v62, %v3199_v59  ;;  %v14387_v58 = vrot.slane %v14042_v61, 4 }
 0x35c   : > { %9119 = vmatprep.subr.mxu0 %v9083_v27  ;;  %8559 = vmatpush1.msra.mxu1 %v8375_v5  ;;  %v2962_v15 = vadd.f32 %v14200_v6, %v2727_v4  ;;  %v8852_v6 = vld [vmem:[#allocation5 + $0xd18] sm:$0xff] }
 0x35d   : > { %8592 = vmatprep.mubr.f32.mxu1 %v13468_v0  ;;  %9120 = vmatpush1.msra.mxu0 %v9082_v35  ;;  %v14335_v16 = vpop.f32.mrf.mxu0  ;;  %v9553_v35 = vld [vmem:[#allocation5 + $0xe18] sm:$0xff]  ;;  %v3669_v3 = vadd.f32 %v14288_v51, %v3434_v17  ;;  %v9547_v51 = vld [vmem:[#allocation5 + $0xde8] sm:$0xff] }
 0x35e   : > { %12978 = vmatmul.mubr.msk.f32.vlgmr.msra.gmra.mxu1 %vm889_vm2, %v14042_v61  ;;  %8720 = vmatprep.subr.mxu1 %v8615_v2  ;;  %v3588_v37 = vpop.f32.mrf.mxu1 }
 0x35f   : > { %9121 = vmatprep.subr.mxu0 %v9077_v10  ;;  %8721 = vmatpush1.msra.mxu1 %v8614_v41  ;;  %v3666_v60 = vadd.f32 %v3588_v37, %v14285_v55  ;;  %v9085_v10 = vld [vmem:[#allocation5 + $0xd68] sm:$0xff] }
 0x360   : > { %9122 = vmatpush1.msra.mxu0 %v9076_v33  ;;  %9155 = vmatprep.mubr.f32.mxu0 %v13468_v0  ;;  %v14348_v11 = vpop.f32.mrf.mxu1 }
 0x361   : > { %8722 = vmatprep.subr.mxu1 %v8609_v23  ;;  %12985 = vmatmul.mubr.msk.f32.vlgmr.msra.gmra.mxu0 %vm889_vm2, %v14341_v44  ;;  %v14354_v36 = vpop.f32.mrf.mxu0  ;;  %v14357_v55 = vadd.f32 %v14304_v31, %v3666_v60  ;;  %v9546_v23 = vld [vmem:[#allocation5 + $0xde0] sm:$0xff]  ;;  %v9078_v60 = vld [vmem:[#allocation5 + $0xd30] sm:$0xff] }
 0x362   : > { %9261 = vmatprep.subr.mxu0 %v9087_v14  ;;  %8723 = vmatpush1.msra.mxu1 %v8608_v18  ;;  %v9079_v14 = vld [vmem:[#allocation5 + $0xd38] sm:$0xff] }
 0x363   : > { %8756 = vmatprep.mubr.f32.mxu1 %v13468_v0  ;;  %9262 = vmatpush1.msra.mxu0 %v9086_v1  ;;  %v14360_v20 = vpop.f32.mrf.mxu0 }
 0x364   : > { %12980 = vmatmul.mubr.msk.f32.vlgmr.msra.gmra.mxu1 %vm889_vm2, %v14264_v32  ;;  %8884 = vmatprep.subr.mxu1 %v8848_v24  ;;  %v3752_v39 = vpop.f32.mrf.mxu1  ;;  %v3197_v32 = vadd.f32 %v14277_v63, %v2962_v15  ;;  %v9313_v63 = vld [vmem:[#allocation5 + $0xd90] sm:$0xff]  ;;  %v9790_v15 = vld [vmem:[#allocation5 + $0xe88] sm:$0xff] }
 0x365   : > { %9263 = vmatprep.subr.mxu0 %v9081_v25  ;;  %8885 = vmatpush1.msra.mxu1 %v8847_v52  ;;  %v3899_v31 = vadd.f32 %v3752_v39, %v14307_v13  ;;  %v9317_v25 = vld [vmem:[#allocation5 + $0xdb0] sm:$0xff]  ;;  %v9311_v39 = vld [vmem:[#allocation5 + $0xd80] sm:$0xff] }
 0x366   : > { %9264 = vmatpush1.msra.mxu0 %v9080_v34  ;;  %9297 = vmatprep.mubr.f32.mxu0 %v13468_v0  ;;  %v3754_v49 = vpop.f32.mrf.mxu1  ;;  %v3432_v62 = vadd.f32 %v14245_v19, %v3197_v32  ;;  %v9784_v32 = vld [vmem:[#allocation5 + $0xe58] sm:$0xff] }
 0x367   : > { %8886 = vmatprep.subr.mxu1 %v8842_v43  ;;  %12987 = vmatmul.mubr.msk.f32.vlgmr.msra.gmra.mxu0 %vm889_vm2, %v14341_v44  ;;  %v3900_v47 = vadd.f32 %v3754_v49, %v3665_v48  ;;  %v14373_v57 = vpop.f32.mrf.mxu0  ;;  %v14376_v13 = vadd.f32 %v14329_v26, %v3899_v31  ;;  %v9322_v31 = vld [vmem:[#allocation5 + $0xdd8] sm:$0xff]  ;;  %v9321_v49 = vld [vmem:[#allocation5 + $0xdd0] sm:$0xff] }
 0x368   : > { %9425 = vmatprep.subr.mxu0 %v9320_v28  ;;  %8887 = vmatpush1.msra.mxu1 %v8841_v40  ;;  %v3667_v41 = vadd.f32 %v14348_v11, %v3432_v62  ;;  %v9556_v11 = vld [vmem:[#allocation5 + $0xe30] sm:$0xff]  ;;  %v9789_v40 = vld [vmem:[#allocation5 + $0xe80] sm:$0xff] }
 0x369   : > { %8920 = vmatprep.mubr.f32.mxu1 %v13468_v0  ;;  %9426 = vmatpush1.msra.mxu0 %v9319_v42  ;;  %v14379_v27 = vpop.f32.mrf.mxu0  ;;  %v14382_v5 = vadd.f32 %v14335_v16, %v3900_v47 }
 0x36a   : > { %12982 = vmatmul.mubr.msk.f32.vlgmr.msra.gmra.mxu1 %vm889_vm2, %v14316_v46  ;;  %9026 = vmatprep.subr.mxu1 %v8852_v6  ;;  %v3894_v45 = vpop.f32.mrf.mxu1  ;;  %v3902_v4 = vadd.f32 %v14310_v8, %v3667_v41  ;;  %v9550_v8 = vld [vmem:[#allocation5 + $0xe00] sm:$0xff]  ;;  %v9783_v6 = vld [vmem:[#allocation5 + $0xe50] sm:$0xff]  ;;  %v9549_v41 = vld [vmem:[#allocation5 + $0xdf8] sm:$0xff] }
 0x36b   : > { %9427 = vmatprep.subr.mxu0 %v9314_v56  ;;  %9027 = vmatpush1.msra.mxu1 %v8851_v12  ;;  %v3903_v2 = vadd.f32 %v3894_v45, %v14332_v9  ;;  %v9084_v9 = vld [vmem:[#allocation5 + $0xd60] sm:$0xff]  ;;  %v14435_v56 = vrot.slane %v14042_v61, 6  ;;  %v10023_v12 = vld [vmem:[#allocation5 + $0xed8] sm:$0xff]  ;;  %v9555_v45 = vld [vmem:[#allocation5 + $0xe28] sm:$0xff] }
 0x36c   : > { %9428 = vmatpush1.msra.mxu0 %v9313_v63  ;;  %9461 = vmatprep.mubr.f32.mxu0 %v13468_v0  ;;  %v3896_v26 = vpop.f32.mrf.mxu1  ;;  %v9315_v63 = vld [vmem:[#allocation5 + $0xda0] sm:$0xff] }
 0x36d   : > { %9028 = vmatprep.subr.mxu1 %v8846_v53  ;;  %12989 = vmatmul.mubr.msk.f32.vlgmr.msra.gmra.mxu0 %vm889_vm2, %v14387_v58  ;;  %v3904_v33 = vadd.f32 %v3896_v26, %v3669_v3  ;;  %v4457_v16 = vpop.f32.mrf.mxu0  ;;  %v14397_v19 = vadd.f32 %v14354_v36, %v3903_v2  ;;  %v10017_v2 = vld [vmem:[#allocation5 + $0xea8] sm:$0xff]  ;;  %v9554_v3 = vld [vmem:[#allocation5 + $0xe20] sm:$0xff] }
 0x36e   : > { %9589 = vmatprep.subr.mxu0 %v9553_v35  ;;  %9029 = vmatpush1.msra.mxu1 %v8845_v38 }
 0x36f   : > { %9062 = vmatprep.mubr.f32.mxu1 %v13468_v0  ;;  %9590 = vmatpush1.msra.mxu0 %v9552_v50  ;;  %v4459_v7 = vpop.f32.mrf.mxu0  ;;  %v14401_v37 = vadd.f32 %v14360_v20, %v3904_v33  ;;  %v9312_v20 = vld [vmem:[#allocation5 + $0xd88] sm:$0xff]  ;;  %v10016_v50 = vld [vmem:[#allocation5 + $0xea0] sm:$0xff] }
 0x370   : > { %12984 = vmatmul.mubr.msk.f32.vlgmr.msra.gmra.mxu1 %vm889_vm2, %v14316_v46  ;;  %9190 = vmatprep.subr.mxu1 %v9085_v10  ;;  %v4058_v18 = vpop.f32.mrf.mxu1  ;;  %v9318_v46 = vld [vmem:[#allocation5 + $0xdb8] sm:$0xff] }
 0x371   : > { %9591 = vmatprep.subr.mxu0 %v9547_v51  ;;  %9191 = vmatpush1.msra.mxu1 %v9084_v9  ;;  %v4136_v1 = vadd.f32 %v4058_v18, %v14357_v55  ;;  %v9551_v55 = vld [vmem:[#allocation5 + $0xe08] sm:$0xff]  ;;  %v9548_v51 = vld [vmem:[#allocation5 + $0xdf0] sm:$0xff] }
 0x372   : > { %9592 = vmatpush1.msra.mxu0 %v9546_v23  ;;  %9625 = vmatprep.mubr.f32.mxu0 %v13468_v0  ;;  %v4060_v24 = vpop.f32.mrf.mxu1  ;;  %v10026_v23 = vld [vmem:[#allocation5 + $0xef0] sm:$0xff] }
 0x373   : > { %9192 = vmatprep.subr.mxu1 %v9079_v14  ;;  %12991 = vmatmul.mubr.msk.f32.vlgmr.msra.gmra.mxu0 %vm889_vm2, %v14406_v22  ;;  %v4137_v30 = vadd.f32 %v4060_v24, %v3902_v4  ;;  %v4599_v29 = vpop.f32.mrf.mxu0  ;;  %v14414_v36 = vadd.f32 %v14373_v57, %v4136_v1  ;;  %v9316_v57 = vld [vmem:[#allocation5 + $0xda8] sm:$0xff] }
 0x374   : > { %9731 = vmatprep.subr.mxu0 %v9557_v21  ;;  %9193 = vmatpush1.msra.mxu1 %v9078_v60  ;;  %v9787_v21 = vld [vmem:[#allocation5 + $0xe70] sm:$0xff]  ;;  %v10020_v60 = vld [vmem:[#allocation5 + $0xec0] sm:$0xff] }
 0x375   : > { %9226 = vmatprep.mubr.f32.mxu1 %v13468_v0  ;;  %9732 = vmatpush1.msra.mxu0 %v9556_v11  ;;  %v4601_v52 = vpop.f32.mrf.mxu0  ;;  %v14418_v34 = vadd.f32 %v14379_v27, %v4137_v30  ;;  %v9782_v11 = vld [vmem:[#allocation5 + $0xe48] sm:$0xff]  ;;  %v9781_v30 = vld [vmem:[#allocation5 + $0xe40] sm:$0xff] }
 0x376   : > { %12986 = vmatmul.mubr.msk.f32.vlgmr.msra.gmra.mxu1 %vm889_vm2, %v14341_v44  ;;  %9354 = vmatprep.subr.mxu1 %v9318_v46  ;;  %v4222_v43 = vpop.f32.mrf.mxu1  ;;  %v10260_v46 = vld [vmem:[#allocation5 + $0xf48] sm:$0xff] }
 0x377   : > { %9733 = vmatprep.subr.mxu0 %v9551_v55  ;;  %9355 = vmatpush1.msra.mxu1 %v9317_v25  ;;  %v4369_v28 = vadd.f32 %v4222_v43, %v14376_v13  ;;  %v9792_v25 = vld [vmem:[#allocation5 + $0xe98] sm:$0xff]  ;;  %v10253_v43 = vld [vmem:[#allocation5 + $0xf10] sm:$0xff] }
 0x378   : > { %9734 = vmatpush1.msra.mxu0 %v9550_v8  ;;  %9767 = vmatprep.mubr.f32.mxu0 %v13468_v0  ;;  %v4224_v59 = vpop.f32.mrf.mxu1 }
 0x379   : > { %9356 = vmatprep.subr.mxu1 %v9312_v20  ;;  %12993 = vmatmul.mubr.msk.f32.vlgmr.msra.gmra.mxu0 %vm889_vm2, %v14406_v22  ;;  %v4370_v44 = vadd.f32 %v4224_v59, %v14382_v5  ;;  %v4763_v48 = vpop.f32.mrf.mxu0  ;;  %v14427_v42 = vadd.f32 %v4457_v16, %v4369_v28  ;;  %v10022_v5 = vld [vmem:[#allocation5 + $0xed0] sm:$0xff]  ;;  %v14450_v16 = vrot.slane %v14042_v61, 7  ;;  %v10021_v61 = vld [vmem:[#allocation5 + $0xec8] sm:$0xff]  ;;  %v10493_v59 = vld [vmem:[#allocation5 + $0xf98] sm:$0xff] }
 0x37a   : > { %9895 = vmatprep.subr.mxu0 %v9790_v15  ;;  %9357 = vmatpush1.msra.mxu1 %v9311_v39  ;;  %v9791_v20 = vld [vmem:[#allocation5 + $0xe90] sm:$0xff]  ;;  %v9786_v28 = vld [vmem:[#allocation5 + $0xe68] sm:$0xff] }
 0x37b   : > { %9390 = vmatprep.mubr.f32.mxu1 %v13468_v0  ;;  %9896 = vmatpush1.msra.mxu0 %v9789_v40  ;;  %v4765_v17 = vpop.f32.mrf.mxu0  ;;  %v14430_v47 = vadd.f32 %v4459_v7, %v4370_v44 }
 0x37c   : > { %12988 = vmatmul.mubr.msk.f32.vlgmr.msra.gmra.mxu1 %vm889_vm2, %v14387_v58  ;;  %9496 = vmatprep.subr.mxu1 %v9322_v31  ;;  %v4364_v13 = vpop.f32.mrf.mxu1  ;;  %v9785_v31 = vld [vmem:[#allocation5 + $0xe60] sm:$0xff] }
 0x37d   : > { %9897 = vmatprep.subr.mxu0 %v9784_v32  ;;  %9497 = vmatpush1.msra.mxu1 %v9321_v49  ;;  %v4373_v27 = vadd.f32 %v4364_v13, %v14397_v19  ;;  %v10027_v19 = vld [vmem:[#allocation5 + $0xef8] sm:$0xff]  ;;  %v10025_v32 = vld [vmem:[#allocation5 + $0xee8] sm:$0xff]  ;;  %v10486_v13 = vld [vmem:[#allocation5 + $0xf60] sm:$0xff] }
 0x37e   : > { %9898 = vmatpush1.msra.mxu0 %v9783_v6  ;;  %9931 = vmatprep.mubr.f32.mxu0 %v13468_v0  ;;  %v4366_v53 = vpop.f32.mrf.mxu1 }
 0x37f   : > { %9498 = vmatprep.subr.mxu1 %v9316_v57  ;;  %12995 = vmatmul.mubr.msk.f32.vlgmr.msra.gmra.mxu0 %vm889_vm2, %v14435_v56  ;;  %v4374_v35 = vadd.f32 %v4366_v53, %v14401_v37  ;;  %v4927_v38 = vpop.f32.mrf.mxu0  ;;  %v14442_v62 = vadd.f32 %v4599_v29, %v4373_v27  ;;  %v10024_v57 = vld [vmem:[#allocation5 + $0xee0] sm:$0xff]  ;;  %v10019_v27 = vld [vmem:[#allocation5 + $0xeb8] sm:$0xff]  ;;  %v14489_v53 = vrot.slane %v14032_v54, 1 }
 0x380   : > { %10059 = vmatprep.subr.mxu0 %v10023_v12  ;;  %9499 = vmatpush1.msra.mxu1 %v9315_v63 }
 0x381   : > { %9532 = vmatprep.mubr.f32.mxu1 %v13468_v0  ;;  %10060 = vmatpush1.msra.mxu0 %v10022_v5  ;;  %v4929_v26 = vpop.f32.mrf.mxu0  ;;  %v14445_v10 = vadd.f32 %v4601_v52, %v4374_v35  ;;  %v10018_v35 = vld [vmem:[#allocation5 + $0xeb0] sm:$0xff] }
 0x382   : > { %12990 = vmatmul.mubr.msk.f32.vlgmr.msra.gmra.mxu1 %vm889_vm2, %v14387_v58  ;;  %9660 = vmatprep.subr.mxu1 %v9555_v45  ;;  %v4528_v33 = vpop.f32.mrf.mxu1  ;;  %v9788_v58 = vld [vmem:[#allocation5 + $0xe78] sm:$0xff] }
 0x383   : > { %10061 = vmatprep.subr.mxu0 %v10017_v2  ;;  %9661 = vmatpush1.msra.mxu1 %v9554_v3  ;;  %v4606_v9 = vadd.f32 %v4528_v33, %v14414_v36  ;;  %v10259_v36 = vld [vmem:[#allocation5 + $0xf40] sm:$0xff]  ;;  %v10497_v45 = vld [vmem:[#allocation5 + $0xfb8] sm:$0xff] }
 0x384   : > { %10062 = vmatpush1.msra.mxu0 %v10016_v50  ;;  %10095 = vmatprep.mubr.f32.mxu0 %v13468_v0  ;;  %v4530_v7 = vpop.f32.mrf.mxu1  ;;  %v10490_v33 = vld [vmem:[#allocation5 + $0xf80] sm:$0xff] }
 0x385   : > { %9662 = vmatprep.subr.mxu1 %v9549_v41  ;;  %12997 = vmatmul.mubr.msk.f32.vlgmr.msra.gmra.mxu0 %vm889_vm2, %v14450_v16  ;;  %v4607_v37 = vadd.f32 %v4530_v7, %v14418_v34  ;;  %v5069_v14 = vpop.f32.mrf.mxu0  ;;  %v14457_v18 = vadd.f32 %v4763_v48, %v4606_v9  ;;  %v10254_v34 = vld [vmem:[#allocation5 + $0xf18] sm:$0xff]  ;;  %v10492_v48 = vld [vmem:[#allocation5 + $0xf90] sm:$0xff]  ;;  %v10252_v9 = vld [vmem:[#allocation5 + $0xf08] sm:$0xff] }
 0x386   : > { %10201 = vmatprep.subr.mxu0 %v10027_v19  ;;  %9663 = vmatpush1.msra.mxu1 %v9548_v51  ;;  %v10257_v41 = vld [vmem:[#allocation5 + $0xf30] sm:$0xff]  ;;  %v10730_v7 = vld [vmem:[#allocation5 + $0x1008] sm:$0xff] }
 0x387   : > { %9696 = vmatprep.mubr.f32.mxu1 %v13468_v0  ;;  %10202 = vmatpush1.msra.mxu0 %v10026_v23  ;;  %v5071_v1 = vpop.f32.mrf.mxu0  ;;  %v14460_v4 = vadd.f32 %v4765_v17, %v4607_v37 }
 0x388   : > { %12992 = vmatmul.mubr.msk.f32.vlgmr.msra.gmra.mxu1 %vm889_vm2, %v14406_v22  ;;  %9824 = vmatprep.subr.mxu1 %v9788_v58  ;;  %v4692_v24 = vpop.f32.mrf.mxu1  ;;  %v10251_v58 = vld [vmem:[#allocation5 + $0xf00] sm:$0xff] }
 0x389   : > { %10203 = vmatprep.subr.mxu0 %v10021_v61  ;;  %9825 = vmatpush1.msra.mxu1 %v9787_v21  ;;  %v4839_v29 = vadd.f32 %v4692_v24, %v14427_v42  ;;  %v10262_v61 = vld [vmem:[#allocation5 + $0xf58] sm:$0xff] }
 0x38a   : > { %10204 = vmatpush1.msra.mxu0 %v10020_v60  ;;  %10237 = vmatprep.mubr.f32.mxu0 %v13468_v0  ;;  %v4694_v55 = vpop.f32.mrf.mxu1 }
 0x38b   : > { %9826 = vmatprep.subr.mxu1 %v9782_v11  ;;  %12999 = vmatmul.mubr.msk.f32.vlgmr.msra.gmra.mxu0 %vm889_vm2, %v14450_v16  ;;  %v4840_v22 = vadd.f32 %v4694_v55, %v14430_v47  ;;  %v5233_v8 = vpop.f32.mrf.mxu0  ;;  %v14469_v52 = vadd.f32 %v4927_v38, %v4839_v29  ;;  %v10487_v47 = vld [vmem:[#allocation5 + $0xf68] sm:$0xff]  ;;  %v10723_v11 = vld [vmem:[#allocation5 + $0xfd0] sm:$0xff]  ;;  %v10963_v55 = vld [vmem:[#allocation5 + $0x1058] sm:$0xff] }
 0x38c   : > { %10365 = vmatprep.subr.mxu0 %v10260_v46  ;;  %9827 = vmatpush1.msra.mxu1 %v9781_v30  ;;  %v10256_v30 = vld [vmem:[#allocation5 + $0xf28] sm:$0xff] }
 0x38d   : > { %9860 = vmatprep.mubr.f32.mxu1 %v13468_v0  ;;  %10366 = vmatpush1.msra.mxu0 %v10259_v36  ;;  %v5235_v15 = vpop.f32.mrf.mxu0  ;;  %v14472_v39 = vadd.f32 %v4929_v26, %v4840_v22  ;;  %v14516_v36 = vrot.slane %v14032_v54, 2 }
 0x38e   : > { %12994 = vmatmul.mubr.msk.f32.vlgmr.msra.gmra.mxu1 %vm889_vm2, %v14435_v56  ;;  %9966 = vmatprep.subr.mxu1 %v9792_v25  ;;  %v4834_v40 = vpop.f32.mrf.mxu1  ;;  %v10255_v25 = vld [vmem:[#allocation5 + $0xf20] sm:$0xff] }
 0x38f   : > { %10367 = vmatprep.subr.mxu0 %v10254_v34  ;;  %9967 = vmatpush1.msra.mxu1 %v9791_v20  ;;  %v4843_v44 = vadd.f32 %v4834_v40, %v14442_v62  ;;  %v10496_v62 = vld [vmem:[#allocation5 + $0xfb0] sm:$0xff]  ;;  %v10495_v34 = vld [vmem:[#allocation5 + $0xfa8] sm:$0xff]  ;;  %v10956_v40 = vld [vmem:[#allocation5 + $0x1020] sm:$0xff] }
 0x390   : > { %10368 = vmatpush1.msra.mxu0 %v10253_v43  ;;  %10401 = vmatprep.mubr.f32.mxu0 %v13468_v0  ;;  %v4836_v42 = vpop.f32.mrf.mxu1 }
 0x391   : > { %9968 = vmatprep.subr.mxu1 %v9786_v28  ;;  %13001 = vmatmul.mubr.msk.f32.vlgmr.msra.gmra.mxu0 %vm889_vm2, %v14032_v54  ;;  %v4844_v49 = vadd.f32 %v4836_v42, %v14445_v10  ;;  %v5397_v6 = vpop.f32.mrf.mxu0  ;;  %v14481_v17 = vadd.f32 %v5069_v14, %v4843_v44  ;;  %v10491_v10 = vld [vmem:[#allocation5 + $0xf88] sm:$0xff]  ;;  %v10729_v14 = vld [vmem:[#allocation5 + $0x1000] sm:$0xff]  ;;  %v10489_v44 = vld [vmem:[#allocation5 + $0xf78] sm:$0xff]  ;;  %v14531_v42 = vrot.slane %v14032_v54, 3 }
 0x392   : > { %10529 = vmatprep.subr.mxu0 %v10493_v59  ;;  %9969 = vmatpush1.msra.mxu1 %v9785_v31  ;;  %v10494_v28 = vld [vmem:[#allocation5 + $0xfa0] sm:$0xff] }
 0x393   : > { %10002 = vmatprep.mubr.f32.mxu1 %v13468_v0  ;;  %10530 = vmatpush1.msra.mxu0 %v10492_v48  ;;  %v5399_v12 = vpop.f32.mrf.mxu0  ;;  %v14484_v63 = vadd.f32 %v5071_v1, %v4844_v49  ;;  %v10724_v1 = vld [vmem:[#allocation5 + $0xfd8] sm:$0xff]  ;;  %v10488_v49 = vld [vmem:[#allocation5 + $0xf70] sm:$0xff] }
 0x394   : > { %12996 = vmatmul.mubr.msk.f32.vlgmr.msra.gmra.mxu1 %vm889_vm2, %v14435_v56  ;;  %10130 = vmatprep.subr.mxu1 %v10025_v32  ;;  %v4998_v5 = vpop.f32.mrf.mxu1  ;;  %v10258_v56 = vld [vmem:[#allocation5 + $0xf38] sm:$0xff] }
 0x395   : > { %10531 = vmatprep.subr.mxu0 %v10487_v47  ;;  %10131 = vmatpush1.msra.mxu1 %v10024_v57  ;;  %v5076_v38 = vadd.f32 %v4998_v5, %v14457_v18  ;;  %v10967_v32 = vld [vmem:[#allocation5 + $0x1078] sm:$0xff]  ;;  %v10727_v5 = vld [vmem:[#allocation5 + $0xff0] sm:$0xff] }
 0x396   : > { %10532 = vmatpush1.msra.mxu0 %v10486_v13  ;;  %10565 = vmatprep.mubr.f32.mxu0 %v13468_v0  ;;  %v5000_v2 = vpop.f32.mrf.mxu1  ;;  %v10728_v57 = vld [vmem:[#allocation5 + $0xff8] sm:$0xff] }
 0x397   : > { %10132 = vmatprep.subr.mxu1 %v10019_v27  ;;  %13003 = vmatmul.mubr.msk.f32.vlgmr.msra.gmra.mxu0 %vm889_vm2, %v14489_v53  ;;  %v5077_v3 = vadd.f32 %v5000_v2, %v14460_v4  ;;  %v5539_v50 = vpop.f32.mrf.mxu0  ;;  %v14496_v26 = vadd.f32 %v5233_v8, %v5076_v38  ;;  %v10261_v4 = vld [vmem:[#allocation5 + $0xf50] sm:$0xff]  ;;  %v10961_v27 = vld [vmem:[#allocation5 + $0x1048] sm:$0xff] }
 0x398   : > { %10671 = vmatprep.subr.mxu0 %v10497_v45  ;;  %10133 = vmatpush1.msra.mxu1 %v10018_v35  ;;  %v10962_v8 = vld [vmem:[#allocation5 + $0x1050] sm:$0xff]  ;;  %v10960_v45 = vld [vmem:[#allocation5 + $0x1040] sm:$0xff] }
 0x399   : > { %10166 = vmatprep.mubr.f32.mxu1 %v13468_v0  ;;  %10672 = vmatpush1.msra.mxu0 %v10496_v62  ;;  %v5541_v19 = vpop.f32.mrf.mxu0  ;;  %v14499_v51 = vadd.f32 %v5235_v15, %v5077_v3  ;;  %v10722_v62 = vld [vmem:[#allocation5 + $0xfc8] sm:$0xff]  ;;  %v10721_v3 = vld [vmem:[#allocation5 + $0xfc0] sm:$0xff] }
 0x39a   : > { %12998 = vmatmul.mubr.msk.f32.vlgmr.msra.gmra.mxu1 %vm889_vm2, %v14450_v16  ;;  %10294 = vmatprep.subr.mxu1 %v10258_v56  ;;  %v5162_v23 = vpop.f32.mrf.mxu1  ;;  %v11200_v56 = vld [vmem:[#allocation5 + $0x10c8] sm:$0xff] }
 0x39b   : > { %10673 = vmatprep.subr.mxu0 %v10491_v10  ;;  %10295 = vmatpush1.msra.mxu1 %v10257_v41  ;;  %v5309_v37 = vadd.f32 %v5162_v23, %v14469_v52  ;;  %v10732_v41 = vld [vmem:[#allocation5 + $0x1018] sm:$0xff]  ;;  %v11193_v23 = vld [vmem:[#allocation5 + $0x1090] sm:$0xff] }
 0x39c   : > { %10674 = vmatpush1.msra.mxu0 %v10490_v33  ;;  %10707 = vmatprep.mubr.f32.mxu0 %v13468_v0  ;;  %v5164_v18 = vpop.f32.mrf.mxu1 }
 0x39d   : > { %10296 = vmatprep.subr.mxu1 %v10252_v9  ;;  %13005 = vmatmul.mubr.msk.f32.vlgmr.msra.gmra.mxu0 %vm889_vm2, %v14489_v53  ;;  %v5310_v16 = vadd.f32 %v5164_v18, %v14472_v39  ;;  %v5703_v21 = vpop.f32.mrf.mxu0  ;;  %v14508_v60 = vadd.f32 %v5397_v6, %v5309_v37  ;;  %v10957_v39 = vld [vmem:[#allocation5 + $0x1028] sm:$0xff]  ;;  %v10731_v9 = vld [vmem:[#allocation5 + $0x1010] sm:$0xff]  ;;  %v14558_v18 = vrot.slane %v14032_v54, 4 }
 0x39e   : > { %10835 = vmatprep.subr.mxu0 %v10730_v7  ;;  %10297 = vmatpush1.msra.mxu1 %v10251_v58  ;;  %v10726_v37 = vld [vmem:[#allocation5 + $0xfe8] sm:$0xff] }
 0x39f   : > { %10330 = vmatprep.mubr.f32.mxu1 %v13468_v0  ;;  %10836 = vmatpush1.msra.mxu0 %v10729_v14  ;;  %v5705_v24 = vpop.f32.mrf.mxu0  ;;  %v14511_v46 = vadd.f32 %v5399_v12, %v5310_v16  ;;  %v10725_v16 = vld [vmem:[#allocation5 + $0xfe0] sm:$0xff] }
 0x3a0   : > { %13000 = vmatmul.mubr.msk.f32.vlgmr.msra.gmra.mxu1 %vm889_vm2, %v14032_v54  ;;  %10436 = vmatprep.subr.mxu1 %v10262_v61  ;;  %v5304_v29 = vpop.f32.mrf.mxu1  ;;  %v11433_v61 = vld [vmem:[#allocation5 + $0x1118] sm:$0xff] }
 0x3a1   : > { %10837 = vmatprep.subr.mxu0 %v10724_v1  ;;  %10437 = vmatpush1.msra.mxu1 %v10261_v4  ;;  %v5313_v22 = vadd.f32 %v5304_v29, %v14481_v17  ;;  %v10966_v17 = vld [vmem:[#allocation5 + $0x1070] sm:$0xff]  ;;  %v10965_v4 = vld [vmem:[#allocation5 + $0x1068] sm:$0xff]  ;;  %v10964_v29 = vld [vmem:[#allocation5 + $0x1060] sm:$0xff] }
 0x3a2   : > { %10838 = vmatpush1.msra.mxu0 %v10723_v11  ;;  %10871 = vmatprep.mubr.f32.mxu0 %v13468_v0  ;;  %v5306_v52 = vpop.f32.mrf.mxu1 }
 0x3a3   : > { %10438 = vmatprep.subr.mxu1 %v10256_v30  ;;  %13007 = vmatmul.mubr.msk.f32.vlgmr.msra.gmra.mxu0 %vm889_vm2, %v14516_v36  ;;  %v5314_v20 = vadd.f32 %v5306_v52, %v14484_v63  ;;  %v5867_v43 = vpop.f32.mrf.mxu0  ;;  %v14523_v15 = vadd.f32 %v5539_v50, %v5313_v22  ;;  %v11427_v30 = vld [vmem:[#allocation5 + $0x10e8] sm:$0xff] }
 0x3a4   : > { %10999 = vmatprep.subr.mxu0 %v10963_v55  ;;  %10439 = vmatpush1.msra.mxu1 %v10255_v25  ;;  %v11426_v55 = vld [vmem:[#allocation5 + $0x10e0] sm:$0xff] }
 0x3a5   : > { %10472 = vmatprep.mubr.f32.mxu1 %v13468_v0  ;;  %11000 = vmatpush1.msra.mxu0 %v10962_v8  ;;  %v5869_v59 = vpop.f32.mrf.mxu0  ;;  %v14526_v31 = vadd.f32 %v5541_v19, %v5314_v20  ;;  %v10959_v8 = vld [vmem:[#allocation5 + $0x1038] sm:$0xff] }
 0x3a6   : > { %13002 = vmatmul.mubr.msk.f32.vlgmr.msra.gmra.mxu1 %vm889_vm2, %v14032_v54  ;;  %10600 = vmatprep.subr.mxu1 %v10495_v34  ;;  %v5468_v48 = vpop.f32.mrf.mxu1  ;;  %v14573_v34 = vrot.slane %v14032_v54, 5  ;;  %v11437_v20 = vld [vmem:[#allocation5 + $0x1138] sm:$0xff] }
 0x3a7   : > { %11001 = vmatprep.subr.mxu0 %v10957_v39  ;;  %10601 = vmatpush1.msra.mxu1 %v10494_v28  ;;  %v5546_v6 = vadd.f32 %v5468_v48, %v14496_v26  ;;  %v11199_v26 = vld [vmem:[#allocation5 + $0x10c0] sm:$0xff]  ;;  %v11436_v39 = vld [vmem:[#allocation5 + $0x1130] sm:$0xff] }
 0x3a8   : > { %11002 = vmatpush1.msra.mxu0 %v10956_v40  ;;  %11035 = vmatprep.mubr.f32.mxu0 %v13468_v0  ;;  %v5470_v47 = vpop.f32.mrf.mxu1  ;;  %v11197_v48 = vld [vmem:[#allocation5 + $0x10b0] sm:$0xff] }
 0x3a9   : > { %10602 = vmatprep.subr.mxu1 %v10489_v44  ;;  %13009 = vmatmul.mubr.msk.f32.vlgmr.msra.gmra.mxu0 %vm889_vm2, %v14531_v42  ;;  %v5547_v13 = vadd.f32 %v5470_v47, %v14499_v51  ;;  %v6009_v12 = vpop.f32.mrf.mxu0  ;;  %v14538_v63 = vadd.f32 %v5703_v21, %v5546_v6  ;;  %v11194_v51 = vld [vmem:[#allocation5 + $0x1098] sm:$0xff]  ;;  %v11431_v44 = vld [vmem:[#allocation5 + $0x1108] sm:$0xff] }
 0x3aa   : > { %11141 = vmatprep.subr.mxu0 %v10967_v32  ;;  %10603 = vmatpush1.msra.mxu1 %v10488_v49  ;;  %v11430_v32 = vld [vmem:[#allocation5 + $0x1100] sm:$0xff] }
 0x3ab   : > { %10636 = vmatprep.mubr.f32.mxu1 %v13468_v0  ;;  %11142 = vmatpush1.msra.mxu0 %v10966_v17  ;;  %v6011_v35 = vpop.f32.mrf.mxu0  ;;  %v14541_v38 = vadd.f32 %v5705_v24, %v5547_v13  ;;  %v11192_v17 = vld [vmem:[#allocation5 + $0x1088] sm:$0xff]  ;;  %v11191_v13 = vld [vmem:[#allocation5 + $0x1080] sm:$0xff] }
 0x3ac   : > { %13004 = vmatmul.mubr.msk.f32.vlgmr.msra.gmra.mxu1 %vm889_vm2, %v14489_v53  ;;  %10764 = vmatprep.subr.mxu1 %v10728_v57  ;;  %v5632_v2 = vpop.f32.mrf.mxu1  ;;  %v11670_v57 = vld [vmem:[#allocation5 + $0x1188] sm:$0xff] }
 0x3ad   : > { %11143 = vmatprep.subr.mxu0 %v10961_v27  ;;  %10765 = vmatpush1.msra.mxu1 %v10727_v5  ;;  %v5779_v50 = vadd.f32 %v5632_v2, %v14508_v60  ;;  %v11432_v60 = vld [vmem:[#allocation5 + $0x1110] sm:$0xff]  ;;  %v11202_v5 = vld [vmem:[#allocation5 + $0x10d8] sm:$0xff] }
 0x3ae   : > { %11144 = vmatpush1.msra.mxu0 %v10960_v45  ;;  %11177 = vmatprep.mubr.f32.mxu0 %v13468_v0  ;;  %v5634_v10 = vpop.f32.mrf.mxu1  ;;  %v11663_v2 = vld [vmem:[#allocation5 + $0x1150] sm:$0xff] }
 0x3af   : > { %10766 = vmatprep.subr.mxu1 %v10722_v62  ;;  %13011 = vmatmul.mubr.msk.f32.vlgmr.msra.gmra.mxu0 %vm889_vm2, %v14531_v42  ;;  %v5780_v53 = vadd.f32 %v5634_v10, %v14511_v46  ;;  %v6173_v33 = vpop.f32.mrf.mxu0  ;;  %v14550_v19 = vadd.f32 %v5867_v43, %v5779_v50  ;;  %v10958_v43 = vld [vmem:[#allocation5 + $0x1030] sm:$0xff]  ;;  %v11196_v50 = vld [vmem:[#allocation5 + $0x10a8] sm:$0xff]  ;;  %v14600_v10 = vrot.slane %v14032_v54, 6 }
 0x3b0   : > { %11305 = vmatprep.subr.mxu0 %v11200_v56  ;;  %10767 = vmatpush1.msra.mxu1 %v10721_v3  ;;  %v11201_v62 = vld [vmem:[#allocation5 + $0x10d0] sm:$0xff] }
 0x3b1   : > { %10800 = vmatprep.mubr.f32.mxu1 %v13468_v0  ;;  %11306 = vmatpush1.msra.mxu0 %v11199_v26  ;;  %v6175_v7 = vpop.f32.mrf.mxu0  ;;  %v14553_v58 = vadd.f32 %v5869_v59, %v5780_v53  ;;  %v11195_v53 = vld [vmem:[#allocation5 + $0x10a0] sm:$0xff] }
 0x3b2   : > { %13006 = vmatmul.mubr.msk.f32.vlgmr.msra.gmra.mxu1 %vm889_vm2, %v14516_v36  ;;  %10906 = vmatprep.subr.mxu1 %v10732_v41  ;;  %v5774_v14 = vpop.f32.mrf.mxu1  ;;  %v11903_v41 = vld [vmem:[#allocation5 + $0x11d8] sm:$0xff] }
 0x3b3   : > { %11307 = vmatprep.subr.mxu0 %v11194_v51  ;;  %10907 = vmatpush1.msra.mxu1 %v10731_v9  ;;  %v5783_v21 = vadd.f32 %v5774_v14, %v14523_v15  ;;  %v11435_v9 = vld [vmem:[#allocation5 + $0x1128] sm:$0xff]  ;;  %v11434_v14 = vld [vmem:[#allocation5 + $0x1120] sm:$0xff] }
 0x3b4   : > { %11308 = vmatpush1.msra.mxu0 %v11193_v23  ;;  %11341 = vmatprep.mubr.f32.mxu0 %v13468_v0  ;;  %v5776_v1 = vpop.f32.mrf.mxu1 }
 0x3b5   : > { %10908 = vmatprep.subr.mxu1 %v10726_v37  ;;  %13013 = vmatmul.mubr.msk.f32.vlgmr.msra.gmra.mxu0 %vm889_vm2, %v14558_v18  ;;  %v5784_v11 = vadd.f32 %v5776_v1, %v14526_v31  ;;  %v6337_v24 = vpop.f32.mrf.mxu0  ;;  %v14565_v46 = vadd.f32 %v6009_v12, %v5783_v21  ;;  %v11897_v37 = vld [vmem:[#allocation5 + $0x11a8] sm:$0xff] }
 0x3b6   : > { %11469 = vmatprep.subr.mxu0 %v11433_v61  ;;  %10909 = vmatpush1.msra.mxu1 %v10725_v16  ;;  %v11896_v61 = vld [vmem:[#allocation5 + $0x11a0] sm:$0xff] }
 0x3b7   : > { %10942 = vmatprep.mubr.f32.mxu1 %v13468_v0  ;;  %11470 = vmatpush1.msra.mxu0 %v11432_v60  ;;  %v6339_v25 = vpop.f32.mrf.mxu0  ;;  %v14568_v22 = vadd.f32 %v6011_v35, %v5784_v11  ;;  %v11429_v60 = vld [vmem:[#allocation5 + $0x10f8] sm:$0xff] }
 0x3b8   : > { %13008 = vmatmul.mubr.msk.f32.vlgmr.msra.gmra.mxu1 %vm889_vm2, %v14516_v36  ;;  %11070 = vmatprep.subr.mxu1 %v10965_v4  ;;  %v5938_v52 = vpop.f32.mrf.mxu1  ;;  %v11198_v36 = vld [vmem:[#allocation5 + $0x10b8] sm:$0xff]  ;;  %v14615_v4 = vrot.slane %v14032_v54, 7  ;;  %v11901_v54 = vld [vmem:[#allocation5 + $0x11c8] sm:$0xff] }
 0x3b9   : > { %11471 = vmatprep.subr.mxu0 %v11427_v30  ;;  %11071 = vmatpush1.msra.mxu1 %v10964_v29  ;;  %v6016_v15 = vadd.f32 %v5938_v52, %v14538_v63  ;;  %v11669_v63 = vld [vmem:[#allocation5 + $0x1180] sm:$0xff]  ;;  %v11907_v11 = vld [vmem:[#allocation5 + $0x11f8] sm:$0xff]  ;;  %v11906_v30 = vld [vmem:[#allocation5 + $0x11f0] sm:$0xff] }
 0x3ba   : > { %11472 = vmatpush1.msra.mxu0 %v11426_v55  ;;  %11505 = vmatprep.mubr.f32.mxu0 %v13468_v0  ;;  %v5940_v28 = vpop.f32.mrf.mxu1  ;;  %v11900_v52 = vld [vmem:[#allocation5 + $0x11c0] sm:$0xff] }
 0x3bb   : > { %11072 = vmatprep.subr.mxu1 %v10959_v8  ;;  %13015 = vmatmul.mubr.msk.f32.vlgmr.msra.gmra.mxu0 %vm889_vm2, %v14573_v34  ;;  %v6017_v40 = vadd.f32 %v5940_v28, %v14541_v38  ;;  %v6479_v59 = vpop.f32.mrf.mxu0  ;;  %v14580_v31 = vadd.f32 %v6173_v33, %v6016_v15  ;;  %v11664_v38 = vld [vmem:[#allocation5 + $0x1158] sm:$0xff]  ;;  %v11667_v8 = vld [vmem:[#allocation5 + $0x1170] sm:$0xff]  ;;  %v11662_v15 = vld [vmem:[#allocation5 + $0x1148] sm:$0xff] }
 0x3bc   : > { %11611 = vmatprep.subr.mxu0 %v11437_v20  ;;  %11073 = vmatpush1.msra.mxu1 %v10958_v43  ;;  %v11661_v28 = vld [vmem:[#allocation5 + $0x1140] sm:$0xff] }
 0x3bd   : > { %11106 = vmatprep.mubr.f32.mxu1 %v13468_v0  ;;  %11612 = vmatpush1.msra.mxu0 %v11436_v39  ;;  %v6481_v49 = vpop.f32.mrf.mxu0  ;;  %v14583_v6 = vadd.f32 %v6175_v7, %v6017_v40  ;;  %v11672_v40 = vld [vmem:[#allocation5 + $0x1198] sm:$0xff] }
 0x3be   : > { %13010 = vmatmul.mubr.msk.f32.vlgmr.msra.gmra.mxu1 %vm889_vm2, %v14531_v42  ;;  %11234 = vmatprep.subr.mxu1 %v11198_v36  ;;  %v6102_v47 = vpop.f32.mrf.mxu1 }
 0x3bf   : > { %11613 = vmatprep.subr.mxu0 %v11431_v44  ;;  %11235 = vmatpush1.msra.mxu1 %v11197_v48  ;;  %v6249_v12 = vadd.f32 %v6102_v47, %v14550_v19  ;;  %v11902_v19 = vld [vmem:[#allocation5 + $0x11d0] sm:$0xff] }
 0x3c0   : > { %11614 = vmatpush1.msra.mxu0 %v11430_v32  ;;  %11647 = vmatprep.mubr.f32.mxu0 %v13468_v0  ;;  %v6104_v27 = vpop.f32.mrf.mxu1  ;;  %v11666_v32 = vld [vmem:[#allocation5 + $0x1168] sm:$0xff] }
 0x3c1   : > { %11236 = vmatprep.subr.mxu1 %v11192_v17  ;;  %13017 = vmatmul.mubr.msk.f32.vlgmr.msra.gmra.mxu0 %vm889_vm2, %v14573_v34  ;;  %v6250_v42 = vadd.f32 %v6104_v27, %v14553_v58  ;;  %v6643_v45 = vpop.f32.mrf.mxu0  ;;  %v14592_v35 = vadd.f32 %v6337_v24, %v6249_v12  ;;  %v11428_v24 = vld [vmem:[#allocation5 + $0x10f0] sm:$0xff] }
 0x3c2   : > { %11775 = vmatprep.subr.mxu0 %v11670_v57  ;;  %11237 = vmatpush1.msra.mxu1 %v11191_v13  ;;  %v12268_v57 = vld [vmem:[#allocation8 + $0x2f0] sm:$0xff]  ;;  %v11905_v13 = vld [vmem:[#allocation5 + $0x11e8] sm:$0xff] }
 0x3c3   : > { %11270 = vmatprep.mubr.f32.mxu1 %v13468_v0  ;;  %11776 = vmatpush1.msra.mxu0 %v11669_v63  ;;  %v6645_v56 = vpop.f32.mrf.mxu0  ;;  %v14595_v3 = vadd.f32 %v6339_v25, %v6250_v42  ;;  %v11904_v63 = vld [vmem:[#allocation5 + $0x11e0] sm:$0xff] }
 0x3c4   : > { %13012 = vmatmul.mubr.msk.f32.vlgmr.msra.gmra.mxu1 %vm889_vm2, %v14558_v18  ;;  %11376 = vmatprep.subr.mxu1 %v11202_v5  ;;  %v6244_v26 = vpop.f32.mrf.mxu1  ;;  %v11899_v5 = vld [vmem:[#allocation5 + $0x11b8] sm:$0xff] }
 0x3c5   : > { %11777 = vmatprep.subr.mxu0 %v11664_v38  ;;  %11377 = vmatpush1.msra.mxu1 %v11201_v62  ;;  %v6253_v33 = vadd.f32 %v6244_v26, %v14565_v46 }
 0x3c6   : > { %11778 = vmatpush1.msra.mxu0 %v11663_v2  ;;  %11811 = vmatprep.mubr.f32.mxu0 %v13468_v0  ;;  %v6246_v51 = vpop.f32.mrf.mxu1 }
 0x3c7   : > { %11378 = vmatprep.subr.mxu1 %v11196_v50  ;;  %13019 = vmatmul.mubr.msk.f32.vlgmr.msra.gmra.mxu0 %vm889_vm2, %v14600_v10  ;;  %v6254_v23 = vadd.f32 %v6246_v51, %v14568_v22  ;;  %v6807_v7 = vpop.f32.mrf.mxu0  ;;  %v14607_v58 = vadd.f32 %v6479_v59, %v6253_v33  ;;  %v12203_v33 = vld [vmem:[#allocation8 + $0xe8] sm:$0xff] }
 0x3c8   : > { %11939 = vmatprep.subr.mxu0 %v11903_v41  ;;  %11379 = vmatpush1.msra.mxu1 %v11195_v53  ;;  %v12204_v41 = vld [vmem:[#allocation8 + $0xf0] sm:$0xff]  ;;  %v12265_v53 = vld [vmem:[#allocation8 + $0x2d8] sm:$0xff] }
 0x3c9   : > { %11412 = vmatprep.mubr.f32.mxu1 %v13468_v0  ;;  %11940 = vmatpush1.msra.mxu0 %v11902_v19  ;;  %v6809_v16 = vpop.f32.mrf.mxu0  ;;  %v14610_v21 = vadd.f32 %v6481_v49, %v6254_v23  ;;  %v12269_v49 = vld [vmem:[#allocation8 + $0x2f8] sm:$0xff]  ;;  %v12264_v19 = vld [vmem:[#allocation8 + $0x2d0] sm:$0xff] }
 0x3ca   : > { %13014 = vmatmul.mubr.msk.f32.vlgmr.msra.gmra.mxu1 %vm889_vm2, %v14558_v18  ;;  %11540 = vmatprep.subr.mxu1 %v11435_v9  ;;  %v6408_v1 = vpop.f32.mrf.mxu1  ;;  %v11668_v18 = vld [vmem:[#allocation5 + $0x1178] sm:$0xff]  ;;  %v12263_v9 = vld [vmem:[#allocation8 + $0x2c8] sm:$0xff] }
 0x3cb   : > { %11941 = vmatprep.subr.mxu0 %v11897_v37  ;;  %11541 = vmatpush1.msra.mxu1 %v11434_v14  ;;  %v6486_v46 = vadd.f32 %v6408_v1, %v14580_v31  ;;  %v11671_v31 = vld [vmem:[#allocation5 + $0x1190] sm:$0xff] }
 0x3cc   : > { %11942 = vmatpush1.msra.mxu0 %v11896_v61  ;;  %11975 = vmatprep.mubr.f32.mxu0 %v13468_v0  ;;  %v6410_v29 = vpop.f32.mrf.mxu1  ;;  %v12260_v1 = vld [vmem:[#allocation8 + $0x2b0] sm:$0xff] }
 0x3cd   : > { %11542 = vmatprep.subr.mxu1 %v11429_v60  ;;  %13021 = vmatmul.mubr.msk.f32.vlgmr.msra.gmra.mxu0 %vm889_vm2, %v14615_v4  ;;  %v6487_v55 = vadd.f32 %v6410_v29, %v14583_v6  ;;  %v6949_v25 = vpop.f32.mrf.mxu0  ;;  %v14622_v22 = vadd.f32 %v6643_v45, %v6486_v46  ;;  %v11665_v6 = vld [vmem:[#allocation5 + $0x1160] sm:$0xff]  ;;  %v12267_v45 = vld [vmem:[#allocation8 + $0x2e8] sm:$0xff] }
 0x3ce   : > { %12081 = vmatprep.subr.mxu0 %v11907_v11  ;;  %11543 = vmatpush1.msra.mxu1 %v11428_v24  ;;  %v12199_v60 = vld [vmem:[#allocation8 + $0xc8] sm:$0xff]  ;;  %v12198_v24 = vld [vmem:[#allocation8 + $0xc0] sm:$0xff]  ;;  %v12197_v29 = vld [vmem:[#allocation8 + $0xb8] sm:$0xff] }
 0x3cf   : > { %11576 = vmatprep.mubr.f32.mxu1 %v13468_v0  ;;  %12082 = vmatpush1.msra.mxu0 %v11906_v30  ;;  %v6951_v20 = vpop.f32.mrf.mxu0  ;;  %v14625_v43 = vadd.f32 %v6645_v56, %v6487_v55  ;;  %v12266_v56 = vld [vmem:[#allocation8 + $0x2e0] sm:$0xff]  ;;  %v12259_v46 = vld [vmem:[#allocation8 + $0x2a8] sm:$0xff] }
 0x3d0   : > { %13016 = vmatmul.mubr.msk.f32.vlgmr.msra.gmra.mxu1 %vm889_vm2, %v14573_v34  ;;  %11704 = vmatprep.subr.mxu1 %v11668_v18  ;;  %v6572_v39 = vpop.f32.mrf.mxu1  ;;  %v12258_v18 = vld [vmem:[#allocation8 + $0x2a0] sm:$0xff] }
 0x3d1   : > { %12083 = vmatprep.subr.mxu0 %v11901_v54  ;;  %11705 = vmatpush1.msra.mxu1 %v11667_v8  ;;  %v6719_v36 = vadd.f32 %v6572_v39, %v14592_v35  ;;  %v11898_v35 = vld [vmem:[#allocation5 + $0x11b0] sm:$0xff]  ;;  %v12194_v39 = vld [vmem:[#allocation8 + $0xa0] sm:$0xff] }
 0x3d2   : > { %12084 = vmatpush1.msra.mxu0 %v11900_v52  ;;  %12117 = vmatprep.mubr.f32.mxu0 %v13468_v0  ;;  %v6574_v59 = vpop.f32.mrf.mxu1  ;;  %v12195_v8 = vld [vmem:[#allocation8 + $0xa8] sm:$0xff]  ;;  %v12256_v52 = vld [vmem:[#allocation8 + $0x290] sm:$0xff] }
 0x3d3   : > { %11706 = vmatprep.subr.mxu1 %v11662_v15  ;;  %13023 = vmatmul.mubr.msk.f32.vlgmr.msra.gmra.mxu0 %vm889_vm2, %v14615_v4  ;;  %v6720_v34 = vadd.f32 %v6574_v59, %v14595_v3  ;;  %v7113_v44 = vpop.f32.mrf.mxu0  ;;  %v14634_v48 = vadd.f32 %v6807_v7, %v6719_v36  ;;  %v12205_v3 = vld [vmem:[#allocation8 + $0xf8] sm:$0xff]  ;;  %v12192_v59 = vld [vmem:[#allocation8 + $0x90] sm:$0xff] }
 0x3d4   : > { %11707 = vmatpush1.msra.mxu1 %v11661_v28  ;;  %11740 = vmatprep.mubr.f32.mxu1 %v13468_v0  ;;  %v12201_v7 = vld [vmem:[#allocation8 + $0xd8] sm:$0xff] }
 0x3d5   : > { %13018 = vmatmul.mubr.msk.f32.vlgmr.msra.gmra.mxu1 %vm889_vm2, %v14600_v10  ;;  %11846 = vmatprep.subr.mxu1 %v11672_v40  ;;  %v7115_v17 = vpop.f32.mrf.mxu0  ;;  %v14639_v47 = vadd.f32 %v6809_v16, %v6720_v34  ;;  %v12200_v16 = vld [vmem:[#allocation8 + $0xd0] sm:$0xff]  ;;  %v12193_v28 = vld [vmem:[#allocation8 + $0x98] sm:$0xff] }
 0x3d6   : > { %11847 = vmatpush1.msra.mxu1 %v11671_v31  ;;  %11882 = vmatprep.mubr.f32.mxu1 %v13468_v0  ;;  %v6714_v12 = vpop.f32.mrf.mxu1  ;;  %v12255_v31 = vld [vmem:[#allocation8 + $0x288] sm:$0xff] }
 0x3d7   : > { %11848 = vmatprep.subr.mxu1 %v11666_v32  ;;  %v6723_v27 = vadd.f32 %v6714_v12, %v14607_v58  ;;  %12449 = vmatprep.subr.mxu0 %v12269_v49  ;;  %v12262_v58 = vld [vmem:[#allocation8 + $0x2c0] sm:$0xff] }
 0x3d8   : > { %11849 = vmatpush1.msra.mxu1 %v11665_v6  ;;  %v6716_v42 = vpop.f32.mrf.mxu1  ;;  %12450 = vmatpush1.msra.mxu0 %v12268_v57  ;;  %v12190_v49 = vld [vmem:[#allocation8 + $0x80] sm:$0xff]  ;;  %v12253_v6 = vld [vmem:[#allocation8 + $0x278] sm:$0xff]  ;;  %v12252_v57 = vld [vmem:[#allocation8 + $0x270] sm:$0xff] }
 0x3d9   : > { %13020 = vmatmul.mubr.msk.f32.vlgmr.msra.gmra.mxu1 %vm889_vm2, %v14600_v10  ;;  %12010 = vmatprep.subr.mxu1 %v11905_v13  ;;  %v6724_v38 = vadd.f32 %v6716_v42, %v14610_v21  ;;  %v7277_v62 = vpop.f32.mrf.mxu0  ;;  %v14646_v2 = vadd.f32 %v6949_v25, %v6723_v27  ;;  %v12261_v21 = vld [vmem:[#allocation8 + $0x2b8] sm:$0xff]  ;;  %v12196_v25 = vld [vmem:[#allocation8 + $0xb0] sm:$0xff] }
 0x3da   : > { %12011 = vmatpush1.msra.mxu1 %v11904_v63  ;;  %12046 = vmatprep.mubr.f32.mxu1 %v13468_v0  ;;  %v12202_v0 = vld [vmem:[#allocation8 + $0xe0] sm:$0xff]  ;;  %v12188_v27 = vld [vmem:[#allocation8 + $0x70] sm:$0xff] }
 0x3db   : > { %12012 = vmatprep.subr.mxu1 %v11899_v5  ;;  %v7279_v50 = vpop.f32.mrf.mxu0  ;;  %v14649_v26 = vadd.f32 %v6951_v20, %v6724_v38  ;;  %12451 = vmatprep.subr.mxu0 %v12267_v45  ;;  %v12187_v5 = vld [vmem:[#allocation8 + $0x68] sm:$0xff] }
 0x3dc   : > { %12013 = vmatpush1.msra.mxu1 %v11898_v35  ;;  %v6878_v10 = vpop.f32.mrf.mxu1  ;;  %12452 = vmatpush1.msra.mxu0 %v12266_v56  ;;  %v12186_v35 = vld [vmem:[#allocation8 + $0x60] sm:$0xff]  ;;  %v12251_v38 = vld [vmem:[#allocation8 + $0x268] sm:$0xff] }
 0x3dd   : > { %13022 = vmatmul.mubr.msk.f32.vlgmr.msra.gmra.mxu1 %vm889_vm2, %v14615_v4  ;;  %v6956_v51 = vadd.f32 %v6878_v10, %v14622_v22  ;;  %12378 = vmatprep.subr.mxu1 %v12205_v3  ;;  %v12257_v22 = vld [vmem:[#allocation8 + $0x298] sm:$0xff]  ;;  %v12250_v56 = vld [vmem:[#allocation8 + $0x260] sm:$0xff]  ;;  %v12248_v10 = vld [vmem:[#allocation8 + $0x250] sm:$0xff] }
 0x3de   : > { %v6880_v23 = vpop.f32.mrf.mxu1  ;;  %12379 = vmatpush1.msra.mxu1 %v12204_v41  ;;  %12453 = vmatprep.subr.mxu0 %v12265_v53  ;;  %v12183_v53 = vld [vmem:[#allocation8 + $0x48] sm:$0xff] }
 0x3df   : > { %v6957_v37 = vadd.f32 %v6880_v23, %v14625_v43  ;;  %v14655_v14 = vpop.f32.mrf.mxu0  ;;  %v14657_v61 = vadd.f32 %v7113_v44, %v6956_v51  ;;  %12380 = vmatprep.subr.mxu1 %v12203_v33  ;;  %12454 = vmatpush1.msra.mxu0 %v12264_v19  ;;  %v12191_v44 = vld [vmem:[#allocation8 + $0x88] sm:$0xff] }
 0x3e0   : > { %12381 = vmatpush1.msra.mxu1 %v12202_v0  ;;  %12455 = vmatprep.subr.mxu0 %v12263_v9  ;;  %v12182_v0 = vld [vmem:[#allocation8 + $0x40] sm:$0xff]  ;;  %v12181_v9 = vld [vmem:[#allocation8 + $0x38] sm:$0xff] }
 0x3e1   : > { %v7421_v4 = vpop.f32.mrf.mxu0  ;;  %v14659_v11 = vadd.f32 %v7115_v17, %v6957_v37  ;;  %12382 = vmatprep.subr.mxu1 %v12201_v7  ;;  %12456 = vmatpush1.msra.mxu0 %v12262_v58  ;;  %v12180_v58 = vld [vmem:[#allocation8 + $0x30] sm:$0xff]  ;;  %v12247_v37 = vld [vmem:[#allocation8 + $0x248] sm:$0xff] }
 0x3e2   : > { %v7042_v30 = vpop.f32.mrf.mxu1  ;;  %12383 = vmatpush1.msra.mxu1 %v12200_v16  ;;  %12457 = vmatprep.subr.mxu0 %v12261_v21  ;;  %v12246_v16 = vld [vmem:[#allocation8 + $0x240] sm:$0xff] }
 0x3e3   : > { %v7189_v55 = vadd.f32 %v7042_v30, %v14634_v48  ;;  %12384 = vmatprep.subr.mxu1 %v12199_v60  ;;  %12458 = vmatpush1.msra.mxu0 %v12260_v1  ;;  %v12254_v48 = vld [vmem:[#allocation8 + $0x280] sm:$0xff]  ;;  %v12245_v1 = vld [vmem:[#allocation8 + $0x238] sm:$0xff] }
 0x3e4   : > { %v7044_v54 = vpop.f32.mrf.mxu1  ;;  %12385 = vmatpush1.msra.mxu1 %v12198_v24  ;;  %12459 = vmatprep.subr.mxu0 %v12259_v46  ;;  %v12178_v60 = vld [vmem:[#allocation8 + $0x20] sm:$0xff]  ;;  %v12244_v24 = vld [vmem:[#allocation8 + $0x230] sm:$0xff] }
 0x3e5   : > { %v7190_v20 = vadd.f32 %v7044_v54, %v14639_v47  ;;  %v7583_v43 = vpop.f32.mrf.mxu0  ;;  %v14663_v15 = vadd.f32 %v7277_v62, %v7189_v55  ;;  %12386 = vmatprep.subr.mxu1 %v12197_v29  ;;  %12460 = vmatpush1.msra.mxu0 %v12258_v18  ;;  %v12189_v47 = vld [vmem:[#allocation8 + $0x78] sm:$0xff]  ;;  %v12176_v18 = vld [vmem:[#allocation8 + $0x10] sm:$0xff]  ;;  %v12175_v55 = vld [vmem:[#allocation8 + $0x8] sm:$0xff] }
 0x3e6   : > { %12387 = vmatpush1.msra.mxu1 %v12196_v25  ;;  %12461 = vmatprep.subr.mxu0 %v12257_v22  ;;  %v12174_v54 = vld [vmem:[#allocation8] sm:$0xff] }
 0x3e7   : > { %v7585_v36 = vpop.f32.mrf.mxu0  ;;  %v14665_v40 = vadd.f32 %v7279_v50, %v7190_v20  ;;  %12388 = vmatprep.subr.mxu1 %v12195_v8  ;;  %12462 = vmatpush1.msra.mxu0 %v12256_v52  ;;  %v12184_v50 = vld [vmem:[#allocation8 + $0x50] sm:$0xff]  ;;  %v12243_v8 = vld [vmem:[#allocation8 + $0x228] sm:$0xff]  ;;  %v12237_v20 = vld [vmem:[#allocation8 + $0x1f8] sm:$0xff] }
 0x3e8   : > { %v7184_v34 = vpop.f32.mrf.mxu1  ;;  %12389 = vmatpush1.msra.mxu1 %v12194_v39  ;;  %12463 = vmatprep.subr.mxu0 %v12255_v31  ;;  %v12236_v39 = vld [vmem:[#allocation8 + $0x1f0] sm:$0xff] }
 0x3e9   : > { %v7193_v32 = vadd.f32 %v7184_v34, %v14646_v2  ;;  %12390 = vmatprep.subr.mxu1 %v12193_v28  ;;  %12464 = vmatpush1.msra.mxu0 %v12254_v48  ;;  %v12185_v2 = vld [vmem:[#allocation8 + $0x58] sm:$0xff]  ;;  %v12234_v48 = vld [vmem:[#allocation8 + $0x1e0] sm:$0xff] }
 0x3ea   : > { %v7186_v17 = vpop.f32.mrf.mxu1  ;;  %12391 = vmatpush1.msra.mxu1 %v12192_v59  ;;  %12465 = vmatprep.subr.mxu0 %v12253_v6  ;;  %v12241_v28 = vld [vmem:[#allocation8 + $0x218] sm:$0xff]  ;;  %v12240_v59 = vld [vmem:[#allocation8 + $0x210] sm:$0xff] }
 0x3eb   : > { %v7194_v13 = vadd.f32 %v7186_v17, %v14649_v26  ;;  %v7747_v12 = vpop.f32.mrf.mxu0  ;;  %v14670_v63 = vadd.f32 %v14655_v14, %v7193_v32  ;;  %12392 = vmatprep.subr.mxu1 %v12191_v44  ;;  %12466 = vmatpush1.msra.mxu0 %v12252_v57  ;;  %v12249_v26 = vld [vmem:[#allocation8 + $0x258] sm:$0xff]  ;;  %v12232_v17 = vld [vmem:[#allocation8 + $0x1d0] sm:$0xff] }
 0x3ec   : > { %12393 = vmatpush1.msra.mxu1 %v12190_v49  ;;  %12467 = vmatprep.subr.mxu0 %v12251_v38  ;;  %v12233_v32 = vld [vmem:[#allocation8 + $0x1d8] sm:$0xff] }
 0x3ed   : > { %v7749_v42 = vpop.f32.mrf.mxu0  ;;  %v14672_v45 = vadd.f32 %v7421_v4, %v7194_v13  ;;  %12394 = vmatprep.subr.mxu1 %v12189_v47  ;;  %12468 = vmatpush1.msra.mxu0 %v12250_v56  ;;  %v12239_v47 = vld [vmem:[#allocation8 + $0x208] sm:$0xff] }
 0x3ee   : > { %v7348_v62 = vpop.f32.mrf.mxu1  ;;  %12395 = vmatpush1.msra.mxu1 %v12188_v27  ;;  %12469 = vmatprep.subr.mxu0 %v12249_v26  ;;  %v12231_v13 = vld [vmem:[#allocation8 + $0x1c8] sm:$0xff]  ;;  %v12230_v27 = vld [vmem:[#allocation8 + $0x1c0] sm:$0xff] }
 0x3ef   : > { %v7426_v3 = vadd.f32 %v7348_v62, %v14657_v61  ;;  %12396 = vmatprep.subr.mxu1 %v12187_v5  ;;  %12470 = vmatpush1.msra.mxu0 %v12248_v10  ;;  %v12179_v61 = vld [vmem:[#allocation8 + $0x28] sm:$0xff]  ;;  %v12301_v5 = vld [vmem:[#allocation8 + $0x3f8] sm:$0xff]  ;;  %v12298_v10 = vld [vmem:[#allocation8 + $0x3e0] sm:$0xff] }
 0x3f0   : > { %v7350_v41 = vpop.f32.mrf.mxu1  ;;  %12397 = vmatpush1.msra.mxu1 %v12186_v35  ;;  %12471 = vmatprep.subr.mxu0 %v12247_v37  ;;  %v12300_v35 = vld [vmem:[#allocation8 + $0x3f0] sm:$0xff]  ;;  %v12299_v26 = vld [vmem:[#allocation8 + $0x3e8] sm:$0xff] }
 0x3f1   : > { %v7427_v33 = vadd.f32 %v7350_v41, %v14659_v11  ;;  %v7889_v19 = vpop.f32.mrf.mxu0  ;;  %v14676_v51 = vadd.f32 %v7583_v43, %v7426_v3  ;;  %12398 = vmatprep.subr.mxu1 %v12185_v2  ;;  %12472 = vmatpush1.msra.mxu0 %v12246_v16  ;;  %v12177_v11 = vld [vmem:[#allocation8 + $0x18] sm:$0xff]  ;;  %v12242_v43 = vld [vmem:[#allocation8 + $0x220] sm:$0xff]  ;;  %v12227_v41 = vld [vmem:[#allocation8 + $0x1a8] sm:$0xff] }
 0x3f2   : > { %12399 = vmatpush1.msra.mxu1 %v12184_v50  ;;  %12473 = vmatprep.subr.mxu0 %v12245_v1  ;;  %v12228_v50 = vld [vmem:[#allocation8 + $0x1b0] sm:$0xff] }
 0x3f3   : > { %v7891_v23 = vpop.f32.mrf.mxu0  ;;  %v14678_v7 = vadd.f32 %v7585_v36, %v7427_v33  ;;  %12400 = vmatprep.subr.mxu1 %v12183_v53  ;;  %12474 = vmatpush1.msra.mxu0 %v12244_v24  ;;  %v12224_v16 = vld [vmem:[#allocation8 + $0x190] sm:$0xff]  ;;  %v12222_v24 = vld [vmem:[#allocation8 + $0x180] sm:$0xff] }
 0x3f4   : > { %v7512_v14 = vpop.f32.mrf.mxu1  ;;  %12401 = vmatpush1.msra.mxu1 %v12182_v0  ;;  %12475 = vmatprep.subr.mxu0 %v12243_v8  ;;  %v12225_v0 = vld [vmem:[#allocation8 + $0x198] sm:$0xff]  ;;  %v12291_v8 = vld [vmem:[#allocation8 + $0x3a8] sm:$0xff] }
 0x3f5   : > { %v7659_v21 = vadd.f32 %v7512_v14, %v14663_v15  ;;  %12402 = vmatprep.subr.mxu1 %v12181_v9  ;;  %12476 = vmatpush1.msra.mxu0 %v12242_v43  ;;  %v12219_v43 = vld [vmem:[#allocation8 + $0x168] sm:$0xff] }
 0x3f6   : > { %v7514_v4 = vpop.f32.mrf.mxu1  ;;  %12403 = vmatpush1.msra.mxu1 %v12180_v58  ;;  %12477 = vmatprep.subr.mxu0 %v12241_v28  ;;  %v12218_v28 = vld [vmem:[#allocation8 + $0x160] sm:$0xff] }
 0x3f7   : > { %v7660_v46 = vadd.f32 %v7514_v4, %v14665_v40  ;;  %v8053_v30 = vpop.f32.mrf.mxu0  ;;  %v14682_v29 = vadd.f32 %v7747_v12, %v7659_v21  ;;  %12404 = vmatprep.subr.mxu1 %v12179_v61  ;;  %v12235_v40 = vld [vmem:[#allocation8 + $0x1e8] sm:$0xff]  ;;  %12478 = vmatpush1.msra.mxu0 %v12240_v59  ;;  %v12238_v12 = vld [vmem:[#allocation8 + $0x200] sm:$0xff]  ;;  %v12217_v59 = vld [vmem:[#allocation8 + $0x158] sm:$0xff] }
 0x3f8   : > { %12405 = vmatpush1.msra.mxu1 %v12178_v60  ;;  %12479 = vmatprep.subr.mxu0 %v12239_v47  ;;  %v12295_v21 = vld [vmem:[#allocation8 + $0x3c8] sm:$0xff]  ;;  %v12294_v4 = vld [vmem:[#allocation8 + $0x3c0] sm:$0xff] }
 0x3f9   : > { %v8055_v25 = vpop.f32.mrf.mxu0  ;;  %v14684_v22 = vadd.f32 %v7749_v42, %v7660_v46  ;;  %12406 = vmatprep.subr.mxu1 %v12177_v11  ;;  %12480 = vmatpush1.msra.mxu0 %v12238_v12  ;;  %v12223_v60 = vld [vmem:[#allocation8 + $0x188] sm:$0xff]  ;;  %v12293_v46 = vld [vmem:[#allocation8 + $0x3b8] sm:$0xff]  ;;  %v12286_v47 = vld [vmem:[#allocation8 + $0x380] sm:$0xff] }
 0x3fa   : > { %v7654_v52 = vpop.f32.mrf.mxu1  ;;  %12407 = vmatpush1.msra.mxu1 %v12176_v18  ;;  %12481 = vmatprep.subr.mxu0 %v12301_v5  ;;  %v12292_v18 = vld [vmem:[#allocation8 + $0x3b0] sm:$0xff]  ;;  %v12285_v12 = vld [vmem:[#allocation8 + $0x378] sm:$0xff] }
 0x3fb   : > { %v7663_v15 = vadd.f32 %v7654_v52, %v14670_v63  ;;  %12408 = vmatprep.subr.mxu1 %v12175_v55  ;;  %12482 = vmatpush2.msra.mxu0 %v12300_v35  ;;  %v12213_v5 = vld [vmem:[#allocation8 + $0x138] sm:$0xff]  ;;  %v12212_v35 = vld [vmem:[#allocation8 + $0x130] sm:$0xff] }
 0x3fc   : > { %v7656_v36 = vpop.f32.mrf.mxu1  ;;  %12409 = vmatpush1.msra.mxu1 %v12174_v54  ;;  %12483 = vmatprep.subr.mxu0 %v12299_v26  ;;  %v12220_v54 = vld [vmem:[#allocation8 + $0x170] sm:$0xff]  ;;  %v12281_v26 = vld [vmem:[#allocation8 + $0x358] sm:$0xff] }
 0x3fd   : > { %v7664_v31 = vadd.f32 %v7656_v36, %v14672_v45  ;;  %v8217_v34 = vpop.f32.mrf.mxu0  ;;  %v14688_v44 = vadd.f32 %v7889_v19, %v7663_v15  ;;  %12410 = vmatprep.subr.mxu1 %v12237_v20  ;;  %v12229_v45 = vld [vmem:[#allocation8 + $0x1b8] sm:$0xff]  ;;  %12484 = vmatpush2.msra.mxu0 %v12298_v10  ;;  %v12226_v19 = vld [vmem:[#allocation8 + $0x1a0] sm:$0xff]  ;;  %v12280_v10 = vld [vmem:[#allocation8 + $0x350] sm:$0xff] }
 0x3fe   : > { %12411 = vmatpush2.msra.mxu1 %v12236_v39  ;;  %v12290_v15 = vld [vmem:[#allocation8 + $0x3a0] sm:$0xff]  ;;  %v12289_v36 = vld [vmem:[#allocation8 + $0x398] sm:$0xff] }
 0x3ff   : > { %v8219_v49 = vpop.f32.mrf.mxu0  ;;  %v14690_v6 = vadd.f32 %v7891_v23, %v7664_v31  ;;  %12412 = vmatprep.subr.mxu1 %v12235_v40  ;;  %v12296_v23 = vld [vmem:[#allocation8 + $0x3d0] sm:$0xff] }
 0x400   : > { %v7818_v57 = vpop.f32.mrf.mxu1  ;;  %12413 = vmatpush2.msra.mxu1 %v12234_v48  ;;  %v12288_v31 = vld [vmem:[#allocation8 + $0x390] sm:$0xff]  ;;  %v12287_v48 = vld [vmem:[#allocation8 + $0x388] sm:$0xff] }
 0x401   : > { %v7896_v63 = vadd.f32 %v7818_v57, %v14676_v51  ;;  %12414 = vmatprep.subr.mxu1 %v12233_v32  ;;  %v12297_v51 = vld [vmem:[#allocation8 + $0x3d8] sm:$0xff]  ;;  %v12138_v57 = vlaneseq }
 0x402   : > { %v7820_v42 = vpop.f32.mrf.mxu1  ;;  %12415 = vmatpush2.msra.mxu1 %v12232_v17  ;;  %12485 = vmatprep.subr.mxu0 %v12297_v51  ;;  %v12215_v17 = vld [vmem:[#allocation8 + $0x148] sm:$0xff] }
 0x403   : > { %v7897_v38 = vadd.f32 %v7820_v42, %v14678_v7  ;;  %v8359_v62 = vpop.f32.mrf.mxu0  ;;  %v14694_v2 = vadd.f32 %v8053_v30, %v7896_v63  ;;  %12416 = vmatprep.subr.mxu1 %v12231_v13  ;;  %12486 = vmatpush2.msra.mxu0 %v12296_v23  ;;  %v12221_v30 = vld [vmem:[#allocation8 + $0x178] sm:$0xff]  ;;  %v12214_v13 = vld [vmem:[#allocation8 + $0x140] sm:$0xff]  ;;  %v12284_v42 = vld [vmem:[#allocation8 + $0x370] sm:$0xff] }
 0x404   : > { %12417 = vmatpush2.msra.mxu1 %v12230_v27  ;;  %12487 = vmatprep.subr.mxu0 %v12295_v21  ;;  %v12279_v51 = vld [vmem:[#allocation8 + $0x348] sm:$0xff]  ;;  %v12277_v21 = vld [vmem:[#allocation8 + $0x338] sm:$0xff] }
 0x405   : > { %v8361_v56 = vpop.f32.mrf.mxu0  ;;  %v14696_v3 = vadd.f32 %v8055_v25, %v7897_v38  ;;  %12418 = vmatprep.subr.mxu1 %v12229_v45  ;;  %12488 = vmatpush2.msra.mxu0 %v12294_v4  ;;  %v12283_v38 = vld [vmem:[#allocation8 + $0x368] sm:$0xff]  ;;  %v12333_v4 = vld [vmem:[#allocation8 + $0x4f8] sm:$0xff] }
 0x406   : > { %v7982_v53 = vpop.f32.mrf.mxu1  ;;  %12419 = vmatpush2.msra.mxu1 %v12228_v50  ;;  %12489 = vmatprep.subr.mxu0 %v12293_v46  ;;  %v12210_v50 = vld [vmem:[#allocation8 + $0x120] sm:$0xff]  ;;  %v12207_v23 = vld [vmem:[#allocation8 + $0x108] sm:$0xff] }
 0x407   : > { %v8129_v33 = vadd.f32 %v7982_v53, %v14682_v29  ;;  %12420 = vmatprep.subr.mxu1 %v12227_v41  ;;  %12490 = vmatpush2.msra.mxu0 %v12292_v18  ;;  %v12209_v53 = vld [vmem:[#allocation8 + $0x118] sm:$0xff] }
 0x408   : > { %v7984_v9 = vpop.f32.mrf.mxu1  ;;  %12421 = vmatpush2.msra.mxu1 %v12226_v19  ;;  %12491 = vmatprep.subr.mxu0 %v12291_v8  ;;  %v12208_v19 = vld [vmem:[#allocation8 + $0x110] sm:$0xff]  ;;  %v12271_v8 = vld [vmem:[#allocation8 + $0x308] sm:$0xff] }
 0x409   : > { %v8130_v7 = vadd.f32 %v7984_v9, %v14684_v22  ;;  %v8523_v58 = vpop.f32.mrf.mxu0  ;;  %v14700_v37 = vadd.f32 %v8217_v34, %v8129_v33  ;;  %12422 = vmatprep.subr.mxu1 %v12225_v0  ;;  %12492 = vmatpush2.msra.mxu0 %v12290_v15  ;;  %v14735_v9 = vld [vmem:[#allocation7] sm:$0x3f]  ;;  %v12270_v15 = vld [vmem:[#allocation8 + $0x300] sm:$0xff] }
 0x40a   : > { %12423 = vmatpush2.msra.mxu1 %v12224_v16  ;;  %12493 = vmatprep.subr.mxu0 %v12289_v36  ;;  %15065 = vst [vmem:[#allocation15_spill] sm:$0xff] %v14735_v9  ;;  %v12206_v16 = vld [vmem:[#allocation8 + $0x100] sm:$0xff] }
 0x40b   : > { %v8525_v14 = vpop.f32.mrf.mxu0  ;;  %v14702_v61 = vadd.f32 %v8219_v49, %v8130_v7  ;;  %12424 = vmatprep.subr.mxu1 %v12223_v60  ;;  %12494 = vmatpush2.msra.mxu0 %v12288_v31  ;;  %v12278_v7 = vld [vmem:[#allocation8 + $0x340] sm:$0xff] }
 0x40c   : > { %v8124_v1 = vpop.f32.mrf.mxu1  ;;  %12425 = vmatpush2.msra.mxu1 %v12222_v24  ;;  %12495 = vmatprep.subr.mxu0 %v12287_v48  ;;  %v12275_v24 = vld [vmem:[#allocation8 + $0x328] sm:$0xff] }
 0x40d   : > { %v8133_v11 = vadd.f32 %v8124_v1, %v14688_v44  ;;  %12426 = vmatprep.subr.mxu1 %v12221_v30  ;;  %v12216_v44 = vld [vmem:[#allocation8 + $0x150] sm:$0xff]  ;;  %12496 = vmatpush2.msra.mxu0 %v12286_v47 }
 0x40e   : > { %v8126_v29 = vpop.f32.mrf.mxu1  ;;  %12427 = vmatpush2.msra.mxu1 %v12220_v54  ;;  %12497 = vmatprep.subr.mxu0 %v12285_v12  ;;  %v12276_v1 = vld [vmem:[#allocation8 + $0x330] sm:$0xff] }
 0x40f   : > { %v8134_v55 = vadd.f32 %v8126_v29, %v14690_v6  ;;  %v14706_v25 = vpop.f32.mrf.mxu0  ;;  %v14708_v22 = vadd.f32 %v8359_v62, %v8133_v11  ;;  %12428 = vmatprep.subr.mxu1 %v12219_v43  ;;  %12498 = vmatpush2.msra.mxu0 %v12284_v42  ;;  %v12211_v62 = vld [vmem:[#allocation8 + $0x128] sm:$0xff]  ;;  %v12274_v29 = vld [vmem:[#allocation8 + $0x320] sm:$0xff]  ;;  %v12272_v54 = vld [vmem:[#allocation8 + $0x310] sm:$0xff] }
 0x410   : > { %12429 = vmatpush2.msra.mxu1 %v12218_v28  ;;  %12499 = vmatprep.subr.mxu0 %v12283_v38 }
 0x411   : > { %v14710_v52 = vpop.f32.mrf.mxu0  ;;  %v14712_v20 = vadd.f32 %v8361_v56, %v8134_v55  ;;  %12430 = vmatprep.subr.mxu1 %v12217_v59  ;;  %v12273_v55 = vld [vmem:[#allocation8 + $0x318] sm:$0xff] }
 0x412   : > { %v8288_v39 = vpop.f32.mrf.mxu1  ;;  %12431 = vmatpush2.msra.mxu1 %v12216_v44 }
 0x413   : > { %v8366_v40 = vadd.f32 %v8288_v39, %v14694_v2  ;;  %12432 = vmatprep.subr.mxu1 %v12215_v17  ;;  %v12282_v2 = vld [vmem:[#allocation8 + $0x360] sm:$0xff] }
 0x414   : > { %v8290_v34 = vpop.f32.mrf.mxu1  ;;  %12433 = vmatpush2.msra.mxu1 %v12214_v13  ;;  %12500 = vmatpush2.msra.mxu0 %v12282_v2 }
 0x415   : > { %v8367_v32 = vadd.f32 %v8290_v34, %v14696_v3  ;;  %v14716_v49 = vpop.f32.mrf.mxu0  ;;  %v14718_v6 = vadd.f32 %v8523_v58, %v8366_v40  ;;  %12434 = vmatprep.subr.mxu1 %v12213_v5  ;;  %v14728_v3 = vshrl.u32 %v12138_v57, 7  ;;  %12501 = vmatprep.subr.mxu0 %v12281_v26 }
 0x416   : > { %12435 = vmatpush2.msra.mxu1 %v12212_v35  ;;  %12502 = vmatpush2.msra.mxu0 %v12280_v10 }
 0x417   : > { %v14720_v63 = vpop.f32.mrf.mxu0  ;;  %v14722_v27 = vadd.f32 %v8525_v14, %v8367_v32  ;;  %15064 = vst [vmem:[#allocation14_spill] sm:$0xff] %v14728_v3  ;;  %12436 = vmatprep.subr.mxu1 %v12211_v62  ;;  %v12156_v33 = vsub.s32 4, %v14728_v3  ;;  %12503 = vmatprep.subr.mxu0 %v12279_v51 }
 0x418   : > { %v14724_v45 = vpop.f32.mrf.mxu1  ;;  %12437 = vmatpush2.msra.mxu1 %v12210_v50  ;;  %12504 = vmatpush2.msra.mxu0 %v12278_v7 }
 0x419   : > { %12438 = vmatprep.subr.mxu1 %v12209_v53  ;;  %v14738_v14 = vrot.slane %v14735_v9, %v12156_v33  ;;  %12505 = vmatprep.subr.mxu0 %v12277_v21 }
 0x41a   : > { %v14726_v56 = vpop.f32.mrf.mxu1  ;;  %12439 = vmatpush2.msra.mxu1 %v12208_v19  ;;  %12506 = vmatpush2.msra.mxu0 %v12276_v1 }
 0x41b   : > { %v14730_v41 = vpop.f32.mrf.mxu0  ;;  %15066 = vst [vmem:[#allocation16_spill] sm:$0xff] %v14738_v14  ;;  %12440 = vmatprep.subr.mxu1 %v12207_v23  ;;  %12507 = vmatprep.subr.mxu0 %v12275_v24  ;;  %v8600_v9 = vadd.f32 %v14726_v56, %v14702_v61 }
 0x41c   : > { %12441 = vmatpush2.msra.mxu1 %v12206_v16  ;;  %12508 = vmatpush2.msra.mxu0 %v12274_v29 }
 0x41d   : > { %v14733_v0 = vpop.f32.mrf.mxu0  ;;  %12520 = vmatprep.subr.mxu1 %v12333_v4  ;;  %12509 = vmatprep.subr.mxu0 %v12273_v55 }
 0x41e   : > { %v8594_v58 = vpop.f32.mrf.mxu1  ;;  %12510 = vmatpush2.msra.mxu0 %v12272_v54 }
 0x41f   : > { %v8603_v60 = vadd.f32 %v8594_v58, %v14708_v22  ;;  %12511 = vmatprep.subr.mxu0 %v12271_v8 }
 0x420   : > { %v14741_v11 = vpop.f32.mrf.mxu1  ;;  %12512 = vmatpush2.msra.mxu0 %v12270_v15 }
 0x421   : > { %v14743_v46 = vpop.f32.mrf.mxu0  ;;  %v8838_v30 = vadd.f32 %v14716_v49, %v8603_v60 }
 0x423   : > { %v14746_v18 = vpop.f32.mrf.mxu0 }
 0x424   : > { %v14748_v22 = vpop.f32.mrf.mxu1 }
 0x426   : > { %v14750_v43 = vpop.f32.mrf.mxu1 }
 0x427   : > { %v9299_v39 = vpop.f32.mrf.mxu0  ;;  %v8837_v56 = vadd.f32 %v14750_v43, %v14722_v27 }
 0x429   : > { %v14752_v28 = vpop.f32.mrf.mxu0 }
 0x42a   : > { %v8922_v36 = vpop.f32.mrf.mxu1 }
 0x42c   : > { %v14754_v40 = vpop.f32.mrf.mxu1 }
 0x42d   : > { %v14756_v59 = vpop.f32.mrf.mxu0 }
 0x42f   : > { %v14758_v31 = vpop.f32.mrf.mxu0 }
 0x430   : > { %v9064_v34 = vpop.f32.mrf.mxu1 }
 0x431   : > { %v9073_v44 = vadd.f32 %v9064_v34, %v8838_v30 }
 0x432   : > { %v14760_v48 = vpop.f32.mrf.mxu1 }
 0x433   : > { %v14762_v32 = vpop.f32.mrf.mxu0  ;;  %v9308_v49 = vadd.f32 %v9299_v39, %v9073_v44 }
 0x435   : > { %v14764_v17 = vpop.f32.mrf.mxu0 }
 0x436   : > { %v14766_v47 = vpop.f32.mrf.mxu1 }
 0x438   : > { %v14768_v57 = vpop.f32.mrf.mxu1 }
 0x439   : > { %v9769_v13 = vpop.f32.mrf.mxu0 }
 0x43b   : > { %v14770_v12 = vpop.f32.mrf.mxu0 }
 0x43c   : > { %v9392_v5 = vpop.f32.mrf.mxu1 }
 0x43e   : > { %v14772_v42 = vpop.f32.mrf.mxu1 }
 0x43f   : > { %v14774_v35 = vpop.f32.mrf.mxu0 }
 0x441   : > { %v14776_v38 = vpop.f32.mrf.mxu0 }
 0x442   : > { %v9534_v62 = vpop.f32.mrf.mxu1 }
 0x443   : > { %v9543_v2 = vadd.f32 %v9534_v62, %v9308_v49 }
 0x444   : > { %v14778_v50 = vpop.f32.mrf.mxu1 }
 0x445   : > { %v14780_v26 = vpop.f32.mrf.mxu0  ;;  %v9778_v53 = vadd.f32 %v9769_v13, %v9543_v2 }
 0x447   : > { %v14782_v10 = vpop.f32.mrf.mxu0 }
 0x448   : > { %v14784_v33 = vpop.f32.mrf.mxu1 }
 0x44a   : > { %v14786_v19 = vpop.f32.mrf.mxu1 }
 0x44b   : > { %v10239_v51 = vpop.f32.mrf.mxu0 }
 0x44d   : > { %v14788_v23 = vpop.f32.mrf.mxu0 }
 0x44e   : > { %v9862_v7 = vpop.f32.mrf.mxu1 }
 0x450   : > { %v14790_v58 = vpop.f32.mrf.mxu1 }
 0x451   : > { %v14792_v16 = vpop.f32.mrf.mxu0 }
 0x453   : > { %v14794_v21 = vpop.f32.mrf.mxu0 }
 0x454   : > { %v10004_v60 = vpop.f32.mrf.mxu1 }
 0x455   : > { %v10013_v1 = vadd.f32 %v10004_v60, %v9778_v53 }
 0x456   : > { %v14796_v4 = vpop.f32.mrf.mxu1 }
 0x457   : > { %v14798_v24 = vpop.f32.mrf.mxu0  ;;  %v10248_v30 = vadd.f32 %v10239_v51, %v10013_v1  ;;  %v8599_v1 = vadd.f32 %v14724_v45, %v14700_v37  ;;  %v8836_v37 = vadd.f32 %v14748_v22, %v14718_v6 }
 0x459   : > { %v14800_v29 = vpop.f32.mrf.mxu0 }
 0x45a   : > { %v14802_v55 = vpop.f32.mrf.mxu1 }
 0x45c   : > { %v14804_v54 = vpop.f32.mrf.mxu1 }
 0x45d   : > { %v10709_v8 = vpop.f32.mrf.mxu0 }
 0x45f   : > { %v14806_v15 = vpop.f32.mrf.mxu0 }
 0x460   : > { %v10332_v39 = vpop.f32.mrf.mxu1 }
 0x462   : > { %v14808_v34 = vpop.f32.mrf.mxu1 }
 0x463   : > { %v14810_v44 = vpop.f32.mrf.mxu0 }
 0x464   : > { %15067 = vst [vmem:[#allocation17_spill] sm:$0xff] %v14810_v44 }
 0x465   : > { %v14812_v49 = vpop.f32.mrf.mxu0 }
 0x466   : > { %15068 = vst [vmem:[#allocation18_spill] sm:$0xff] %v14812_v49  ;;  %v10474_v13 = vpop.f32.mrf.mxu1 }
 0x467   : > { %v10483_v62 = vadd.f32 %v10474_v13, %v10248_v30  ;;  %v8834_v30 = vadd.f32 %v14706_v25, %v8599_v1 }
 0x468   : > { %v14814_v2 = vpop.f32.mrf.mxu1 }
 0x469   : > { %v14816_v53 = vpop.f32.mrf.mxu0  ;;  %v10718_v51 = vadd.f32 %v10709_v8, %v10483_v62  ;;  %v8604_v8 = vadd.f32 %v14741_v11, %v14712_v20  ;;  %v9069_v62 = vadd.f32 %v8922_v36, %v8834_v30  ;;  %v9072_v36 = vadd.f32 %v14733_v0, %v8837_v56 }
 0x46a   : > { %15069 = vst [vmem:[#allocation19_spill] sm:$0xff] %v14816_v53 }
 0x46b   : > { %v14818_v60 = vpop.f32.mrf.mxu0  ;;  %v8839_v25 = vadd.f32 %v14720_v63, %v8604_v8  ;;  %v9304_v1 = vadd.f32 %v14743_v46, %v9069_v62  ;;  %v9307_v46 = vadd.f32 %v14768_v57, %v9072_v36 }
 0x46c   : > { %15070 = vst [vmem:[#allocation20_spill] sm:$0xff] %v14818_v60  ;;  %v14822_v14 = vpop.f32.mrf.mxu1  ;;  %v8835_v60 = vadd.f32 %v14710_v52, %v8600_v9  ;;  %v9071_v9 = vadd.f32 %v14730_v41, %v8836_v37 }
 0x46d   : > { %v9074_v52 = vadd.f32 %v14760_v48, %v8839_v25  ;;  %v9539_v11 = vadd.f32 %v9392_v5, %v9304_v1 }
 0x46e   : > { %v14826_v3 = vpop.f32.mrf.mxu1  ;;  %v9070_v45 = vadd.f32 %v14754_v40, %v8835_v60  ;;  %v9306_v27 = vadd.f32 %v14766_v47, %v9071_v9 }
 0x46f   : > { %v11179_v49 = vpop.f32.mrf.mxu0  ;;  %v9309_v48 = vadd.f32 %v14752_v28, %v9074_v52  ;;  %v9774_v41 = vadd.f32 %v14762_v32, %v9539_v11 }
 0x470   : > { %v9305_v6 = vadd.f32 %v14746_v18, %v9070_v45  ;;  %v9541_v8 = vadd.f32 %v14756_v59, %v9306_v27 }
 0x471   : > { %v14829_v13 = vpop.f32.mrf.mxu0  ;;  %v9544_v18 = vadd.f32 %v14778_v50, %v9309_v48  ;;  %v10009_v0 = vadd.f32 %v9862_v7, %v9774_v41 }
 0x472   : > { %v10802_v44 = vpop.f32.mrf.mxu1  ;;  %v9540_v43 = vadd.f32 %v14772_v42, %v9305_v6  ;;  %v9542_v42 = vadd.f32 %v14758_v31, %v9307_v46  ;;  %v9776_v62 = vadd.f32 %v14784_v33, %v9541_v8  ;;  %v15074_v46 = vld [vmem:[#allocation18_spill] sm:$0xff] }
 0x473   : > { %v9779_v32 = vadd.f32 %v14770_v12, %v9544_v18  ;;  %v10244_v50 = vadd.f32 %v14780_v26, %v10009_v0  ;;  %v15073_v27 = vld [vmem:[#allocation20_spill] sm:$0xff] }
 0x474   : > { %v10804_v61 = vpop.f32.mrf.mxu1  ;;  %v9777_v28 = vadd.f32 %v14786_v19, %v9542_v42  ;;  %v10011_v7 = vadd.f32 %v14774_v35, %v9776_v62 }
 0x475   : > { %v14839_v53 = vpop.f32.mrf.mxu0  ;;  %v10014_v59 = vadd.f32 %v14796_v4, %v9779_v32 }
 0x476   : > { %v10012_v33 = vadd.f32 %v14776_v38, %v9777_v28 }
 0x477   : > { %v14843_v20 = vpop.f32.mrf.mxu0  ;;  %v10249_v26 = vadd.f32 %v14788_v23, %v10014_v59 }
 0x478   : > { %v10944_v22 = vpop.f32.mrf.mxu1  ;;  %v10247_v12 = vadd.f32 %v14804_v54, %v10012_v33 }
 0x479   : > { %v10953_v40 = vadd.f32 %v10944_v22, %v10718_v51  ;;  %v9775_v51 = vadd.f32 %v14764_v17, %v9540_v43  ;;  %v10479_v17 = vadd.f32 %v10332_v39, %v10244_v50  ;;  %v10484_v35 = vadd.f32 %v14814_v2, %v10249_v26  ;;  %v15071_v2 = vld [vmem:[#allocation19_spill] sm:$0xff] }
 0x47a   : > { %v10946_v63 = vpop.f32.mrf.mxu1 }
 0x47b   : > { %v11507_v60 = vpop.f32.mrf.mxu0  ;;  %v11188_v30 = vadd.f32 %v11179_v49, %v10953_v40  ;;  %v10010_v57 = vadd.f32 %v14790_v58, %v9775_v51  ;;  %v10246_v58 = vadd.f32 %v14802_v55, %v10011_v7  ;;  %v10714_v4 = vadd.f32 %v14798_v24, %v10479_v17  ;;  %v15075_v51 = vld [vmem:[#allocation14_spill] sm:$0xff] }
 0x47c   : > { %v10482_v55 = vadd.f32 %v14794_v21, %v10247_v12  ;;  %v10719_v22 = vadd.f32 %v14806_v15, %v10484_v35  ;;  %v12140_v32 = vsub.s32 0, %v15075_v51  ;;  %v12160_v17 = vsub.s32 5, %v15075_v51 }
 0x47d   : > { %v11509_v5 = vpop.f32.mrf.mxu0  ;;  %v10245_v45 = vadd.f32 %v14782_v10, %v10010_v57  ;;  %v10481_v10 = vadd.f32 %v14792_v16, %v10246_v58  ;;  %v10949_v39 = vadd.f32 %v10802_v44, %v10714_v4  ;;  %v15072_v44 = vld [vmem:[#allocation17_spill] sm:$0xff] }
 0x47e   : > { %v11108_v47 = vpop.f32.mrf.mxu1  ;;  %v10717_v23 = vadd.f32 %v14826_v3, %v10482_v55  ;;  %v10954_v16 = vadd.f32 %v10946_v63, %v10719_v22  ;;  %v12144_v63 = vsub.s32 1, %v15075_v51  ;;  %v15077_v22 = vld [vmem:[#allocation16_spill] sm:$0xff] }
 0x47f   : > { %v10480_v19 = vadd.f32 %v14808_v34, %v10245_v45  ;;  %v10716_v34 = vadd.f32 %v14822_v14, %v10481_v10  ;;  %v11184_v36 = vadd.f32 %v15071_v2, %v10949_v39 }
 0x480   : > { %v11110_v49 = vpop.f32.mrf.mxu1  ;;  %v11189_v18 = vadd.f32 %v14829_v13, %v10954_v16 }
 0x481   : > { %v11649_v37 = vpop.f32.mrf.mxu0  ;;  %v10715_v38 = vadd.f32 %v14800_v29, %v10480_v19  ;;  %v10951_v40 = vadd.f32 %v15072_v44, %v10716_v34  ;;  %v12331_v44 = vld [vmem:[#allocation8 + $0x4e8] sm:$0xff] }
 0x483   : > { %v11651_v56 = vpop.f32.mrf.mxu0  ;;  %v10950_v11 = vadd.f32 %v10804_v61, %v10715_v38  ;;  %v11186_v61 = vadd.f32 %v11108_v47, %v10951_v40 }
 0x484   : > { %v11272_v31 = vpop.f32.mrf.mxu1 }
 0x485   : > { %v11419_v29 = vadd.f32 %v11272_v31, %v11184_v36  ;;  %v11185_v43 = vadd.f32 %v15073_v27, %v10950_v11  ;;  %v11421_v62 = vadd.f32 %v14839_v53, %v11186_v61  ;;  %v15076_v53 = vld [vmem:[#allocation15_spill] sm:$0xff] }
 0x486   : > { %v11274_v25 = vpop.f32.mrf.mxu1 }
 0x487   : > { %v11813_v1 = vpop.f32.mrf.mxu0  ;;  %v11420_v48 = vadd.f32 %v11274_v25, %v11185_v43  ;;  %v11654_v8 = vadd.f32 %v11507_v60, %v11419_v29  ;;  %v12152_v25 = vsub.s32 3, %v15075_v51  ;;  %v12330_v29 = vld [vmem:[#allocation8 + $0x4e0] sm:$0xff]  ;;  %v12329_v43 = vld [vmem:[#allocation8 + $0x4d8] sm:$0xff] }
 0x489   : > { %v11815_v6 = vpop.f32.mrf.mxu0  ;;  %v11655_v28 = vadd.f32 %v11509_v5, %v11420_v48  ;;  %v12145_v5 = vrot.slane %v15076_v53, %v12144_v63  ;;  %v12326_v48 = vld [vmem:[#allocation8 + $0x4c0] sm:$0xff] }
 0x48a   : > { %v11414_v52 = vpop.f32.mrf.mxu1 }
 0x48b   : > { %v11423_v9 = vadd.f32 %v11414_v52, %v11188_v30  ;;  %v10952_v30 = vadd.f32 %v15074_v46, %v10717_v23  ;;  %v12161_v52 = vrot.slane %v15076_v53, %v12160_v17  ;;  %v12328_v46 = vld [vmem:[#allocation8 + $0x4d0] sm:$0xff]  ;;  %v12307_v17 = vld [vmem:[#allocation8 + $0x428] sm:$0xff] }
 0x48c   : > { %v11416_v54 = vpop.f32.mrf.mxu1 }
 0x48d   : > { %v11658_v24 = vadd.f32 %v11649_v37, %v11423_v9  ;;  %v11977_v14 = vpop.f32.mrf.mxu0  ;;  %v11187_v3 = vadd.f32 %v11110_v49, %v10952_v30  ;;  %v11424_v42 = vadd.f32 %v11416_v54, %v11189_v18  ;;  %v12323_v18 = vld [vmem:[#allocation8 + $0x4a8] sm:$0xff] }
 0x48f   : > { %v11979_v15 = vpop.f32.mrf.mxu0  ;;  %v11422_v37 = vadd.f32 %v14843_v20, %v11187_v3  ;;  %v11659_v33 = vadd.f32 %v11651_v56, %v11424_v42  ;;  %v12141_v20 = vrot.slane %v15076_v53, %v12140_v32  ;;  %v12148_v56 = vsub.s32 2, %v15075_v51  ;;  %v12324_v3 = vld [vmem:[#allocation8 + $0x4b0] sm:$0xff]  ;;  %v12319_v42 = vld [vmem:[#allocation8 + $0x488] sm:$0xff]  ;;  %v12625_v51 = vld [vmem:[%s15038_s8] sm:$0x1] }
 0x490   : > { %v11578_v21 = vpop.f32.mrf.mxu1 }
 0x491   : > { %v11656_v50 = vadd.f32 %v11578_v21, %v11421_v62  ;;  %v12318_v62 = vld [vmem:[#allocation8 + $0x480] sm:$0xff] }
 0x492   : > { %v11580_v41 = vpop.f32.mrf.mxu1 }
 0x493   : > { %v11657_v7 = vadd.f32 %v11580_v41, %v11422_v37  ;;  %v12119_v13 = vpop.f32.mrf.mxu0  ;;  %v11891_v35 = vadd.f32 %v11813_v1, %v11656_v50  ;;  %v12153_v1 = vrot.slane %v15076_v53, %v12152_v25  ;;  %v12325_v41 = vld [vmem:[#allocation8 + $0x4b8] sm:$0xff]  ;;  %v12315_v37 = vld [vmem:[#allocation8 + $0x468] sm:$0xff]  ;;  %v12362_v25 = vld [vmem:[#allocation8 + $0x5e0] sm:$0xff] }
 0x494   : > { %v12313_v50 = vld [vmem:[#allocation8 + $0x458] sm:$0xff] }
 0x495   : > { %v11742_v0 = vpop.f32.mrf.mxu1  ;;  %v12121_v10 = vpop.f32.mrf.mxu0  ;;  %v11892_v38 = vadd.f32 %v11815_v6, %v11657_v7  ;;  %v12149_v6 = vrot.slane %v15076_v53, %v12148_v56  ;;  %v12310_v7 = vld [vmem:[#allocation8 + $0x440] sm:$0xff]  ;;  %v12303_v53 = vld [vmem:[#allocation8 + $0x408] sm:$0xff] }
 0x496   : > { %v11889_v57 = vadd.f32 %v11742_v0, %v11654_v8  ;;  %v12322_v8 = vld [vmem:[#allocation8 + $0x4a0] sm:$0xff]  ;;  %v12320_v0 = vld [vmem:[#allocation8 + $0x490] sm:$0xff]  ;;  %v12355_v56 = vld [vmem:[#allocation8 + $0x5a8] sm:$0xff] }
 0x497   : > { %v11744_v47 = vpop.f32.mrf.mxu1 }
 0x498   : > { %v12124_v59 = vadd.f32 %v11977_v14, %v11889_v57  ;;  %v11890_v49 = vadd.f32 %v11744_v47, %v11655_v28  ;;  %v12327_v14 = vld [vmem:[#allocation8 + $0x4c8] sm:$0xff]  ;;  %v12317_v57 = vld [vmem:[#allocation8 + $0x478] sm:$0xff]  ;;  %v12316_v28 = vld [vmem:[#allocation8 + $0x470] sm:$0xff] }
 0x499   : > { %v11884_v60 = vpop.f32.mrf.mxu1  ;;  %v12314_v47 = vld [vmem:[#allocation8 + $0x460] sm:$0xff] }
 0x49a   : > { %v12125_v45 = vadd.f32 %v11979_v15, %v11890_v49  ;;  %v11893_v31 = vadd.f32 %v11884_v60, %v11658_v24  ;;  %v12130_v58 = vmul.f32 0.0625, %v12124_v59  ;;  %v12332_v24 = vld [vmem:[#allocation8 + $0x4f0] sm:$0xff]  ;;  %v12321_v15 = vld [vmem:[#allocation8 + $0x498] sm:$0xff]  ;;  %v12311_v49 = vld [vmem:[#allocation8 + $0x448] sm:$0xff] }
 0x49b   : > { %v11886_v19 = vpop.f32.mrf.mxu1  ;;  %v12312_v59 = vld [vmem:[#allocation8 + $0x450] sm:$0xff] }
 0x49c   : > { %v12131_v12 = vmul.f32 0.0625, %v12125_v45  ;;  %v12128_v26 = vadd.f32 %v12119_v13, %v11893_v31  ;;  %v11894_v4 = vadd.f32 %v11886_v19, %v11659_v33  ;;  %v12168_v54 = vadd.f32 %v12141_v20, %v12130_v58  ;;  %v12309_v13 = vld [vmem:[#allocation8 + $0x438] sm:$0xff]  ;;  %v12308_v60 = vld [vmem:[#allocation8 + $0x430] sm:$0xff]  ;;  %v12306_v45 = vld [vmem:[#allocation8 + $0x420] sm:$0xff] }
 0x49d   : > { %v12048_v39 = vpop.f32.mrf.mxu1  ;;  %v12305_v31 = vld [vmem:[#allocation8 + $0x418] sm:$0xff]  ;;  %v12304_v33 = vld [vmem:[#allocation8 + $0x410] sm:$0xff]  ;;  %v12363_v19 = vld [vmem:[#allocation8 + $0x5e8] sm:$0xff] }
 0x49e   : > { %v12134_v55 = vmul.f32 0.0625, %v12128_v26  ;;  %v12129_v9 = vadd.f32 %v12121_v10, %v11894_v4  ;;  %v12126_v34 = vadd.f32 %v12048_v39, %v11891_v35  ;;  %v12169_v11 = vadd.f32 %v12145_v5, %v12131_v12  ;;  %v12302_v5 = vld [vmem:[#allocation8 + $0x400] sm:$0xff]  ;;  %v12365_v58 = vld [vmem:[#allocation8 + $0x5f8] sm:$0xff]  ;;  %v12364_v20 = vld [vmem:[#allocation8 + $0x5f0] sm:$0xff] }
 0x49f   : > { %v12050_v23 = vpop.f32.mrf.mxu1  ;;  %v12361_v12 = vld [vmem:[#allocation8 + $0x5d8] sm:$0xff]  ;;  %v12360_v26 = vld [vmem:[#allocation8 + $0x5d0] sm:$0xff]  ;;  %v12359_v4 = vld [vmem:[#allocation8 + $0x5c8] sm:$0xff] }
 0x4a0   : > { %v14899_v2 = vadd.f32 %v15077_v22, %v12134_v55  ;;  %v12135_v36 = vmul.f32 0.0625, %v12129_v9  ;;  %v12127_v16 = vadd.f32 %v12050_v23, %v11892_v38  ;;  %12442 = vmatprep.mubr.f32.mxu1 %v12169_v11  ;;  %v12132_v40 = vmul.f32 0.0625, %v12126_v34  ;;  %v12358_v35 = vld [vmem:[#allocation8 + $0x5c0] sm:$0xff]  ;;  %v12357_v10 = vld [vmem:[#allocation8 + $0x5b8] sm:$0xff]  ;;  %v12356_v39 = vld [vmem:[#allocation8 + $0x5b0] sm:$0xff] }
 0x4a1   : > { %12443 = vmatmul.mubr.f32.vlgmr.msra.gmra.mxu1 %v12168_v54  ;;  %v12354_v38 = vld [vmem:[#allocation8 + $0x5a0] sm:$0xff]  ;;  %v12352_v55 = vld [vmem:[#allocation8 + $0x590] sm:$0xff]  ;;  %v12351_v9 = vld [vmem:[#allocation8 + $0x588] sm:$0xff] }
 0x4a2   : > { %v12133_v27 = vmul.f32 0.0625, %v12127_v16  ;;  %12521 = vmatpush1.msra.mxu1 %v12332_v24  ;;  %v12173_v21 = vadd.f32 %v12161_v52, %v12135_v36  ;;  %v12170_v61 = vadd.f32 %v12149_v6, %v12132_v40  ;;  %v12353_v52 = vld [vmem:[#allocation8 + $0x598] sm:$0xff]  ;;  %v12350_v34 = vld [vmem:[#allocation8 + $0x580] sm:$0xff]  ;;  %v12348_v54 = vld [vmem:[#allocation8 + $0x570] sm:$0xff] }
 0x4a3   : > { %12522 = vmatprep.subr.mxu1 %v12331_v44  ;;  %v12349_v11 = vld [vmem:[#allocation8 + $0x578] sm:$0xff]  ;;  %v12347_v23 = vld [vmem:[#allocation8 + $0x568] sm:$0xff]  ;;  %v12346_v24 = vld [vmem:[#allocation8 + $0x560] sm:$0xff] }
 0x4a4   : > { %v12171_v30 = vadd.f32 %v12153_v1, %v12133_v27  ;;  %12523 = vmatpush1.msra.mxu1 %v12330_v29  ;;  %12584 = vmatprep.mubr.f32.mxu1 %v12173_v21  ;;  %v12345_v22 = vld [vmem:[#allocation8 + $0x558] sm:$0xff]  ;;  %v12344_v36 = vld [vmem:[#allocation8 + $0x550] sm:$0xff]  ;;  %v12343_v16 = vld [vmem:[#allocation8 + $0x548] sm:$0xff] }
 0x4a5   : > { %12524 = vmatprep.subr.mxu1 %v12329_v43  ;;  %v12342_v1 = vld [vmem:[#allocation8 + $0x540] sm:$0xff]  ;;  %v12341_v44 = vld [vmem:[#allocation8 + $0x538] sm:$0xff]  ;;  %v12340_v40 = vld [vmem:[#allocation8 + $0x530] sm:$0xff] }
 0x4a6   : > { %12525 = vmatpush1.msra.mxu1 %v12328_v46  ;;  %12513 = vmatprep.mubr.f32.mxu0 %v12171_v30  ;;  %v12339_v6 = vld [vmem:[#allocation8 + $0x528] sm:$0xff]  ;;  %v12338_v29 = vld [vmem:[#allocation8 + $0x520] sm:$0xff]  ;;  %v12337_v27 = vld [vmem:[#allocation8 + $0x518] sm:$0xff] }
 0x4a7   : > { %12526 = vmatprep.subr.mxu1 %v12327_v14  ;;  %12514 = vmatmul.mubr.f32.vlgmr.msra.gmra.mxu0 %v12170_v61  ;;  %v12336_v43 = vld [vmem:[#allocation8 + $0x510] sm:$0xff]  ;;  %v12335_v21 = vld [vmem:[#allocation8 + $0x508] sm:$0xff]  ;;  %v12334_v46 = vld [vmem:[#allocation8 + $0x500] sm:$0xff] }
 0x4a8   : > { %12527 = vmatpush1.msra.mxu1 %v12326_v48  ;;  %v12624_v30 = vld [vmem:[%s15037_s7 + $0xf8] sm:$0xff]  ;;  %v12623_v61 = vld [vmem:[%s15037_s7 + $0xf0] sm:$0xff] }
 0x4a9   : > { %12528 = vmatprep.subr.mxu1 %v12325_v41  ;;  %v12608_v14 = vld [vmem:[%s15037_s7 + $0x78] sm:$0xff]  ;;  %13061 = vmatprep.subr.mxu0 %v12624_v30  ;;  %v12607_v48 = vld [vmem:[%s15037_s7 + $0x70] sm:$0xff]  ;;  %v12606_v41 = vld [vmem:[%s15037_s7 + $0x68] sm:$0xff] }
 0x4aa   : > { %12529 = vmatpush1.msra.mxu1 %v12324_v3  ;;  %13062 = vmatpush3.msra.mxu0 %v12608_v14  ;;  %v12621_v3 = vld [vmem:[%s15037_s7 + $0xe0] sm:$0xff] }
 0x4ab   : > { %12530 = vmatprep.subr.mxu1 %v12323_v18  ;;  %13063 = vmatprep.subr.mxu0 %v12623_v61  ;;  %v12605_v18 = vld [vmem:[%s15037_s7 + $0x60] sm:$0xff] }
 0x4ac   : > { %12531 = vmatpush1.msra.mxu1 %v12322_v8  ;;  %13064 = vmatpush3.msra.mxu0 %v12607_v48  ;;  %v12620_v8 = vld [vmem:[%s15037_s7 + $0xd8] sm:$0xff] }
 0x4ad   : > { %12532 = vmatprep.subr.mxu1 %v12321_v15  ;;  %v12604_v15 = vld [vmem:[%s15037_s7 + $0x58] sm:$0xff] }
 0x4ae   : > { %12533 = vmatpush1.msra.mxu1 %v12320_v0  ;;  %v12619_v0 = vld [vmem:[%s15037_s7 + $0xd0] sm:$0xff] }
 0x4af   : > { %12534 = vmatprep.subr.mxu1 %v12319_v42  ;;  %v12603_v42 = vld [vmem:[%s15037_s7 + $0x50] sm:$0xff] }
 0x4b0   : > { %12535 = vmatpush1.msra.mxu1 %v12318_v62  ;;  %v12618_v62 = vld [vmem:[%s15037_s7 + $0xc8] sm:$0xff] }
 0x4b1   : > { %12536 = vmatprep.subr.mxu1 %v12317_v57  ;;  %v12602_v57 = vld [vmem:[%s15037_s7 + $0x48] sm:$0xff] }
 0x4b2   : > { %12537 = vmatpush1.msra.mxu1 %v12316_v28  ;;  %v12617_v28 = vld [vmem:[%s15037_s7 + $0xc0] sm:$0xff] }
 0x4b3   : > { %12538 = vmatprep.subr.mxu1 %v12315_v37  ;;  %v12601_v37 = vld [vmem:[%s15037_s7 + $0x40] sm:$0xff] }
 0x4b4   : > { %12539 = vmatpush1.msra.mxu1 %v12314_v47  ;;  %v12616_v47 = vld [vmem:[%s15037_s7 + $0xb8] sm:$0xff] }
 0x4b5   : > { %12540 = vmatprep.subr.mxu1 %v12313_v50  ;;  %v12600_v50 = vld [vmem:[%s15037_s7 + $0x38] sm:$0xff] }
 0x4b6   : > { %12541 = vmatpush1.msra.mxu1 %v12312_v59  ;;  %v12615_v59 = vld [vmem:[%s15037_s7 + $0xb0] sm:$0xff] }
 0x4b7   : > { %12542 = vmatprep.subr.mxu1 %v12311_v49  ;;  %v12599_v49 = vld [vmem:[%s15037_s7 + $0x30] sm:$0xff] }
 0x4b8   : > { %12543 = vmatpush1.msra.mxu1 %v12310_v7  ;;  %v12614_v7 = vld [vmem:[%s15037_s7 + $0xa8] sm:$0xff] }
 0x4b9   : > { %12544 = vmatprep.subr.mxu1 %v12309_v13  ;;  %v12598_v13 = vld [vmem:[%s15037_s7 + $0x28] sm:$0xff] }
 0x4ba   : > { %12545 = vmatpush1.msra.mxu1 %v12308_v60  ;;  %v12613_v60 = vld [vmem:[%s15037_s7 + $0xa0] sm:$0xff] }
 0x4bb   : > { %12546 = vmatprep.subr.mxu1 %v12307_v17  ;;  %v12597_v17 = vld [vmem:[%s15037_s7 + $0x20] sm:$0xff] }
 0x4bc   : > { %12547 = vmatpush1.msra.mxu1 %v12306_v45  ;;  %v12612_v45 = vld [vmem:[%s15037_s7 + $0x98] sm:$0xff] }
 0x4bd   : > { %12548 = vmatprep.subr.mxu1 %v12305_v31  ;;  %v12596_v31 = vld [vmem:[%s15037_s7 + $0x18] sm:$0xff] }
 0x4be   : > { %12549 = vmatpush1.msra.mxu1 %v12304_v33  ;;  %v12611_v33 = vld [vmem:[%s15037_s7 + $0x90] sm:$0xff] }
 0x4bf   : > { %12550 = vmatprep.subr.mxu1 %v12303_v53  ;;  %v12595_v53 = vld [vmem:[%s15037_s7 + $0x10] sm:$0xff] }
 0x4c0   : > { %12551 = vmatpush1.msra.mxu1 %v12302_v5  ;;  %v12610_v5 = vld [vmem:[%s15037_s7 + $0x88] sm:$0xff] }
 0x4c1   : > { %12552 = vmatprep.subr.mxu1 %v12365_v58  ;;  %v12594_v58 = vld [vmem:[%s15037_s7 + $0x8] sm:$0xff] }
 0x4c2   : > { %12553 = vmatpush2.msra.mxu1 %v12364_v20  ;;  %v12609_v20 = vld [vmem:[%s15037_s7 + $0x80] sm:$0xff] }
 0x4c3   : > { %12554 = vmatprep.subr.mxu1 %v12363_v19  ;;  %v12593_v19 = vld [vmem:[%s15037_s7] sm:$0xff] }
 0x4c4   : > { %12555 = vmatpush2.msra.mxu1 %v12362_v25  ;;  %v12366_v25 = vld [vmem:[#allocation10] sm:$0x3] }
 0x4c5   : > { %12556 = vmatprep.subr.mxu1 %v12361_v12 }
 0x4c6   : > { %12557 = vmatpush2.msra.mxu1 %v12360_v26  ;;  %v12371_v26 = vrot.slane %v12366_v25, %v12140_v32 }
 0x4c7   : > { %12558 = vmatprep.subr.mxu1 %v12359_v4 }
 0x4c8   : > { %12559 = vmatpush2.msra.mxu1 %v12358_v35  ;;  %v12375_v35 = vrot.slane %v12366_v25, %v12144_v63 }
 0x4c9   : > { %12560 = vmatprep.subr.mxu1 %v12357_v10 }
 0x4ca   : > { %12561 = vmatpush2.msra.mxu1 %v12356_v39 }
 0x4cb   : > { %12562 = vmatprep.subr.mxu1 %v12355_v56 }
 0x4cc   : > { %12563 = vmatpush2.msra.mxu1 %v12354_v38 }
 0x4cd   : > { %12564 = vmatprep.subr.mxu1 %v12353_v52 }
 0x4ce   : > { %12565 = vmatpush2.msra.mxu1 %v12352_v55 }
 0x4cf   : > { %12566 = vmatprep.subr.mxu1 %v12351_v9 }
 0x4d0   : > { %12567 = vmatpush2.msra.mxu1 %v12350_v34 }
 0x4d1   : > { %12568 = vmatprep.subr.mxu1 %v12349_v11 }
 0x4d2   : > { %12569 = vmatpush2.msra.mxu1 %v12348_v54 }
 0x4d3   : > { %12570 = vmatprep.subr.mxu1 %v12347_v23 }
 0x4d4   : > { %12571 = vmatpush2.msra.mxu1 %v12346_v24 }
 0x4d5   : > { %12572 = vmatprep.subr.mxu1 %v12345_v22 }
 0x4d6   : > { %12573 = vmatpush2.msra.mxu1 %v12344_v36 }
 0x4d7   : > { %12574 = vmatprep.subr.mxu1 %v12343_v16 }
 0x4d8   : > { %12575 = vmatpush2.msra.mxu1 %v12342_v1 }
 0x4d9   : > { %12576 = vmatprep.subr.mxu1 %v12341_v44 }
 0x4da   : > { %12577 = vmatpush2.msra.mxu1 %v12340_v40 }
 0x4db   : > { %12578 = vmatprep.subr.mxu1 %v12339_v6 }
 0x4dc   : > { %12579 = vmatpush2.msra.mxu1 %v12338_v29 }
 0x4dd   : > { %12580 = vmatprep.subr.mxu1 %v12337_v27 }
 0x4de   : > { %12581 = vmatpush2.msra.mxu1 %v12336_v43 }
 0x4df   : > { %12582 = vmatprep.subr.mxu1 %v12335_v21 }
 0x4e0   : > { %12583 = vmatpush2.msra.mxu1 %v12334_v46 }
 0x4e1   : > { %12585 = vmatmul.mubr.f32.vlgmr.msra.gmra.mxu1 %v14899_v2  ;;  %v12622_v2 = vld [vmem:[%s15037_s7 + $0xe8] sm:$0xff] }
 0x4e2   : > { %13065 = vmatprep.subr.mxu0 %v12622_v2 }
 0x4e3   : > { %13066 = vmatpush3.msra.mxu0 %v12606_v41 }
 0x4e4   : > { %13067 = vmatprep.subr.mxu0 %v12621_v3 }
 0x4e5   : > { %13068 = vmatpush3.msra.mxu0 %v12605_v18 }
 0x4e6   : > { %13069 = vmatprep.subr.mxu0 %v12620_v8 }
 0x4e7   : > { %13070 = vmatpush3.msra.mxu0 %v12604_v15 }
 0x4e8   : > { %13071 = vmatprep.subr.mxu0 %v12619_v0 }
 0x4e9   : > { %13072 = vmatpush3.msra.mxu0 %v12603_v42 }
 0x4ea   : > { %13073 = vmatprep.subr.mxu0 %v12618_v62 }
 0x4eb   : > { %13074 = vmatpush3.msra.mxu0 %v12602_v57 }
 0x4ec   : > { %13075 = vmatprep.subr.mxu0 %v12617_v28 }
 0x4ed   : > { %13076 = vmatpush3.msra.mxu0 %v12601_v37 }
 0x4ee   : > { %13077 = vmatprep.subr.mxu0 %v12616_v47 }
 0x4ef   : > { %13078 = vmatpush3.msra.mxu0 %v12600_v50 }
 0x4f0   : > { %13079 = vmatprep.subr.mxu0 %v12615_v59 }
 0x4f1   : > { %13080 = vmatpush3.msra.mxu0 %v12599_v49 }
 0x4f2   : > { %13081 = vmatprep.subr.mxu0 %v12614_v7 }
 0x4f3   : > { %13082 = vmatpush3.msra.mxu0 %v12598_v13 }
 0x4f4   : > { %13083 = vmatprep.subr.mxu0 %v12613_v60 }
 0x4f5   : > { %13084 = vmatpush3.msra.mxu0 %v12597_v17 }
 0x4f6   : > { %13085 = vmatprep.subr.mxu0 %v12612_v45 }
 0x4f7   : > { %13086 = vmatpush3.msra.mxu0 %v12596_v31 }
 0x4f8   : > { %13087 = vmatprep.subr.mxu0 %v12611_v33 }
 0x4f9   : > { %13088 = vmatpush3.msra.mxu0 %v12595_v53 }
 0x4fa   : > { %13089 = vmatprep.subr.mxu0 %v12610_v5 }
 0x4fb   : > { %13090 = vmatpush3.msra.mxu0 %v12594_v58 }
 0x4fc   : > { %13091 = vmatprep.subr.mxu0 %v12609_v20 }
 0x4fd   : > { %13092 = vmatpush3.msra.mxu0 %v12593_v19 }
 0x561   : > { %v12444_v12 = vpop.f32.mrf.mxu1 }
 0x562   : > { %v12445_v39 = vadd.f32 %v12444_v12, %v12371_v26 }
 0x563   : > { %v12446_v10 = vpop.f32.mrf.mxu1 }
 0x564   : > { %v12447_v38 = vadd.f32 %v12446_v10, %v12375_v35 }
 0x567   : > { %v12515_v4 = vpop.f32.mrf.mxu0 }
 0x568   : > { %v12516_v52 = vadd.f32 %v12515_v4, %v12445_v39 }
 0x569   : > { %v12517_v56 = vpop.f32.mrf.mxu0 }
 0x56a   : > { %v12518_v9 = vadd.f32 %v12517_v56, %v12447_v38 }
 0x5a1   : > { %v12586_v55 = vpop.f32.mrf.mxu1 }
 0x5a2   : > { %v12587_v34 = vadd.f32 %v12586_v55, %v12516_v52 }
 0x5a3   : > { %v12588_v11 = vpop.f32.mrf.mxu1 }
 0x5a4   : > { %v12589_v54 = vadd.f32 %v12588_v11, %v12518_v9  ;;  %v12591_v24 = vmax.f32 %v12587_v34, 0.0 }
 0x5a6   : > { %v12592_v23 = vmax.f32 %v12589_v54, 0.0 }
 0x5a8   : > { %12690 = vmatprep.mubr.f32.mxu0 %v12592_v23 }
 0x5a9   : > { %12691 = vmatmul.mubr.f32.vlgmr.msra.gmra.mxu0 %v12591_v24 }
 0x669   : > { %v13093_v32 = vpop.f32.mrf.mxu0 }
 0x66b   : > { %v13094_v63 = vpop.f32.mrf.mxu0 }
 0x66c   : > { %v13095_v22 = vadd.f32 %v13094_v63, %v13093_v32 }
 0x66e   : > { %v12693_v36 = vadd.f32 %v13095_v22, %v12625_v51 }
 0x670   : > { %v13024_v16 = vmul.f32 -1.442695, %v12693_v36 }
 0x672   : > { %13261 = vpow2.f32 %v13024_v16 }
 0x67f   : > { %v13262_v1 = vpop.eup %13261 }
 0x680   : > { %v12699_v44 = vadd.f32 1.0, %v13262_v1 }
 0x682   : > { %13263 = vrcp.f32 %v12699_v44 }
 0x68f   : > { %v13264_v40 = vpop.eup %13263 }
 0x690   : > { %v12702_v6 = vmul.f32 10.0, %v13264_v40 }
 0x692   : > { %12703 = vst [vmem:[%s420_s4] sm:$0x1] %v12702_v6 }
 0x693 PF: > { %s24_s14 = sadd.s32 1, %s13455_s14   ;;  %s15078_s30 = smov %s13439_s10 }
 0x694   : > { %p21_p3 = scmp.ge.s32.totalorder %s24_s14, 4   ;;  %s15079_s10 = smov %s13443_s11 }
 0x695   : > { %s15080_s11 = smov %s13624_s26  ;;  %s15081_s12 = smov %s13451_s13 }
 0x696   : > { %s15082_s13 = smov %s15084_s19  ;;  %23 = sbr.rel (!%p21_p3) target bundleno = 11 (0xb), region = 170 }
 0x69b   :  { %12721 = vsyncpa [#allocation4], 1 }
 0x69c   :  { %12723 = vsyncpa [#allocation4 + $0x1], 1 }
 0x69d   :  { %12724 = vsyncpa [#allocation6], 1 }
 0x69e   :  { %12725 = vsyncpa [#allocation9], 1 }

</bundles_post_ra>
